<compile_context>
chip_gen: v7x
topology: tpu7x:2x2x1
jax: 0.10.0
libtpu: 0.0.40
codegen_flags: <defaults>
</compile_context>

<pallas_src>
import jax
import jax.numpy as jnp
from jax import lax
from jax.experimental import pallas as pl
from jax.experimental.pallas import tpu as pltpu


def _make_residual_group_kernel(N, H, W, C, Cr, R):
    M = N * H * W

    def kernel(x_ref, w1_ref, b1_ref, w2_ref, b2_ref,
               wd_ref, bd_ref, wu_ref, bu_ref,
               wf_ref, bf_ref, pool_ref, bcast_ref,
               o_ref, pad_ref, res_ref):
        # Zero the padded conv scratch once per call.  Only the 1-pixel border
        # must stay zero ("SAME" padding) and it is never written afterwards;
        # the interior is fully overwritten before every conv.
        pad_ref[...] = jnp.zeros((N, H + 2, W + 2, C), jnp.float32)

        def conv3x3(act2d, w_ref, w_idx, bias):
            """3x3 SAME conv over all N images at once.

            act2d : (M, C) value, channels minor
            w_ref : weight ref; w_ref[w_idx + (k,)] is the (C, C) tap weight
            bias  : (1, C) value
            Returns an (M, C) f32 value: 9 full-image MXU matmuls, one per tap.
            """
            # Bulk write of the padded-scratch interior (single strided store).
            pad_ref[:, 1:H + 1, 1:W + 1, :] = act2d.reshape(N, H, W, C)
            acc = jnp.zeros((M, C), jnp.float32)
            for k in range(9):
                dy, dx = divmod(k, 3)
                lhs = pad_ref[:, dy:dy + H, dx:dx + W, :].reshape(M, C)
                acc = acc + jnp.dot(lhs, w_ref[w_idx + (k,)],
                                    preferred_element_type=jnp.float32)
            return acc + bias       # bias broadcast hoisted out of the tap loop

        # Running activation lives in a VMEM scratch (keeps vreg pressure flat).
        res_ref[...] = x_ref[...]

        for r in range(R):          # RCAB blocks (static unroll, R is small)
            # body[0]: conv3x3 -> ReLU
            h1 = jnp.maximum(conv3x3(res_ref[...], w1_ref, (r,), b1_ref[r]),
                             0.0)
            # body[1]: conv3x3
            h2 = conv3x3(h1, w2_ref, (r,), b2_ref[r])

            # CALayer: global average pool as a tiny matmul with the per-image
            # pooling matrix (avoids in-kernel 3-D reductions).
            pool = jnp.dot(pool_ref[...], h2,
                           preferred_element_type=jnp.float32)        # (N, C)
            z = jnp.maximum(jnp.dot(pool, wd_ref[r],
                                    preferred_element_type=jnp.float32)
                            + bd_ref[r], 0.0)                         # (N, Cr)
            logits = (jnp.dot(z, wu_ref[r],
                              preferred_element_type=jnp.float32)
                      + bu_ref[r])                                    # (N, C)
            s = 1.0 / (1.0 + jnp.exp(-logits))                        # sigmoid
            # Broadcast the per-image channel scale to every pixel row (MXU).
            s_full = jnp.dot(bcast_ref[...], s,
                             preferred_element_type=jnp.float32)      # (M, C)
            # channel scale + RCAB skip connection
            res_ref[...] = h2 * s_full + res_ref[...]

        # Trailing conv of the residual group + group-level skip connection.
        hf = conv3x3(res_ref[...], wf_ref, (), bf_ref[...])
        o_ref[...] = hf + x_ref[...]

    return kernel


def residual_group_forward(x, w1s, b1s, w2s, b2s, wds, bds, wus, bus, wf, bf):
    """x: (N, H, W, C) NHWC; 3x3 weights HWIO; stacked over R resblocks."""
    N, H, W, C = x.shape
    R = w1s.shape[0]
    Cr = wds.shape[-1]
    M = N * H * W

    # Channel-minor, batch-folded HBM layout (free reshape in the wrapper).
    x2 = x.reshape(M, C)
    w1k = w1s.reshape(R, 9, C, C)
    w2k = w2s.reshape(R, 9, C, C)
    b1k = b1s.reshape(R, 1, C)
    b2k = b2s.reshape(R, 1, C)
    bdk = bds.reshape(R, 1, Cr)
    buk = bus.reshape(R, 1, C)
    wfk = wf.reshape(9, C, C)
    bfk = bf.reshape(1, C)

    # Per-image pooling / broadcast selection matrices (built once, host side).
    img_id = jnp.repeat(jnp.arange(N, dtype=jnp.int32), H * W)          # (M,)
    bcast = (img_id[:, None] ==
             jnp.arange(N, dtype=jnp.int32)[None, :]).astype(jnp.float32)  # (M, N)
    pool_mat = bcast.T * (1.0 / float(H * W))                            # (N, M)

    kernel = _make_residual_group_kernel(N, H, W, C, Cr, R)

    grid_spec = pltpu.PrefetchScalarGridSpec(
        num_scalar_prefetch=0,
        grid=(1,),                                    # all N images in one step
        in_specs=[
            pl.BlockSpec((M, C), lambda i: (0, 0)),                  # x
            pl.BlockSpec((R, 9, C, C), lambda i: (0, 0, 0, 0)),      # w1 (RCABs)
            pl.BlockSpec((R, 1, C), lambda i: (0, 0, 0)),            # b1
            pl.BlockSpec((R, 9, C, C), lambda i: (0, 0, 0, 0)),      # w2
            pl.BlockSpec((R, 1, C), lambda i: (0, 0, 0)),            # b2
            pl.BlockSpec((R, C, Cr), lambda i: (0, 0, 0)),           # wd (C->C/r)
            pl.BlockSpec((R, 1, Cr), lambda i: (0, 0, 0)),           # bd
            pl.BlockSpec((R, Cr, C), lambda i: (0, 0, 0)),           # wu (C/r->C)
            pl.BlockSpec((R, 1, C), lambda i: (0, 0, 0)),            # bu
            pl.BlockSpec((9, C, C), lambda i: (0, 0, 0)),            # final conv w
            pl.BlockSpec((1, C), lambda i: (0, 0)),                  # final conv b
            pl.BlockSpec((N, M), lambda i: (0, 0)),                  # pooling matrix
            pl.BlockSpec((M, N), lambda i: (0, 0)),                  # broadcast matrix
        ],
        out_specs=pl.BlockSpec((M, C), lambda i: (0, 0)),
        scratch_shapes=[
            pltpu.VMEM((N, H + 2, W + 2, C), jnp.float32),  # zero-padded image
            pltpu.VMEM((M, C), jnp.float32),                # running residual
        ],
    )

    out2 = pl.pallas_call(
        kernel,
        out_shape=jax.ShapeDtypeStruct((M, C), jnp.float32),
        grid_spec=grid_spec,
        compiler_params=pltpu.CompilerParams(
            dimension_semantics=("arbitrary",)),
    )(x2, w1k, b1k, w2k, b2k, wds, bdk, wus, buk, wfk, bfk, pool_mat, bcast)

    return out2.reshape(N, H, W, C)


def residual_group_reference(x, w1s, b1s, w2s, b2s, wds, bds, wus, bus, wf, bf):
    """Pure-JAX reference matching PyTorch ResidualGroup semantics (NHWC)."""
    def conv(h, w, b):
        dn = lax.conv_dimension_numbers(h.shape, w.shape, ("NHWC", "HWIO", "NHWC"))
        return lax.conv_general_dilated(h, w, (1, 1), "SAME",
                                        dimension_numbers=dn,
                                        precision=lax.Precision.HIGHEST) + b

    res = x
    R = w1s.shape[0]
    for r in range(R):
        h1 = jnp.maximum(conv(res, w1s[r], b1s[r]), 0.0)
        h2 = conv(h1, w2s[r], b2s[r])
        y = jnp.mean(h2, axis=(1, 2))                                     # (N, C)
        z = jnp.maximum(jnp.dot(y, wds[r], precision=lax.Precision.HIGHEST)
                        + bds[r], 0.0)                                    # (N, Cr)
        s = jax.nn.sigmoid(jnp.dot(z, wus[r], precision=lax.Precision.HIGHEST)
                           + bus[r])                                      # (N, C)
        res = h2 * s[:, None, None, :] + res
    res = conv(res, wf, bf)
    return res + x


if __name__ == "__main__":
    N, H, W, C = 2, 8, 8, 32       # n_feat = 32
    reduction = 16
    Cr = C // reduction
    R = 2                          # n_resblocks

    key = jax.random.PRNGKey(0)
    ks = jax.random.split(key, 11)
    x   = jax.random.normal(ks[0], (N, H, W, C), jnp.float32)
    w1s = 0.05 * jax.random.normal(ks[1], (R, 3, 3, C, C), jnp.float32)
    b1s = 0.05 * jax.random.normal(ks[2], (R, C), jnp.float32)
    w2s = 0.05 * jax.random.normal(ks[3], (R, 3, 3, C, C), jnp.float32)
    b2s = 0.05 * jax.random.normal(ks[4], (R, C), jnp.float32)
    wds = 0.20 * jax.random.normal(ks[5], (R, C, Cr), jnp.float32)
    bds = 0.05 * jax.random.normal(ks[6], (R, Cr), jnp.float32)
    wus = 0.20 * jax.random.normal(ks[7], (R, Cr, C), jnp.float32)
    bus = 0.05 * jax.random.normal(ks[8], (R, C), jnp.float32)
    wf  = 0.05 * jax.random.normal(ks[9], (3, 3, C, C), jnp.float32)
    bf  = 0.05 * jax.random.normal(ks[10], (C,), jnp.float32)

    out = residual_group_forward(x, w1s, b1s, w2s, b2s, wds, bds, wus, bus,
                                 wf, bf)
    out = jax.block_until_ready(out)

    ref = residual_group_reference(x, w1s, b1s, w2s, b2s, wds, bds, wus, bus,
                                   wf, bf)
    err = float(jnp.max(jnp.abs(out - ref)))
    assert out.shape == (N, H, W, C)
    assert err < 1e-2, f"max abs error too large: {err}"
    print("KERNEL_OK")
</pallas_src>

<mosaic_0001>
module attributes {stable_mosaic.version = 11 : i64} {
  func.func @kernel(%arg0: i32, %arg1: memref<128x32xf32, #tpu.memory_space<vmem>>, %arg2: memref<2x9x32x32xf32, #tpu.memory_space<vmem>>, %arg3: memref<2x1x32xf32, #tpu.memory_space<vmem>>, %arg4: memref<2x9x32x32xf32, #tpu.memory_space<vmem>>, %arg5: memref<2x1x32xf32, #tpu.memory_space<vmem>>, %arg6: memref<2x32x2xf32, #tpu.memory_space<vmem>>, %arg7: memref<2x1x2xf32, #tpu.memory_space<vmem>>, %arg8: memref<2x2x32xf32, #tpu.memory_space<vmem>>, %arg9: memref<2x1x32xf32, #tpu.memory_space<vmem>>, %arg10: memref<9x32x32xf32, #tpu.memory_space<vmem>>, %arg11: memref<1x32xf32, #tpu.memory_space<vmem>>, %arg12: memref<2x128xf32, #tpu.memory_space<vmem>>, %arg13: memref<128x2xf32, #tpu.memory_space<vmem>>, %arg14: memref<128x32xf32, #tpu.memory_space<vmem>>, %arg15: memref<2x10x10x32xf32, #tpu.memory_space<vmem>>, %arg16: memref<128x32xf32, #tpu.memory_space<vmem>>) attributes {dimension_semantics = [#tpu.dimension_semantics<arbitrary>], iteration_bounds = array<i64: 1>, scalar_prefetch = 0 : i64, scratch_operands = 2 : i64, tpu.core_type = #tpu.core_type<tc>, window_params = [{pipeline_mode = #tpu.pipeline_mode<synchronous>, transform_indices = @transform_0, window_bounds = array<i64: 128, 32>}, {pipeline_mode = #tpu.pipeline_mode<synchronous>, transform_indices = @transform_1, window_bounds = array<i64: 2, 9, 32, 32>}, {pipeline_mode = #tpu.pipeline_mode<synchronous>, transform_indices = @transform_2, window_bounds = array<i64: 2, 1, 32>}, {pipeline_mode = #tpu.pipeline_mode<synchronous>, transform_indices = @transform_3, window_bounds = array<i64: 2, 9, 32, 32>}, {pipeline_mode = #tpu.pipeline_mode<synchronous>, transform_indices = @transform_4, window_bounds = array<i64: 2, 1, 32>}, {pipeline_mode = #tpu.pipeline_mode<synchronous>, transform_indices = @transform_5, window_bounds = array<i64: 2, 32, 2>}, {pipeline_mode = #tpu.pipeline_mode<synchronous>, transform_indices = @transform_6, window_bounds = array<i64: 2, 1, 2>}, {pipeline_mode = #tpu.pipeline_mode<synchronous>, transform_indices = @transform_7, window_bounds = array<i64: 2, 2, 32>}, {pipeline_mode = #tpu.pipeline_mode<synchronous>, transform_indices = @transform_8, window_bounds = array<i64: 2, 1, 32>}, {pipeline_mode = #tpu.pipeline_mode<synchronous>, transform_indices = @transform_9, window_bounds = array<i64: 9, 32, 32>}, {pipeline_mode = #tpu.pipeline_mode<synchronous>, transform_indices = @transform_10, window_bounds = array<i64: 1, 32>}, {pipeline_mode = #tpu.pipeline_mode<synchronous>, transform_indices = @transform_11, window_bounds = array<i64: 2, 128>}, {pipeline_mode = #tpu.pipeline_mode<synchronous>, transform_indices = @transform_12, window_bounds = array<i64: 128, 2>}, {pipeline_mode = #tpu.pipeline_mode<synchronous>, transform_indices = @transform_13, window_bounds = array<i64: 128, 32>}]} {
    %cst = arith.constant 0.000000e+00 : f32
    %0 = vector.broadcast %cst : f32 to vector<2x10x10x32xf32>
    %c0 = arith.constant 0 : index
    %c0_0 = arith.constant 0 : index
    %c0_1 = arith.constant 0 : index
    %c0_2 = arith.constant 0 : index
    %1 = vector.load %arg15[%c0, %c0_0, %c0_1, %c0_2] : memref<2x10x10x32xf32, #tpu.memory_space<vmem>>, vector<2x10x10x32xf32>
    tpu.vector_store %arg15[%c0, %c0_0, %c0_1, %c0_2], %0 {strides = array<i32>} : memref<2x10x10x32xf32, #tpu.memory_space<vmem>>, vector<2x10x10x32xf32>,
    %c0_3 = arith.constant 0 : index
    %c0_4 = arith.constant 0 : index
    %2 = vector.load %arg1[%c0_3, %c0_4] : memref<128x32xf32, #tpu.memory_space<vmem>>, vector<128x32xf32>
    %c0_5 = arith.constant 0 : index
    %c0_6 = arith.constant 0 : index
    %3 = vector.load %arg16[%c0_5, %c0_6] : memref<128x32xf32, #tpu.memory_space<vmem>>, vector<128x32xf32>
    tpu.vector_store %arg16[%c0_5, %c0_6], %2 {strides = array<i32>} : memref<128x32xf32, #tpu.memory_space<vmem>>, vector<128x32xf32>,
    %c0_7 = arith.constant 0 : index
    %c0_8 = arith.constant 0 : index
    %4 = vector.load %arg16[%c0_7, %c0_8] : memref<128x32xf32, #tpu.memory_space<vmem>>, vector<128x32xf32>
    %c0_9 = arith.constant 0 : index
    %c0_10 = arith.constant 0 : index
    %c0_11 = arith.constant 0 : index
    %5 = vector.load %arg3[%c0_9, %c0_10, %c0_11] : memref<2x1x32xf32, #tpu.memory_space<vmem>>, vector<1x1x32xf32>
    %6 = vector.shape_cast %5 : vector<1x1x32xf32> to vector<1x32xf32>
    %7 = vector.shape_cast %4 : vector<128x32xf32> to vector<2x8x8x32xf32>
    %c0_12 = arith.constant 0 : index
    %c1 = arith.constant 1 : index
    %c1_13 = arith.constant 1 : index
    %c0_14 = arith.constant 0 : index
    %8 = vector.load %arg15[%c0_12, %c1, %c1_13, %c0_14] : memref<2x10x10x32xf32, #tpu.memory_space<vmem>>, vector<2x8x8x32xf32>
    tpu.vector_store %arg15[%c0_12, %c1, %c1_13, %c0_14], %7 {strides = array<i32>} : memref<2x10x10x32xf32, #tpu.memory_space<vmem>>, vector<2x8x8x32xf32>,
    %cst_15 = arith.constant 0.000000e+00 : f32
    %9 = vector.broadcast %cst_15 : f32 to vector<128x32xf32>
    %c0_16 = arith.constant 0 : index
    %c0_17 = arith.constant 0 : index
    %c0_18 = arith.constant 0 : index
    %c0_19 = arith.constant 0 : index
    %10 = vector.load %arg15[%c0_16, %c0_17, %c0_18, %c0_19] : memref<2x10x10x32xf32, #tpu.memory_space<vmem>>, vector<2x8x8x32xf32>
    %11 = vector.shape_cast %10 : vector<2x8x8x32xf32> to vector<128x32xf32>
    %c0_20 = arith.constant 0 : index
    %c0_21 = arith.constant 0 : index
    %c0_22 = arith.constant 0 : index
    %c0_23 = arith.constant 0 : index
    %12 = vector.load %arg2[%c0_20, %c0_21, %c0_22, %c0_23] : memref<2x9x32x32xf32, #tpu.memory_space<vmem>>, vector<1x1x32x32xf32>
    %13 = vector.shape_cast %12 : vector<1x1x32x32xf32> to vector<32x32xf32>
    %cst_24 = arith.constant dense<0.000000e+00> : vector<128x32xf32>
    %14 = tpu.matmul %11, %13, %cst_24 {dimension_numbers = #tpu.dot_dimension_numbers<[1], [0], [0], [1], [0, 0, 1, 1], [], []>} : vector<128x32xf32>, vector<32x32xf32>, vector<128x32xf32> -> vector<128x32xf32>
    %15 = arith.addf %9, %14 : vector<128x32xf32>
    %c0_25 = arith.constant 0 : index
    %c0_26 = arith.constant 0 : index
    %c1_27 = arith.constant 1 : index
    %c0_28 = arith.constant 0 : index
    %16 = vector.load %arg15[%c0_25, %c0_26, %c1_27, %c0_28] : memref<2x10x10x32xf32, #tpu.memory_space<vmem>>, vector<2x8x8x32xf32>
    %17 = vector.shape_cast %16 : vector<2x8x8x32xf32> to vector<128x32xf32>
    %c0_29 = arith.constant 0 : index
    %c1_30 = arith.constant 1 : index
    %c0_31 = arith.constant 0 : index
    %c0_32 = arith.constant 0 : index
    %18 = vector.load %arg2[%c0_29, %c1_30, %c0_31, %c0_32] : memref<2x9x32x32xf32, #tpu.memory_space<vmem>>, vector<1x1x32x32xf32>
    %19 = vector.shape_cast %18 : vector<1x1x32x32xf32> to vector<32x32xf32>
    %cst_33 = arith.constant dense<0.000000e+00> : vector<128x32xf32>
    %20 = tpu.matmul %17, %19, %cst_33 {dimension_numbers = #tpu.dot_dimension_numbers<[1], [0], [0], [1], [0, 0, 1, 1], [], []>} : vector<128x32xf32>, vector<32x32xf32>, vector<128x32xf32> -> vector<128x32xf32>
    %21 = arith.addf %15, %20 : vector<128x32xf32>
    %c0_34 = arith.constant 0 : index
    %c0_35 = arith.constant 0 : index
    %c2 = arith.constant 2 : index
    %c0_36 = arith.constant 0 : index
    %22 = vector.load %arg15[%c0_34, %c0_35, %c2, %c0_36] : memref<2x10x10x32xf32, #tpu.memory_space<vmem>>, vector<2x8x8x32xf32>
    %23 = vector.shape_cast %22 : vector<2x8x8x32xf32> to vector<128x32xf32>
    %c0_37 = arith.constant 0 : index
    %c2_38 = arith.constant 2 : index
    %c0_39 = arith.constant 0 : index
    %c0_40 = arith.constant 0 : index
    %24 = vector.load %arg2[%c0_37, %c2_38, %c0_39, %c0_40] : memref<2x9x32x32xf32, #tpu.memory_space<vmem>>, vector<1x1x32x32xf32>
    %25 = vector.shape_cast %24 : vector<1x1x32x32xf32> to vector<32x32xf32>
    %cst_41 = arith.constant dense<0.000000e+00> : vector<128x32xf32>
    %26 = tpu.matmul %23, %25, %cst_41 {dimension_numbers = #tpu.dot_dimension_numbers<[1], [0], [0], [1], [0, 0, 1, 1], [], []>} : vector<128x32xf32>, vector<32x32xf32>, vector<128x32xf32> -> vector<128x32xf32>
    %27 = arith.addf %21, %26 : vector<128x32xf32>
    %c0_42 = arith.constant 0 : index
    %c1_43 = arith.constant 1 : index
    %c0_44 = arith.constant 0 : index
    %c0_45 = arith.constant 0 : index
    %28 = vector.load %arg15[%c0_42, %c1_43, %c0_44, %c0_45] : memref<2x10x10x32xf32, #tpu.memory_space<vmem>>, vector<2x8x8x32xf32>
    %29 = vector.shape_cast %28 : vector<2x8x8x32xf32> to vector<128x32xf32>
    %c0_46 = arith.constant 0 : index
    %c3 = arith.constant 3 : index
    %c0_47 = arith.constant 0 : index
    %c0_48 = arith.constant 0 : index
    %30 = vector.load %arg2[%c0_46, %c3, %c0_47, %c0_48] : memref<2x9x32x32xf32, #tpu.memory_space<vmem>>, vector<1x1x32x32xf32>
    %31 = vector.shape_cast %30 : vector<1x1x32x32xf32> to vector<32x32xf32>
    %cst_49 = arith.constant dense<0.000000e+00> : vector<128x32xf32>
    %32 = tpu.matmul %29, %31, %cst_49 {dimension_numbers = #tpu.dot_dimension_numbers<[1], [0], [0], [1], [0, 0, 1, 1], [], []>} : vector<128x32xf32>, vector<32x32xf32>, vector<128x32xf32> -> vector<128x32xf32>
    %33 = arith.addf %27, %32 : vector<128x32xf32>
    %c0_50 = arith.constant 0 : index
    %c1_51 = arith.constant 1 : index
    %c1_52 = arith.constant 1 : index
    %c0_53 = arith.constant 0 : index
    %34 = vector.load %arg15[%c0_50, %c1_51, %c1_52, %c0_53] : memref<2x10x10x32xf32, #tpu.memory_space<vmem>>, vector<2x8x8x32xf32>
    %35 = vector.shape_cast %34 : vector<2x8x8x32xf32> to vector<128x32xf32>
    %c0_54 = arith.constant 0 : index
    %c4 = arith.constant 4 : index
    %c0_55 = arith.constant 0 : index
    %c0_56 = arith.constant 0 : index
    %36 = vector.load %arg2[%c0_54, %c4, %c0_55, %c0_56] : memref<2x9x32x32xf32, #tpu.memory_space<vmem>>, vector<1x1x32x32xf32>
    %37 = vector.shape_cast %36 : vector<1x1x32x32xf32> to vector<32x32xf32>
    %cst_57 = arith.constant dense<0.000000e+00> : vector<128x32xf32>
    %38 = tpu.matmul %35, %37, %cst_57 {dimension_numbers = #tpu.dot_dimension_numbers<[1], [0], [0], [1], [0, 0, 1, 1], [], []>} : vector<128x32xf32>, vector<32x32xf32>, vector<128x32xf32> -> vector<128x32xf32>
    %39 = arith.addf %33, %38 : vector<128x32xf32>
    %c0_58 = arith.constant 0 : index
    %c1_59 = arith.constant 1 : index
    %c2_60 = arith.constant 2 : index
    %c0_61 = arith.constant 0 : index
    %40 = vector.load %arg15[%c0_58, %c1_59, %c2_60, %c0_61] : memref<2x10x10x32xf32, #tpu.memory_space<vmem>>, vector<2x8x8x32xf32>
    %41 = vector.shape_cast %40 : vector<2x8x8x32xf32> to vector<128x32xf32>
    %c0_62 = arith.constant 0 : index
    %c5 = arith.constant 5 : index
    %c0_63 = arith.constant 0 : index
    %c0_64 = arith.constant 0 : index
    %42 = vector.load %arg2[%c0_62, %c5, %c0_63, %c0_64] : memref<2x9x32x32xf32, #tpu.memory_space<vmem>>, vector<1x1x32x32xf32>
    %43 = vector.shape_cast %42 : vector<1x1x32x32xf32> to vector<32x32xf32>
    %cst_65 = arith.constant dense<0.000000e+00> : vector<128x32xf32>
    %44 = tpu.matmul %41, %43, %cst_65 {dimension_numbers = #tpu.dot_dimension_numbers<[1], [0], [0], [1], [0, 0, 1, 1], [], []>} : vector<128x32xf32>, vector<32x32xf32>, vector<128x32xf32> -> vector<128x32xf32>
    %45 = arith.addf %39, %44 : vector<128x32xf32>
    %c0_66 = arith.constant 0 : index
    %c2_67 = arith.constant 2 : index
    %c0_68 = arith.constant 0 : index
    %c0_69 = arith.constant 0 : index
    %46 = vector.load %arg15[%c0_66, %c2_67, %c0_68, %c0_69] : memref<2x10x10x32xf32, #tpu.memory_space<vmem>>, vector<2x8x8x32xf32>
    %47 = vector.shape_cast %46 : vector<2x8x8x32xf32> to vector<128x32xf32>
    %c0_70 = arith.constant 0 : index
    %c6 = arith.constant 6 : index
    %c0_71 = arith.constant 0 : index
    %c0_72 = arith.constant 0 : index
    %48 = vector.load %arg2[%c0_70, %c6, %c0_71, %c0_72] : memref<2x9x32x32xf32, #tpu.memory_space<vmem>>, vector<1x1x32x32xf32>
    %49 = vector.shape_cast %48 : vector<1x1x32x32xf32> to vector<32x32xf32>
    %cst_73 = arith.constant dense<0.000000e+00> : vector<128x32xf32>
    %50 = tpu.matmul %47, %49, %cst_73 {dimension_numbers = #tpu.dot_dimension_numbers<[1], [0], [0], [1], [0, 0, 1, 1], [], []>} : vector<128x32xf32>, vector<32x32xf32>, vector<128x32xf32> -> vector<128x32xf32>
    %51 = arith.addf %45, %50 : vector<128x32xf32>
    %c0_74 = arith.constant 0 : index
    %c2_75 = arith.constant 2 : index
    %c1_76 = arith.constant 1 : index
    %c0_77 = arith.constant 0 : index
    %52 = vector.load %arg15[%c0_74, %c2_75, %c1_76, %c0_77] : memref<2x10x10x32xf32, #tpu.memory_space<vmem>>, vector<2x8x8x32xf32>
    %53 = vector.shape_cast %52 : vector<2x8x8x32xf32> to vector<128x32xf32>
    %c0_78 = arith.constant 0 : index
    %c7 = arith.constant 7 : index
    %c0_79 = arith.constant 0 : index
    %c0_80 = arith.constant 0 : index
    %54 = vector.load %arg2[%c0_78, %c7, %c0_79, %c0_80] : memref<2x9x32x32xf32, #tpu.memory_space<vmem>>, vector<1x1x32x32xf32>
    %55 = vector.shape_cast %54 : vector<1x1x32x32xf32> to vector<32x32xf32>
    %cst_81 = arith.constant dense<0.000000e+00> : vector<128x32xf32>
    %56 = tpu.matmul %53, %55, %cst_81 {dimension_numbers = #tpu.dot_dimension_numbers<[1], [0], [0], [1], [0, 0, 1, 1], [], []>} : vector<128x32xf32>, vector<32x32xf32>, vector<128x32xf32> -> vector<128x32xf32>
    %57 = arith.addf %51, %56 : vector<128x32xf32>
    %c0_82 = arith.constant 0 : index
    %c2_83 = arith.constant 2 : index
    %c2_84 = arith.constant 2 : index
    %c0_85 = arith.constant 0 : index
    %58 = vector.load %arg15[%c0_82, %c2_83, %c2_84, %c0_85] : memref<2x10x10x32xf32, #tpu.memory_space<vmem>>, vector<2x8x8x32xf32>
    %59 = vector.shape_cast %58 : vector<2x8x8x32xf32> to vector<128x32xf32>
    %c0_86 = arith.constant 0 : index
    %c8 = arith.constant 8 : index
    %c0_87 = arith.constant 0 : index
    %c0_88 = arith.constant 0 : index
    %60 = vector.load %arg2[%c0_86, %c8, %c0_87, %c0_88] : memref<2x9x32x32xf32, #tpu.memory_space<vmem>>, vector<1x1x32x32xf32>
    %61 = vector.shape_cast %60 : vector<1x1x32x32xf32> to vector<32x32xf32>
    %cst_89 = arith.constant dense<0.000000e+00> : vector<128x32xf32>
    %62 = tpu.matmul %59, %61, %cst_89 {dimension_numbers = #tpu.dot_dimension_numbers<[1], [0], [0], [1], [0, 0, 1, 1], [], []>} : vector<128x32xf32>, vector<32x32xf32>, vector<128x32xf32> -> vector<128x32xf32>
    %63 = arith.addf %57, %62 : vector<128x32xf32>
    %64 = vector.broadcast %6 : vector<1x32xf32> to vector<128x32xf32>
    %65 = arith.addf %63, %64 : vector<128x32xf32>
    %cst_90 = arith.constant 0.000000e+00 : f32
    %66 = vector.broadcast %cst_90 : f32 to vector<128x32xf32>
    %67 = arith.maximumf %65, %66 : vector<128x32xf32>
    %c0_91 = arith.constant 0 : index
    %c0_92 = arith.constant 0 : index
    %c0_93 = arith.constant 0 : index
    %68 = vector.load %arg5[%c0_91, %c0_92, %c0_93] : memref<2x1x32xf32, #tpu.memory_space<vmem>>, vector<1x1x32xf32>
    %69 = vector.shape_cast %68 : vector<1x1x32xf32> to vector<1x32xf32>
    %70 = vector.shape_cast %67 : vector<128x32xf32> to vector<2x8x8x32xf32>
    %c0_94 = arith.constant 0 : index
    %c1_95 = arith.constant 1 : index
    %c1_96 = arith.constant 1 : index
    %c0_97 = arith.constant 0 : index
    %71 = vector.load %arg15[%c0_94, %c1_95, %c1_96, %c0_97] : memref<2x10x10x32xf32, #tpu.memory_space<vmem>>, vector<2x8x8x32xf32>
    tpu.vector_store %arg15[%c0_94, %c1_95, %c1_96, %c0_97], %70 {strides = array<i32>} : memref<2x10x10x32xf32, #tpu.memory_space<vmem>>, vector<2x8x8x32xf32>,
    %cst_98 = arith.constant 0.000000e+00 : f32
    %72 = vector.broadcast %cst_98 : f32 to vector<128x32xf32>
    %c0_99 = arith.constant 0 : index
    %c0_100 = arith.constant 0 : index
    %c0_101 = arith.constant 0 : index
    %c0_102 = arith.constant 0 : index
    %73 = vector.load %arg15[%c0_99, %c0_100, %c0_101, %c0_102] : memref<2x10x10x32xf32, #tpu.memory_space<vmem>>, vector<2x8x8x32xf32>
    %74 = vector.shape_cast %73 : vector<2x8x8x32xf32> to vector<128x32xf32>
    %c0_103 = arith.constant 0 : index
    %c0_104 = arith.constant 0 : index
    %c0_105 = arith.constant 0 : index
    %c0_106 = arith.constant 0 : index
    %75 = vector.load %arg4[%c0_103, %c0_104, %c0_105, %c0_106] : memref<2x9x32x32xf32, #tpu.memory_space<vmem>>, vector<1x1x32x32xf32>
    %76 = vector.shape_cast %75 : vector<1x1x32x32xf32> to vector<32x32xf32>
    %cst_107 = arith.constant dense<0.000000e+00> : vector<128x32xf32>
    %77 = tpu.matmul %74, %76, %cst_107 {dimension_numbers = #tpu.dot_dimension_numbers<[1], [0], [0], [1], [0, 0, 1, 1], [], []>} : vector<128x32xf32>, vector<32x32xf32>, vector<128x32xf32> -> vector<128x32xf32>
    %78 = arith.addf %72, %77 : vector<128x32xf32>
    %c0_108 = arith.constant 0 : index
    %c0_109 = arith.constant 0 : index
    %c1_110 = arith.constant 1 : index
    %c0_111 = arith.constant 0 : index
    %79 = vector.load %arg15[%c0_108, %c0_109, %c1_110, %c0_111] : memref<2x10x10x32xf32, #tpu.memory_space<vmem>>, vector<2x8x8x32xf32>
    %80 = vector.shape_cast %79 : vector<2x8x8x32xf32> to vector<128x32xf32>
    %c0_112 = arith.constant 0 : index
    %c1_113 = arith.constant 1 : index
    %c0_114 = arith.constant 0 : index
    %c0_115 = arith.constant 0 : index
    %81 = vector.load %arg4[%c0_112, %c1_113, %c0_114, %c0_115] : memref<2x9x32x32xf32, #tpu.memory_space<vmem>>, vector<1x1x32x32xf32>
    %82 = vector.shape_cast %81 : vector<1x1x32x32xf32> to vector<32x32xf32>
    %cst_116 = arith.constant dense<0.000000e+00> : vector<128x32xf32>
    %83 = tpu.matmul %80, %82, %cst_116 {dimension_numbers = #tpu.dot_dimension_numbers<[1], [0], [0], [1], [0, 0, 1, 1], [], []>} : vector<128x32xf32>, vector<32x32xf32>, vector<128x32xf32> -> vector<128x32xf32>
    %84 = arith.addf %78, %83 : vector<128x32xf32>
    %c0_117 = arith.constant 0 : index
    %c0_118 = arith.constant 0 : index
    %c2_119 = arith.constant 2 : index
    %c0_120 = arith.constant 0 : index
    %85 = vector.load %arg15[%c0_117, %c0_118, %c2_119, %c0_120] : memref<2x10x10x32xf32, #tpu.memory_space<vmem>>, vector<2x8x8x32xf32>
    %86 = vector.shape_cast %85 : vector<2x8x8x32xf32> to vector<128x32xf32>
    %c0_121 = arith.constant 0 : index
    %c2_122 = arith.constant 2 : index
    %c0_123 = arith.constant 0 : index
    %c0_124 = arith.constant 0 : index
    %87 = vector.load %arg4[%c0_121, %c2_122, %c0_123, %c0_124] : memref<2x9x32x32xf32, #tpu.memory_space<vmem>>, vector<1x1x32x32xf32>
    %88 = vector.shape_cast %87 : vector<1x1x32x32xf32> to vector<32x32xf32>
    %cst_125 = arith.constant dense<0.000000e+00> : vector<128x32xf32>
    %89 = tpu.matmul %86, %88, %cst_125 {dimension_numbers = #tpu.dot_dimension_numbers<[1], [0], [0], [1], [0, 0, 1, 1], [], []>} : vector<128x32xf32>, vector<32x32xf32>, vector<128x32xf32> -> vector<128x32xf32>
    %90 = arith.addf %84, %89 : vector<128x32xf32>
    %c0_126 = arith.constant 0 : index
    %c1_127 = arith.constant 1 : index
    %c0_128 = arith.constant 0 : index
    %c0_129 = arith.constant 0 : index
    %91 = vector.load %arg15[%c0_126, %c1_127, %c0_128, %c0_129] : memref<2x10x10x32xf32, #tpu.memory_space<vmem>>, vector<2x8x8x32xf32>
    %92 = vector.shape_cast %91 : vector<2x8x8x32xf32> to vector<128x32xf32>
    %c0_130 = arith.constant 0 : index
    %c3_131 = arith.constant 3 : index
    %c0_132 = arith.constant 0 : index
    %c0_133 = arith.constant 0 : index
    %93 = vector.load %arg4[%c0_130, %c3_131, %c0_132, %c0_133] : memref<2x9x32x32xf32, #tpu.memory_space<vmem>>, vector<1x1x32x32xf32>
    %94 = vector.shape_cast %93 : vector<1x1x32x32xf32> to vector<32x32xf32>
    %cst_134 = arith.constant dense<0.000000e+00> : vector<128x32xf32>
    %95 = tpu.matmul %92, %94, %cst_134 {dimension_numbers = #tpu.dot_dimension_numbers<[1], [0], [0], [1], [0, 0, 1, 1], [], []>} : vector<128x32xf32>, vector<32x32xf32>, vector<128x32xf32> -> vector<128x32xf32>
    %96 = arith.addf %90, %95 : vector<128x32xf32>
    %c0_135 = arith.constant 0 : index
    %c1_136 = arith.constant 1 : index
    %c1_137 = arith.constant 1 : index
    %c0_138 = arith.constant 0 : index
    %97 = vector.load %arg15[%c0_135, %c1_136, %c1_137, %c0_138] : memref<2x10x10x32xf32, #tpu.memory_space<vmem>>, vector<2x8x8x32xf32>
    %98 = vector.shape_cast %97 : vector<2x8x8x32xf32> to vector<128x32xf32>
    %c0_139 = arith.constant 0 : index
    %c4_140 = arith.constant 4 : index
    %c0_141 = arith.constant 0 : index
    %c0_142 = arith.constant 0 : index
    %99 = vector.load %arg4[%c0_139, %c4_140, %c0_141, %c0_142] : memref<2x9x32x32xf32, #tpu.memory_space<vmem>>, vector<1x1x32x32xf32>
    %100 = vector.shape_cast %99 : vector<1x1x32x32xf32> to vector<32x32xf32>
    %cst_143 = arith.constant dense<0.000000e+00> : vector<128x32xf32>
    %101 = tpu.matmul %98, %100, %cst_143 {dimension_numbers = #tpu.dot_dimension_numbers<[1], [0], [0], [1], [0, 0, 1, 1], [], []>} : vector<128x32xf32>, vector<32x32xf32>, vector<128x32xf32> -> vector<128x32xf32>
    %102 = arith.addf %96, %101 : vector<128x32xf32>
    %c0_144 = arith.constant 0 : index
    %c1_145 = arith.constant 1 : index
    %c2_146 = arith.constant 2 : index
    %c0_147 = arith.constant 0 : index
    %103 = vector.load %arg15[%c0_144, %c1_145, %c2_146, %c0_147] : memref<2x10x10x32xf32, #tpu.memory_space<vmem>>, vector<2x8x8x32xf32>
    %104 = vector.shape_cast %103 : vector<2x8x8x32xf32> to vector<128x32xf32>
    %c0_148 = arith.constant 0 : index
    %c5_149 = arith.constant 5 : index
    %c0_150 = arith.constant 0 : index
    %c0_151 = arith.constant 0 : index
    %105 = vector.load %arg4[%c0_148, %c5_149, %c0_150, %c0_151] : memref<2x9x32x32xf32, #tpu.memory_space<vmem>>, vector<1x1x32x32xf32>
    %106 = vector.shape_cast %105 : vector<1x1x32x32xf32> to vector<32x32xf32>
    %cst_152 = arith.constant dense<0.000000e+00> : vector<128x32xf32>
    %107 = tpu.matmul %104, %106, %cst_152 {dimension_numbers = #tpu.dot_dimension_numbers<[1], [0], [0], [1], [0, 0, 1, 1], [], []>} : vector<128x32xf32>, vector<32x32xf32>, vector<128x32xf32> -> vector<128x32xf32>
    %108 = arith.addf %102, %107 : vector<128x32xf32>
    %c0_153 = arith.constant 0 : index
    %c2_154 = arith.constant 2 : index
    %c0_155 = arith.constant 0 : index
    %c0_156 = arith.constant 0 : index
    %109 = vector.load %arg15[%c0_153, %c2_154, %c0_155, %c0_156] : memref<2x10x10x32xf32, #tpu.memory_space<vmem>>, vector<2x8x8x32xf32>
    %110 = vector.shape_cast %109 : vector<2x8x8x32xf32> to vector<128x32xf32>
    %c0_157 = arith.constant 0 : index
    %c6_158 = arith.constant 6 : index
    %c0_159 = arith.constant 0 : index
    %c0_160 = arith.constant 0 : index
    %111 = vector.load %arg4[%c0_157, %c6_158, %c0_159, %c0_160] : memref<2x9x32x32xf32, #tpu.memory_space<vmem>>, vector<1x1x32x32xf32>
    %112 = vector.shape_cast %111 : vector<1x1x32x32xf32> to vector<32x32xf32>
    %cst_161 = arith.constant dense<0.000000e+00> : vector<128x32xf32>
    %113 = tpu.matmul %110, %112, %cst_161 {dimension_numbers = #tpu.dot_dimension_numbers<[1], [0], [0], [1], [0, 0, 1, 1], [], []>} : vector<128x32xf32>, vector<32x32xf32>, vector<128x32xf32> -> vector<128x32xf32>
    %114 = arith.addf %108, %113 : vector<128x32xf32>
    %c0_162 = arith.constant 0 : index
    %c2_163 = arith.constant 2 : index
    %c1_164 = arith.constant 1 : index
    %c0_165 = arith.constant 0 : index
    %115 = vector.load %arg15[%c0_162, %c2_163, %c1_164, %c0_165] : memref<2x10x10x32xf32, #tpu.memory_space<vmem>>, vector<2x8x8x32xf32>
    %116 = vector.shape_cast %115 : vector<2x8x8x32xf32> to vector<128x32xf32>
    %c0_166 = arith.constant 0 : index
    %c7_167 = arith.constant 7 : index
    %c0_168 = arith.constant 0 : index
    %c0_169 = arith.constant 0 : index
    %117 = vector.load %arg4[%c0_166, %c7_167, %c0_168, %c0_169] : memref<2x9x32x32xf32, #tpu.memory_space<vmem>>, vector<1x1x32x32xf32>
    %118 = vector.shape_cast %117 : vector<1x1x32x32xf32> to vector<32x32xf32>
    %cst_170 = arith.constant dense<0.000000e+00> : vector<128x32xf32>
    %119 = tpu.matmul %116, %118, %cst_170 {dimension_numbers = #tpu.dot_dimension_numbers<[1], [0], [0], [1], [0, 0, 1, 1], [], []>} : vector<128x32xf32>, vector<32x32xf32>, vector<128x32xf32> -> vector<128x32xf32>
    %120 = arith.addf %114, %119 : vector<128x32xf32>
    %c0_171 = arith.constant 0 : index
    %c2_172 = arith.constant 2 : index
    %c2_173 = arith.constant 2 : index
    %c0_174 = arith.constant 0 : index
    %121 = vector.load %arg15[%c0_171, %c2_172, %c2_173, %c0_174] : memref<2x10x10x32xf32, #tpu.memory_space<vmem>>, vector<2x8x8x32xf32>
    %122 = vector.shape_cast %121 : vector<2x8x8x32xf32> to vector<128x32xf32>
    %c0_175 = arith.constant 0 : index
    %c8_176 = arith.constant 8 : index
    %c0_177 = arith.constant 0 : index
    %c0_178 = arith.constant 0 : index
    %123 = vector.load %arg4[%c0_175, %c8_176, %c0_177, %c0_178] : memref<2x9x32x32xf32, #tpu.memory_space<vmem>>, vector<1x1x32x32xf32>
    %124 = vector.shape_cast %123 : vector<1x1x32x32xf32> to vector<32x32xf32>
    %cst_179 = arith.constant dense<0.000000e+00> : vector<128x32xf32>
    %125 = tpu.matmul %122, %124, %cst_179 {dimension_numbers = #tpu.dot_dimension_numbers<[1], [0], [0], [1], [0, 0, 1, 1], [], []>} : vector<128x32xf32>, vector<32x32xf32>, vector<128x32xf32> -> vector<128x32xf32>
    %126 = arith.addf %120, %125 : vector<128x32xf32>
    %127 = vector.broadcast %69 : vector<1x32xf32> to vector<128x32xf32>
    %128 = arith.addf %126, %127 : vector<128x32xf32>
    %c0_180 = arith.constant 0 : index
    %c0_181 = arith.constant 0 : index
    %129 = vector.load %arg12[%c0_180, %c0_181] : memref<2x128xf32, #tpu.memory_space<vmem>>, vector<2x128xf32>
    %cst_182 = arith.constant dense<0.000000e+00> : vector<2x32xf32>
    %130 = tpu.matmul %129, %128, %cst_182 {dimension_numbers = #tpu.dot_dimension_numbers<[1], [0], [0], [1], [0, 0, 1, 1], [], []>} : vector<2x128xf32>, vector<128x32xf32>, vector<2x32xf32> -> vector<2x32xf32>
    %c0_183 = arith.constant 0 : index
    %c0_184 = arith.constant 0 : index
    %c0_185 = arith.constant 0 : index
    %131 = vector.load %arg6[%c0_183, %c0_184, %c0_185] : memref<2x32x2xf32, #tpu.memory_space<vmem>>, vector<1x32x2xf32>
    %132 = vector.shape_cast %131 : vector<1x32x2xf32> to vector<32x2xf32>
    %cst_186 = arith.constant dense<0.000000e+00> : vector<2x2xf32>
    %133 = tpu.matmul %130, %132, %cst_186 {dimension_numbers = #tpu.dot_dimension_numbers<[1], [0], [0], [1], [0, 0, 1, 1], [], []>} : vector<2x32xf32>, vector<32x2xf32>, vector<2x2xf32> -> vector<2x2xf32>
    %c0_187 = arith.constant 0 : index
    %c0_188 = arith.constant 0 : index
    %c0_189 = arith.constant 0 : index
    %134 = vector.load %arg7[%c0_187, %c0_188, %c0_189] : memref<2x1x2xf32, #tpu.memory_space<vmem>>, vector<1x1x2xf32>
    %135 = vector.shape_cast %134 : vector<1x1x2xf32> to vector<1x2xf32>
    %136 = vector.broadcast %135 : vector<1x2xf32> to vector<2x2xf32>
    %137 = arith.addf %133, %136 : vector<2x2xf32>
    %cst_190 = arith.constant 0.000000e+00 : f32
    %138 = vector.broadcast %cst_190 : f32 to vector<2x2xf32>
    %139 = arith.maximumf %137, %138 : vector<2x2xf32>
    %c0_191 = arith.constant 0 : index
    %c0_192 = arith.constant 0 : index
    %c0_193 = arith.constant 0 : index
    %140 = vector.load %arg8[%c0_191, %c0_192, %c0_193] : memref<2x2x32xf32, #tpu.memory_space<vmem>>, vector<1x2x32xf32>
    %141 = vector.shape_cast %140 : vector<1x2x32xf32> to vector<2x32xf32>
    %cst_194 = arith.constant dense<0.000000e+00> : vector<2x32xf32>
    %142 = tpu.matmul %139, %141, %cst_194 {dimension_numbers = #tpu.dot_dimension_numbers<[1], [0], [0], [1], [0, 0, 1, 1], [], []>} : vector<2x2xf32>, vector<2x32xf32>, vector<2x32xf32> -> vector<2x32xf32>
    %c0_195 = arith.constant 0 : index
    %c0_196 = arith.constant 0 : index
    %c0_197 = arith.constant 0 : index
    %143 = vector.load %arg9[%c0_195, %c0_196, %c0_197] : memref<2x1x32xf32, #tpu.memory_space<vmem>>, vector<1x1x32xf32>
    %144 = vector.shape_cast %143 : vector<1x1x32xf32> to vector<1x32xf32>
    %145 = vector.broadcast %144 : vector<1x32xf32> to vector<2x32xf32>
    %146 = arith.addf %142, %145 : vector<2x32xf32>
    %cst_198 = arith.constant 0.000000e+00 : f32
    %147 = vector.broadcast %cst_198 : f32 to vector<2x32xf32>
    %148 = arith.subf %147, %146 : vector<2x32xf32>
    %149 = math.exp %148 : vector<2x32xf32>
    %cst_199 = arith.constant 1.000000e+00 : f32
    %150 = vector.broadcast %cst_199 : f32 to vector<2x32xf32>
    %151 = arith.addf %150, %149 : vector<2x32xf32>
    %cst_200 = arith.constant 1.000000e+00 : f32
    %152 = vector.broadcast %cst_200 : f32 to vector<2x32xf32>
    %153 = arith.divf %152, %151 : vector<2x32xf32>
    %c0_201 = arith.constant 0 : index
    %c0_202 = arith.constant 0 : index
    %154 = vector.load %arg13[%c0_201, %c0_202] : memref<128x2xf32, #tpu.memory_space<vmem>>, vector<128x2xf32>
    %cst_203 = arith.constant dense<0.000000e+00> : vector<128x32xf32>
    %155 = tpu.matmul %154, %153, %cst_203 {dimension_numbers = #tpu.dot_dimension_numbers<[1], [0], [0], [1], [0, 0, 1, 1], [], []>} : vector<128x2xf32>, vector<2x32xf32>, vector<128x32xf32> -> vector<128x32xf32>
    %156 = arith.mulf %128, %155 : vector<128x32xf32>
    %c0_204 = arith.constant 0 : index
    %c0_205 = arith.constant 0 : index
    %157 = vector.load %arg16[%c0_204, %c0_205] : memref<128x32xf32, #tpu.memory_space<vmem>>, vector<128x32xf32>
    %158 = arith.addf %156, %157 : vector<128x32xf32>
    %c0_206 = arith.constant 0 : index
    %c0_207 = arith.constant 0 : index
    %159 = vector.load %arg16[%c0_206, %c0_207] : memref<128x32xf32, #tpu.memory_space<vmem>>, vector<128x32xf32>
    tpu.vector_store %arg16[%c0_206, %c0_207], %158 {strides = array<i32>} : memref<128x32xf32, #tpu.memory_space<vmem>>, vector<128x32xf32>,
    %c0_208 = arith.constant 0 : index
    %c0_209 = arith.constant 0 : index
    %160 = vector.load %arg16[%c0_208, %c0_209] : memref<128x32xf32, #tpu.memory_space<vmem>>, vector<128x32xf32>
    %c1_210 = arith.constant 1 : index
    %c0_211 = arith.constant 0 : index
    %c0_212 = arith.constant 0 : index
    %161 = vector.load %arg3[%c1_210, %c0_211, %c0_212] : memref<2x1x32xf32, #tpu.memory_space<vmem>>, vector<1x1x32xf32>
    %162 = vector.shape_cast %161 : vector<1x1x32xf32> to vector<1x32xf32>
    %163 = vector.shape_cast %160 : vector<128x32xf32> to vector<2x8x8x32xf32>
    %c0_213 = arith.constant 0 : index
    %c1_214 = arith.constant 1 : index
    %c1_215 = arith.constant 1 : index
    %c0_216 = arith.constant 0 : index
    %164 = vector.load %arg15[%c0_213, %c1_214, %c1_215, %c0_216] : memref<2x10x10x32xf32, #tpu.memory_space<vmem>>, vector<2x8x8x32xf32>
    tpu.vector_store %arg15[%c0_213, %c1_214, %c1_215, %c0_216], %163 {strides = array<i32>} : memref<2x10x10x32xf32, #tpu.memory_space<vmem>>, vector<2x8x8x32xf32>,
    %cst_217 = arith.constant 0.000000e+00 : f32
    %165 = vector.broadcast %cst_217 : f32 to vector<128x32xf32>
    %c0_218 = arith.constant 0 : index
    %c0_219 = arith.constant 0 : index
    %c0_220 = arith.constant 0 : index
    %c0_221 = arith.constant 0 : index
    %166 = vector.load %arg15[%c0_218, %c0_219, %c0_220, %c0_221] : memref<2x10x10x32xf32, #tpu.memory_space<vmem>>, vector<2x8x8x32xf32>
    %167 = vector.shape_cast %166 : vector<2x8x8x32xf32> to vector<128x32xf32>
    %c1_222 = arith.constant 1 : index
    %c0_223 = arith.constant 0 : index
    %c0_224 = arith.constant 0 : index
    %c0_225 = arith.constant 0 : index
    %168 = vector.load %arg2[%c1_222, %c0_223, %c0_224, %c0_225] : memref<2x9x32x32xf32, #tpu.memory_space<vmem>>, vector<1x1x32x32xf32>
    %169 = vector.shape_cast %168 : vector<1x1x32x32xf32> to vector<32x32xf32>
    %cst_226 = arith.constant dense<0.000000e+00> : vector<128x32xf32>
    %170 = tpu.matmul %167, %169, %cst_226 {dimension_numbers = #tpu.dot_dimension_numbers<[1], [0], [0], [1], [0, 0, 1, 1], [], []>} : vector<128x32xf32>, vector<32x32xf32>, vector<128x32xf32> -> vector<128x32xf32>
    %171 = arith.addf %165, %170 : vector<128x32xf32>
    %c0_227 = arith.constant 0 : index
    %c0_228 = arith.constant 0 : index
    %c1_229 = arith.constant 1 : index
    %c0_230 = arith.constant 0 : index
    %172 = vector.load %arg15[%c0_227, %c0_228, %c1_229, %c0_230] : memref<2x10x10x32xf32, #tpu.memory_space<vmem>>, vector<2x8x8x32xf32>
    %173 = vector.shape_cast %172 : vector<2x8x8x32xf32> to vector<128x32xf32>
    %c1_231 = arith.constant 1 : index
    %c1_232 = arith.constant 1 : index
    %c0_233 = arith.constant 0 : index
    %c0_234 = arith.constant 0 : index
    %174 = vector.load %arg2[%c1_231, %c1_232, %c0_233, %c0_234] : memref<2x9x32x32xf32, #tpu.memory_space<vmem>>, vector<1x1x32x32xf32>
    %175 = vector.shape_cast %174 : vector<1x1x32x32xf32> to vector<32x32xf32>
    %cst_235 = arith.constant dense<0.000000e+00> : vector<128x32xf32>
    %176 = tpu.matmul %173, %175, %cst_235 {dimension_numbers = #tpu.dot_dimension_numbers<[1], [0], [0], [1], [0, 0, 1, 1], [], []>} : vector<128x32xf32>, vector<32x32xf32>, vector<128x32xf32> -> vector<128x32xf32>
    %177 = arith.addf %171, %176 : vector<128x32xf32>
    %c0_236 = arith.constant 0 : index
    %c0_237 = arith.constant 0 : index
    %c2_238 = arith.constant 2 : index
    %c0_239 = arith.constant 0 : index
    %178 = vector.load %arg15[%c0_236, %c0_237, %c2_238, %c0_239] : memref<2x10x10x32xf32, #tpu.memory_space<vmem>>, vector<2x8x8x32xf32>
    %179 = vector.shape_cast %178 : vector<2x8x8x32xf32> to vector<128x32xf32>
    %c1_240 = arith.constant 1 : index
    %c2_241 = arith.constant 2 : index
    %c0_242 = arith.constant 0 : index
    %c0_243 = arith.constant 0 : index
    %180 = vector.load %arg2[%c1_240, %c2_241, %c0_242, %c0_243] : memref<2x9x32x32xf32, #tpu.memory_space<vmem>>, vector<1x1x32x32xf32>
    %181 = vector.shape_cast %180 : vector<1x1x32x32xf32> to vector<32x32xf32>
    %cst_244 = arith.constant dense<0.000000e+00> : vector<128x32xf32>
    %182 = tpu.matmul %179, %181, %cst_244 {dimension_numbers = #tpu.dot_dimension_numbers<[1], [0], [0], [1], [0, 0, 1, 1], [], []>} : vector<128x32xf32>, vector<32x32xf32>, vector<128x32xf32> -> vector<128x32xf32>
    %183 = arith.addf %177, %182 : vector<128x32xf32>
    %c0_245 = arith.constant 0 : index
    %c1_246 = arith.constant 1 : index
    %c0_247 = arith.constant 0 : index
    %c0_248 = arith.constant 0 : index
    %184 = vector.load %arg15[%c0_245, %c1_246, %c0_247, %c0_248] : memref<2x10x10x32xf32, #tpu.memory_space<vmem>>, vector<2x8x8x32xf32>
    %185 = vector.shape_cast %184 : vector<2x8x8x32xf32> to vector<128x32xf32>
    %c1_249 = arith.constant 1 : index
    %c3_250 = arith.constant 3 : index
    %c0_251 = arith.constant 0 : index
    %c0_252 = arith.constant 0 : index
    %186 = vector.load %arg2[%c1_249, %c3_250, %c0_251, %c0_252] : memref<2x9x32x32xf32, #tpu.memory_space<vmem>>, vector<1x1x32x32xf32>
    %187 = vector.shape_cast %186 : vector<1x1x32x32xf32> to vector<32x32xf32>
    %cst_253 = arith.constant dense<0.000000e+00> : vector<128x32xf32>
    %188 = tpu.matmul %185, %187, %cst_253 {dimension_numbers = #tpu.dot_dimension_numbers<[1], [0], [0], [1], [0, 0, 1, 1], [], []>} : vector<128x32xf32>, vector<32x32xf32>, vector<128x32xf32> -> vector<128x32xf32>
    %189 = arith.addf %183, %188 : vector<128x32xf32>
    %c0_254 = arith.constant 0 : index
    %c1_255 = arith.constant 1 : index
    %c1_256 = arith.constant 1 : index
    %c0_257 = arith.constant 0 : index
    %190 = vector.load %arg15[%c0_254, %c1_255, %c1_256, %c0_257] : memref<2x10x10x32xf32, #tpu.memory_space<vmem>>, vector<2x8x8x32xf32>
    %191 = vector.shape_cast %190 : vector<2x8x8x32xf32> to vector<128x32xf32>
    %c1_258 = arith.constant 1 : index
    %c4_259 = arith.constant 4 : index
    %c0_260 = arith.constant 0 : index
    %c0_261 = arith.constant 0 : index
    %192 = vector.load %arg2[%c1_258, %c4_259, %c0_260, %c0_261] : memref<2x9x32x32xf32, #tpu.memory_space<vmem>>, vector<1x1x32x32xf32>
    %193 = vector.shape_cast %192 : vector<1x1x32x32xf32> to vector<32x32xf32>
    %cst_262 = arith.constant dense<0.000000e+00> : vector<128x32xf32>
    %194 = tpu.matmul %191, %193, %cst_262 {dimension_numbers = #tpu.dot_dimension_numbers<[1], [0], [0], [1], [0, 0, 1, 1], [], []>} : vector<128x32xf32>, vector<32x32xf32>, vector<128x32xf32> -> vector<128x32xf32>
    %195 = arith.addf %189, %194 : vector<128x32xf32>
    %c0_263 = arith.constant 0 : index
    %c1_264 = arith.constant 1 : index
    %c2_265 = arith.constant 2 : index
    %c0_266 = arith.constant 0 : index
    %196 = vector.load %arg15[%c0_263, %c1_264, %c2_265, %c0_266] : memref<2x10x10x32xf32, #tpu.memory_space<vmem>>, vector<2x8x8x32xf32>
    %197 = vector.shape_cast %196 : vector<2x8x8x32xf32> to vector<128x32xf32>
    %c1_267 = arith.constant 1 : index
    %c5_268 = arith.constant 5 : index
    %c0_269 = arith.constant 0 : index
    %c0_270 = arith.constant 0 : index
    %198 = vector.load %arg2[%c1_267, %c5_268, %c0_269, %c0_270] : memref<2x9x32x32xf32, #tpu.memory_space<vmem>>, vector<1x1x32x32xf32>
    %199 = vector.shape_cast %198 : vector<1x1x32x32xf32> to vector<32x32xf32>
    %cst_271 = arith.constant dense<0.000000e+00> : vector<128x32xf32>
    %200 = tpu.matmul %197, %199, %cst_271 {dimension_numbers = #tpu.dot_dimension_numbers<[1], [0], [0], [1], [0, 0, 1, 1], [], []>} : vector<128x32xf32>, vector<32x32xf32>, vector<128x32xf32> -> vector<128x32xf32>
    %201 = arith.addf %195, %200 : vector<128x32xf32>
    %c0_272 = arith.constant 0 : index
    %c2_273 = arith.constant 2 : index
    %c0_274 = arith.constant 0 : index
    %c0_275 = arith.constant 0 : index
    %202 = vector.load %arg15[%c0_272, %c2_273, %c0_274, %c0_275] : memref<2x10x10x32xf32, #tpu.memory_space<vmem>>, vector<2x8x8x32xf32>
    %203 = vector.shape_cast %202 : vector<2x8x8x32xf32> to vector<128x32xf32>
    %c1_276 = arith.constant 1 : index
    %c6_277 = arith.constant 6 : index
    %c0_278 = arith.constant 0 : index
    %c0_279 = arith.constant 0 : index
    %204 = vector.load %arg2[%c1_276, %c6_277, %c0_278, %c0_279] : memref<2x9x32x32xf32, #tpu.memory_space<vmem>>, vector<1x1x32x32xf32>
    %205 = vector.shape_cast %204 : vector<1x1x32x32xf32> to vector<32x32xf32>
    %cst_280 = arith.constant dense<0.000000e+00> : vector<128x32xf32>
    %206 = tpu.matmul %203, %205, %cst_280 {dimension_numbers = #tpu.dot_dimension_numbers<[1], [0], [0], [1], [0, 0, 1, 1], [], []>} : vector<128x32xf32>, vector<32x32xf32>, vector<128x32xf32> -> vector<128x32xf32>
    %207 = arith.addf %201, %206 : vector<128x32xf32>
    %c0_281 = arith.constant 0 : index
    %c2_282 = arith.constant 2 : index
    %c1_283 = arith.constant 1 : index
    %c0_284 = arith.constant 0 : index
    %208 = vector.load %arg15[%c0_281, %c2_282, %c1_283, %c0_284] : memref<2x10x10x32xf32, #tpu.memory_space<vmem>>, vector<2x8x8x32xf32>
    %209 = vector.shape_cast %208 : vector<2x8x8x32xf32> to vector<128x32xf32>
    %c1_285 = arith.constant 1 : index
    %c7_286 = arith.constant 7 : index
    %c0_287 = arith.constant 0 : index
    %c0_288 = arith.constant 0 : index
    %210 = vector.load %arg2[%c1_285, %c7_286, %c0_287, %c0_288] : memref<2x9x32x32xf32, #tpu.memory_space<vmem>>, vector<1x1x32x32xf32>
    %211 = vector.shape_cast %210 : vector<1x1x32x32xf32> to vector<32x32xf32>
    %cst_289 = arith.constant dense<0.000000e+00> : vector<128x32xf32>
    %212 = tpu.matmul %209, %211, %cst_289 {dimension_numbers = #tpu.dot_dimension_numbers<[1], [0], [0], [1], [0, 0, 1, 1], [], []>} : vector<128x32xf32>, vector<32x32xf32>, vector<128x32xf32> -> vector<128x32xf32>
    %213 = arith.addf %207, %212 : vector<128x32xf32>
    %c0_290 = arith.constant 0 : index
    %c2_291 = arith.constant 2 : index
    %c2_292 = arith.constant 2 : index
    %c0_293 = arith.constant 0 : index
    %214 = vector.load %arg15[%c0_290, %c2_291, %c2_292, %c0_293] : memref<2x10x10x32xf32, #tpu.memory_space<vmem>>, vector<2x8x8x32xf32>
    %215 = vector.shape_cast %214 : vector<2x8x8x32xf32> to vector<128x32xf32>
    %c1_294 = arith.constant 1 : index
    %c8_295 = arith.constant 8 : index
    %c0_296 = arith.constant 0 : index
    %c0_297 = arith.constant 0 : index
    %216 = vector.load %arg2[%c1_294, %c8_295, %c0_296, %c0_297] : memref<2x9x32x32xf32, #tpu.memory_space<vmem>>, vector<1x1x32x32xf32>
    %217 = vector.shape_cast %216 : vector<1x1x32x32xf32> to vector<32x32xf32>
    %cst_298 = arith.constant dense<0.000000e+00> : vector<128x32xf32>
    %218 = tpu.matmul %215, %217, %cst_298 {dimension_numbers = #tpu.dot_dimension_numbers<[1], [0], [0], [1], [0, 0, 1, 1], [], []>} : vector<128x32xf32>, vector<32x32xf32>, vector<128x32xf32> -> vector<128x32xf32>
    %219 = arith.addf %213, %218 : vector<128x32xf32>
    %220 = vector.broadcast %162 : vector<1x32xf32> to vector<128x32xf32>
    %221 = arith.addf %219, %220 : vector<128x32xf32>
    %cst_299 = arith.constant 0.000000e+00 : f32
    %222 = vector.broadcast %cst_299 : f32 to vector<128x32xf32>
    %223 = arith.maximumf %221, %222 : vector<128x32xf32>
    %c1_300 = arith.constant 1 : index
    %c0_301 = arith.constant 0 : index
    %c0_302 = arith.constant 0 : index
    %224 = vector.load %arg5[%c1_300, %c0_301, %c0_302] : memref<2x1x32xf32, #tpu.memory_space<vmem>>, vector<1x1x32xf32>
    %225 = vector.shape_cast %224 : vector<1x1x32xf32> to vector<1x32xf32>
    %226 = vector.shape_cast %223 : vector<128x32xf32> to vector<2x8x8x32xf32>
    %c0_303 = arith.constant 0 : index
    %c1_304 = arith.constant 1 : index
    %c1_305 = arith.constant 1 : index
    %c0_306 = arith.constant 0 : index
    %227 = vector.load %arg15[%c0_303, %c1_304, %c1_305, %c0_306] : memref<2x10x10x32xf32, #tpu.memory_space<vmem>>, vector<2x8x8x32xf32>
    tpu.vector_store %arg15[%c0_303, %c1_304, %c1_305, %c0_306], %226 {strides = array<i32>} : memref<2x10x10x32xf32, #tpu.memory_space<vmem>>, vector<2x8x8x32xf32>,
    %cst_307 = arith.constant 0.000000e+00 : f32
    %228 = vector.broadcast %cst_307 : f32 to vector<128x32xf32>
    %c0_308 = arith.constant 0 : index
    %c0_309 = arith.constant 0 : index
    %c0_310 = arith.constant 0 : index
    %c0_311 = arith.constant 0 : index
    %229 = vector.load %arg15[%c0_308, %c0_309, %c0_310, %c0_311] : memref<2x10x10x32xf32, #tpu.memory_space<vmem>>, vector<2x8x8x32xf32>
    %230 = vector.shape_cast %229 : vector<2x8x8x32xf32> to vector<128x32xf32>
    %c1_312 = arith.constant 1 : index
    %c0_313 = arith.constant 0 : index
    %c0_314 = arith.constant 0 : index
    %c0_315 = arith.constant 0 : index
    %231 = vector.load %arg4[%c1_312, %c0_313, %c0_314, %c0_315] : memref<2x9x32x32xf32, #tpu.memory_space<vmem>>, vector<1x1x32x32xf32>
    %232 = vector.shape_cast %231 : vector<1x1x32x32xf32> to vector<32x32xf32>
    %cst_316 = arith.constant dense<0.000000e+00> : vector<128x32xf32>
    %233 = tpu.matmul %230, %232, %cst_316 {dimension_numbers = #tpu.dot_dimension_numbers<[1], [0], [0], [1], [0, 0, 1, 1], [], []>} : vector<128x32xf32>, vector<32x32xf32>, vector<128x32xf32> -> vector<128x32xf32>
    %234 = arith.addf %228, %233 : vector<128x32xf32>
    %c0_317 = arith.constant 0 : index
    %c0_318 = arith.constant 0 : index
    %c1_319 = arith.constant 1 : index
    %c0_320 = arith.constant 0 : index
    %235 = vector.load %arg15[%c0_317, %c0_318, %c1_319, %c0_320] : memref<2x10x10x32xf32, #tpu.memory_space<vmem>>, vector<2x8x8x32xf32>
    %236 = vector.shape_cast %235 : vector<2x8x8x32xf32> to vector<128x32xf32>
    %c1_321 = arith.constant 1 : index
    %c1_322 = arith.constant 1 : index
    %c0_323 = arith.constant 0 : index
    %c0_324 = arith.constant 0 : index
    %237 = vector.load %arg4[%c1_321, %c1_322, %c0_323, %c0_324] : memref<2x9x32x32xf32, #tpu.memory_space<vmem>>, vector<1x1x32x32xf32>
    %238 = vector.shape_cast %237 : vector<1x1x32x32xf32> to vector<32x32xf32>
    %cst_325 = arith.constant dense<0.000000e+00> : vector<128x32xf32>
    %239 = tpu.matmul %236, %238, %cst_325 {dimension_numbers = #tpu.dot_dimension_numbers<[1], [0], [0], [1], [0, 0, 1, 1], [], []>} : vector<128x32xf32>, vector<32x32xf32>, vector<128x32xf32> -> vector<128x32xf32>
    %240 = arith.addf %234, %239 : vector<128x32xf32>
    %c0_326 = arith.constant 0 : index
    %c0_327 = arith.constant 0 : index
    %c2_328 = arith.constant 2 : index
    %c0_329 = arith.constant 0 : index
    %241 = vector.load %arg15[%c0_326, %c0_327, %c2_328, %c0_329] : memref<2x10x10x32xf32, #tpu.memory_space<vmem>>, vector<2x8x8x32xf32>
    %242 = vector.shape_cast %241 : vector<2x8x8x32xf32> to vector<128x32xf32>
    %c1_330 = arith.constant 1 : index
    %c2_331 = arith.constant 2 : index
    %c0_332 = arith.constant 0 : index
    %c0_333 = arith.constant 0 : index
    %243 = vector.load %arg4[%c1_330, %c2_331, %c0_332, %c0_333] : memref<2x9x32x32xf32, #tpu.memory_space<vmem>>, vector<1x1x32x32xf32>
    %244 = vector.shape_cast %243 : vector<1x1x32x32xf32> to vector<32x32xf32>
    %cst_334 = arith.constant dense<0.000000e+00> : vector<128x32xf32>
    %245 = tpu.matmul %242, %244, %cst_334 {dimension_numbers = #tpu.dot_dimension_numbers<[1], [0], [0], [1], [0, 0, 1, 1], [], []>} : vector<128x32xf32>, vector<32x32xf32>, vector<128x32xf32> -> vector<128x32xf32>
    %246 = arith.addf %240, %245 : vector<128x32xf32>
    %c0_335 = arith.constant 0 : index
    %c1_336 = arith.constant 1 : index
    %c0_337 = arith.constant 0 : index
    %c0_338 = arith.constant 0 : index
    %247 = vector.load %arg15[%c0_335, %c1_336, %c0_337, %c0_338] : memref<2x10x10x32xf32, #tpu.memory_space<vmem>>, vector<2x8x8x32xf32>
    %248 = vector.shape_cast %247 : vector<2x8x8x32xf32> to vector<128x32xf32>
    %c1_339 = arith.constant 1 : index
    %c3_340 = arith.constant 3 : index
    %c0_341 = arith.constant 0 : index
    %c0_342 = arith.constant 0 : index
    %249 = vector.load %arg4[%c1_339, %c3_340, %c0_341, %c0_342] : memref<2x9x32x32xf32, #tpu.memory_space<vmem>>, vector<1x1x32x32xf32>
    %250 = vector.shape_cast %249 : vector<1x1x32x32xf32> to vector<32x32xf32>
    %cst_343 = arith.constant dense<0.000000e+00> : vector<128x32xf32>
    %251 = tpu.matmul %248, %250, %cst_343 {dimension_numbers = #tpu.dot_dimension_numbers<[1], [0], [0], [1], [0, 0, 1, 1], [], []>} : vector<128x32xf32>, vector<32x32xf32>, vector<128x32xf32> -> vector<128x32xf32>
    %252 = arith.addf %246, %251 : vector<128x32xf32>
    %c0_344 = arith.constant 0 : index
    %c1_345 = arith.constant 1 : index
    %c1_346 = arith.constant 1 : index
    %c0_347 = arith.constant 0 : index
    %253 = vector.load %arg15[%c0_344, %c1_345, %c1_346, %c0_347] : memref<2x10x10x32xf32, #tpu.memory_space<vmem>>, vector<2x8x8x32xf32>
    %254 = vector.shape_cast %253 : vector<2x8x8x32xf32> to vector<128x32xf32>
    %c1_348 = arith.constant 1 : index
    %c4_349 = arith.constant 4 : index
    %c0_350 = arith.constant 0 : index
    %c0_351 = arith.constant 0 : index
    %255 = vector.load %arg4[%c1_348, %c4_349, %c0_350, %c0_351] : memref<2x9x32x32xf32, #tpu.memory_space<vmem>>, vector<1x1x32x32xf32>
    %256 = vector.shape_cast %255 : vector<1x1x32x32xf32> to vector<32x32xf32>
    %cst_352 = arith.constant dense<0.000000e+00> : vector<128x32xf32>
    %257 = tpu.matmul %254, %256, %cst_352 {dimension_numbers = #tpu.dot_dimension_numbers<[1], [0], [0], [1], [0, 0, 1, 1], [], []>} : vector<128x32xf32>, vector<32x32xf32>, vector<128x32xf32> -> vector<128x32xf32>
    %258 = arith.addf %252, %257 : vector<128x32xf32>
    %c0_353 = arith.constant 0 : index
    %c1_354 = arith.constant 1 : index
    %c2_355 = arith.constant 2 : index
    %c0_356 = arith.constant 0 : index
    %259 = vector.load %arg15[%c0_353, %c1_354, %c2_355, %c0_356] : memref<2x10x10x32xf32, #tpu.memory_space<vmem>>, vector<2x8x8x32xf32>
    %260 = vector.shape_cast %259 : vector<2x8x8x32xf32> to vector<128x32xf32>
    %c1_357 = arith.constant 1 : index
    %c5_358 = arith.constant 5 : index
    %c0_359 = arith.constant 0 : index
    %c0_360 = arith.constant 0 : index
    %261 = vector.load %arg4[%c1_357, %c5_358, %c0_359, %c0_360] : memref<2x9x32x32xf32, #tpu.memory_space<vmem>>, vector<1x1x32x32xf32>
    %262 = vector.shape_cast %261 : vector<1x1x32x32xf32> to vector<32x32xf32>
    %cst_361 = arith.constant dense<0.000000e+00> : vector<128x32xf32>
    %263 = tpu.matmul %260, %262, %cst_361 {dimension_numbers = #tpu.dot_dimension_numbers<[1], [0], [0], [1], [0, 0, 1, 1], [], []>} : vector<128x32xf32>, vector<32x32xf32>, vector<128x32xf32> -> vector<128x32xf32>
    %264 = arith.addf %258, %263 : vector<128x32xf32>
    %c0_362 = arith.constant 0 : index
    %c2_363 = arith.constant 2 : index
    %c0_364 = arith.constant 0 : index
    %c0_365 = arith.constant 0 : index
    %265 = vector.load %arg15[%c0_362, %c2_363, %c0_364, %c0_365] : memref<2x10x10x32xf32, #tpu.memory_space<vmem>>, vector<2x8x8x32xf32>
    %266 = vector.shape_cast %265 : vector<2x8x8x32xf32> to vector<128x32xf32>
    %c1_366 = arith.constant 1 : index
    %c6_367 = arith.constant 6 : index
    %c0_368 = arith.constant 0 : index
    %c0_369 = arith.constant 0 : index
    %267 = vector.load %arg4[%c1_366, %c6_367, %c0_368, %c0_369] : memref<2x9x32x32xf32, #tpu.memory_space<vmem>>, vector<1x1x32x32xf32>
    %268 = vector.shape_cast %267 : vector<1x1x32x32xf32> to vector<32x32xf32>
    %cst_370 = arith.constant dense<0.000000e+00> : vector<128x32xf32>
    %269 = tpu.matmul %266, %268, %cst_370 {dimension_numbers = #tpu.dot_dimension_numbers<[1], [0], [0], [1], [0, 0, 1, 1], [], []>} : vector<128x32xf32>, vector<32x32xf32>, vector<128x32xf32> -> vector<128x32xf32>
    %270 = arith.addf %264, %269 : vector<128x32xf32>
    %c0_371 = arith.constant 0 : index
    %c2_372 = arith.constant 2 : index
    %c1_373 = arith.constant 1 : index
    %c0_374 = arith.constant 0 : index
    %271 = vector.load %arg15[%c0_371, %c2_372, %c1_373, %c0_374] : memref<2x10x10x32xf32, #tpu.memory_space<vmem>>, vector<2x8x8x32xf32>
    %272 = vector.shape_cast %271 : vector<2x8x8x32xf32> to vector<128x32xf32>
    %c1_375 = arith.constant 1 : index
    %c7_376 = arith.constant 7 : index
    %c0_377 = arith.constant 0 : index
    %c0_378 = arith.constant 0 : index
    %273 = vector.load %arg4[%c1_375, %c7_376, %c0_377, %c0_378] : memref<2x9x32x32xf32, #tpu.memory_space<vmem>>, vector<1x1x32x32xf32>
    %274 = vector.shape_cast %273 : vector<1x1x32x32xf32> to vector<32x32xf32>
    %cst_379 = arith.constant dense<0.000000e+00> : vector<128x32xf32>
    %275 = tpu.matmul %272, %274, %cst_379 {dimension_numbers = #tpu.dot_dimension_numbers<[1], [0], [0], [1], [0, 0, 1, 1], [], []>} : vector<128x32xf32>, vector<32x32xf32>, vector<128x32xf32> -> vector<128x32xf32>
    %276 = arith.addf %270, %275 : vector<128x32xf32>
    %c0_380 = arith.constant 0 : index
    %c2_381 = arith.constant 2 : index
    %c2_382 = arith.constant 2 : index
    %c0_383 = arith.constant 0 : index
    %277 = vector.load %arg15[%c0_380, %c2_381, %c2_382, %c0_383] : memref<2x10x10x32xf32, #tpu.memory_space<vmem>>, vector<2x8x8x32xf32>
    %278 = vector.shape_cast %277 : vector<2x8x8x32xf32> to vector<128x32xf32>
    %c1_384 = arith.constant 1 : index
    %c8_385 = arith.constant 8 : index
    %c0_386 = arith.constant 0 : index
    %c0_387 = arith.constant 0 : index
    %279 = vector.load %arg4[%c1_384, %c8_385, %c0_386, %c0_387] : memref<2x9x32x32xf32, #tpu.memory_space<vmem>>, vector<1x1x32x32xf32>
    %280 = vector.shape_cast %279 : vector<1x1x32x32xf32> to vector<32x32xf32>
    %cst_388 = arith.constant dense<0.000000e+00> : vector<128x32xf32>
    %281 = tpu.matmul %278, %280, %cst_388 {dimension_numbers = #tpu.dot_dimension_numbers<[1], [0], [0], [1], [0, 0, 1, 1], [], []>} : vector<128x32xf32>, vector<32x32xf32>, vector<128x32xf32> -> vector<128x32xf32>
    %282 = arith.addf %276, %281 : vector<128x32xf32>
    %283 = vector.broadcast %225 : vector<1x32xf32> to vector<128x32xf32>
    %284 = arith.addf %282, %283 : vector<128x32xf32>
    %c0_389 = arith.constant 0 : index
    %c0_390 = arith.constant 0 : index
    %285 = vector.load %arg12[%c0_389, %c0_390] : memref<2x128xf32, #tpu.memory_space<vmem>>, vector<2x128xf32>
    %cst_391 = arith.constant dense<0.000000e+00> : vector<2x32xf32>
    %286 = tpu.matmul %285, %284, %cst_391 {dimension_numbers = #tpu.dot_dimension_numbers<[1], [0], [0], [1], [0, 0, 1, 1], [], []>} : vector<2x128xf32>, vector<128x32xf32>, vector<2x32xf32> -> vector<2x32xf32>
    %c1_392 = arith.constant 1 : index
    %c0_393 = arith.constant 0 : index
    %c0_394 = arith.constant 0 : index
    %287 = vector.load %arg6[%c1_392, %c0_393, %c0_394] : memref<2x32x2xf32, #tpu.memory_space<vmem>>, vector<1x32x2xf32>
    %288 = vector.shape_cast %287 : vector<1x32x2xf32> to vector<32x2xf32>
    %cst_395 = arith.constant dense<0.000000e+00> : vector<2x2xf32>
    %289 = tpu.matmul %286, %288, %cst_395 {dimension_numbers = #tpu.dot_dimension_numbers<[1], [0], [0], [1], [0, 0, 1, 1], [], []>} : vector<2x32xf32>, vector<32x2xf32>, vector<2x2xf32> -> vector<2x2xf32>
    %c1_396 = arith.constant 1 : index
    %c0_397 = arith.constant 0 : index
    %c0_398 = arith.constant 0 : index
    %290 = vector.load %arg7[%c1_396, %c0_397, %c0_398] : memref<2x1x2xf32, #tpu.memory_space<vmem>>, vector<1x1x2xf32>
    %291 = vector.shape_cast %290 : vector<1x1x2xf32> to vector<1x2xf32>
    %292 = vector.broadcast %291 : vector<1x2xf32> to vector<2x2xf32>
    %293 = arith.addf %289, %292 : vector<2x2xf32>
    %cst_399 = arith.constant 0.000000e+00 : f32
    %294 = vector.broadcast %cst_399 : f32 to vector<2x2xf32>
    %295 = arith.maximumf %293, %294 : vector<2x2xf32>
    %c1_400 = arith.constant 1 : index
    %c0_401 = arith.constant 0 : index
    %c0_402 = arith.constant 0 : index
    %296 = vector.load %arg8[%c1_400, %c0_401, %c0_402] : memref<2x2x32xf32, #tpu.memory_space<vmem>>, vector<1x2x32xf32>
    %297 = vector.shape_cast %296 : vector<1x2x32xf32> to vector<2x32xf32>
    %cst_403 = arith.constant dense<0.000000e+00> : vector<2x32xf32>
    %298 = tpu.matmul %295, %297, %cst_403 {dimension_numbers = #tpu.dot_dimension_numbers<[1], [0], [0], [1], [0, 0, 1, 1], [], []>} : vector<2x2xf32>, vector<2x32xf32>, vector<2x32xf32> -> vector<2x32xf32>
    %c1_404 = arith.constant 1 : index
    %c0_405 = arith.constant 0 : index
    %c0_406 = arith.constant 0 : index
    %299 = vector.load %arg9[%c1_404, %c0_405, %c0_406] : memref<2x1x32xf32, #tpu.memory_space<vmem>>, vector<1x1x32xf32>
    %300 = vector.shape_cast %299 : vector<1x1x32xf32> to vector<1x32xf32>
    %301 = vector.broadcast %300 : vector<1x32xf32> to vector<2x32xf32>
    %302 = arith.addf %298, %301 : vector<2x32xf32>
    %cst_407 = arith.constant 0.000000e+00 : f32
    %303 = vector.broadcast %cst_407 : f32 to vector<2x32xf32>
    %304 = arith.subf %303, %302 : vector<2x32xf32>
    %305 = math.exp %304 : vector<2x32xf32>
    %cst_408 = arith.constant 1.000000e+00 : f32
    %306 = vector.broadcast %cst_408 : f32 to vector<2x32xf32>
    %307 = arith.addf %306, %305 : vector<2x32xf32>
    %cst_409 = arith.constant 1.000000e+00 : f32
    %308 = vector.broadcast %cst_409 : f32 to vector<2x32xf32>
    %309 = arith.divf %308, %307 : vector<2x32xf32>
    %c0_410 = arith.constant 0 : index
    %c0_411 = arith.constant 0 : index
    %310 = vector.load %arg13[%c0_410, %c0_411] : memref<128x2xf32, #tpu.memory_space<vmem>>, vector<128x2xf32>
    %cst_412 = arith.constant dense<0.000000e+00> : vector<128x32xf32>
    %311 = tpu.matmul %310, %309, %cst_412 {dimension_numbers = #tpu.dot_dimension_numbers<[1], [0], [0], [1], [0, 0, 1, 1], [], []>} : vector<128x2xf32>, vector<2x32xf32>, vector<128x32xf32> -> vector<128x32xf32>
    %312 = arith.mulf %284, %311 : vector<128x32xf32>
    %c0_413 = arith.constant 0 : index
    %c0_414 = arith.constant 0 : index
    %313 = vector.load %arg16[%c0_413, %c0_414] : memref<128x32xf32, #tpu.memory_space<vmem>>, vector<128x32xf32>
    %314 = arith.addf %312, %313 : vector<128x32xf32>
    %c0_415 = arith.constant 0 : index
    %c0_416 = arith.constant 0 : index
    %315 = vector.load %arg16[%c0_415, %c0_416] : memref<128x32xf32, #tpu.memory_space<vmem>>, vector<128x32xf32>
    tpu.vector_store %arg16[%c0_415, %c0_416], %314 {strides = array<i32>} : memref<128x32xf32, #tpu.memory_space<vmem>>, vector<128x32xf32>,
    %c0_417 = arith.constant 0 : index
    %c0_418 = arith.constant 0 : index
    %316 = vector.load %arg16[%c0_417, %c0_418] : memref<128x32xf32, #tpu.memory_space<vmem>>, vector<128x32xf32>
    %c0_419 = arith.constant 0 : index
    %c0_420 = arith.constant 0 : index
    %317 = vector.load %arg11[%c0_419, %c0_420] : memref<1x32xf32, #tpu.memory_space<vmem>>, vector<1x32xf32>
    %318 = vector.shape_cast %316 : vector<128x32xf32> to vector<2x8x8x32xf32>
    %c0_421 = arith.constant 0 : index
    %c1_422 = arith.constant 1 : index
    %c1_423 = arith.constant 1 : index
    %c0_424 = arith.constant 0 : index
    %319 = vector.load %arg15[%c0_421, %c1_422, %c1_423, %c0_424] : memref<2x10x10x32xf32, #tpu.memory_space<vmem>>, vector<2x8x8x32xf32>
    tpu.vector_store %arg15[%c0_421, %c1_422, %c1_423, %c0_424], %318 {strides = array<i32>} : memref<2x10x10x32xf32, #tpu.memory_space<vmem>>, vector<2x8x8x32xf32>,
    %cst_425 = arith.constant 0.000000e+00 : f32
    %320 = vector.broadcast %cst_425 : f32 to vector<128x32xf32>
    %c0_426 = arith.constant 0 : index
    %c0_427 = arith.constant 0 : index
    %c0_428 = arith.constant 0 : index
    %c0_429 = arith.constant 0 : index
    %321 = vector.load %arg15[%c0_426, %c0_427, %c0_428, %c0_429] : memref<2x10x10x32xf32, #tpu.memory_space<vmem>>, vector<2x8x8x32xf32>
    %322 = vector.shape_cast %321 : vector<2x8x8x32xf32> to vector<128x32xf32>
    %c0_430 = arith.constant 0 : index
    %c0_431 = arith.constant 0 : index
    %c0_432 = arith.constant 0 : index
    %323 = vector.load %arg10[%c0_430, %c0_431, %c0_432] : memref<9x32x32xf32, #tpu.memory_space<vmem>>, vector<1x32x32xf32>
    %324 = vector.shape_cast %323 : vector<1x32x32xf32> to vector<32x32xf32>
    %cst_433 = arith.constant dense<0.000000e+00> : vector<128x32xf32>
    %325 = tpu.matmul %322, %324, %cst_433 {dimension_numbers = #tpu.dot_dimension_numbers<[1], [0], [0], [1], [0, 0, 1, 1], [], []>} : vector<128x32xf32>, vector<32x32xf32>, vector<128x32xf32> -> vector<128x32xf32>
    %326 = arith.addf %320, %325 : vector<128x32xf32>
    %c0_434 = arith.constant 0 : index
    %c0_435 = arith.constant 0 : index
    %c1_436 = arith.constant 1 : index
    %c0_437 = arith.constant 0 : index
    %327 = vector.load %arg15[%c0_434, %c0_435, %c1_436, %c0_437] : memref<2x10x10x32xf32, #tpu.memory_space<vmem>>, vector<2x8x8x32xf32>
    %328 = vector.shape_cast %327 : vector<2x8x8x32xf32> to vector<128x32xf32>
    %c1_438 = arith.constant 1 : index
    %c0_439 = arith.constant 0 : index
    %c0_440 = arith.constant 0 : index
    %329 = vector.load %arg10[%c1_438, %c0_439, %c0_440] : memref<9x32x32xf32, #tpu.memory_space<vmem>>, vector<1x32x32xf32>
    %330 = vector.shape_cast %329 : vector<1x32x32xf32> to vector<32x32xf32>
    %cst_441 = arith.constant dense<0.000000e+00> : vector<128x32xf32>
    %331 = tpu.matmul %328, %330, %cst_441 {dimension_numbers = #tpu.dot_dimension_numbers<[1], [0], [0], [1], [0, 0, 1, 1], [], []>} : vector<128x32xf32>, vector<32x32xf32>, vector<128x32xf32> -> vector<128x32xf32>
    %332 = arith.addf %326, %331 : vector<128x32xf32>
    %c0_442 = arith.constant 0 : index
    %c0_443 = arith.constant 0 : index
    %c2_444 = arith.constant 2 : index
    %c0_445 = arith.constant 0 : index
    %333 = vector.load %arg15[%c0_442, %c0_443, %c2_444, %c0_445] : memref<2x10x10x32xf32, #tpu.memory_space<vmem>>, vector<2x8x8x32xf32>
    %334 = vector.shape_cast %333 : vector<2x8x8x32xf32> to vector<128x32xf32>
    %c2_446 = arith.constant 2 : index
    %c0_447 = arith.constant 0 : index
    %c0_448 = arith.constant 0 : index
    %335 = vector.load %arg10[%c2_446, %c0_447, %c0_448] : memref<9x32x32xf32, #tpu.memory_space<vmem>>, vector<1x32x32xf32>
    %336 = vector.shape_cast %335 : vector<1x32x32xf32> to vector<32x32xf32>
    %cst_449 = arith.constant dense<0.000000e+00> : vector<128x32xf32>
    %337 = tpu.matmul %334, %336, %cst_449 {dimension_numbers = #tpu.dot_dimension_numbers<[1], [0], [0], [1], [0, 0, 1, 1], [], []>} : vector<128x32xf32>, vector<32x32xf32>, vector<128x32xf32> -> vector<128x32xf32>
    %338 = arith.addf %332, %337 : vector<128x32xf32>
    %c0_450 = arith.constant 0 : index
    %c1_451 = arith.constant 1 : index
    %c0_452 = arith.constant 0 : index
    %c0_453 = arith.constant 0 : index
    %339 = vector.load %arg15[%c0_450, %c1_451, %c0_452, %c0_453] : memref<2x10x10x32xf32, #tpu.memory_space<vmem>>, vector<2x8x8x32xf32>
    %340 = vector.shape_cast %339 : vector<2x8x8x32xf32> to vector<128x32xf32>
    %c3_454 = arith.constant 3 : index
    %c0_455 = arith.constant 0 : index
    %c0_456 = arith.constant 0 : index
    %341 = vector.load %arg10[%c3_454, %c0_455, %c0_456] : memref<9x32x32xf32, #tpu.memory_space<vmem>>, vector<1x32x32xf32>
    %342 = vector.shape_cast %341 : vector<1x32x32xf32> to vector<32x32xf32>
    %cst_457 = arith.constant dense<0.000000e+00> : vector<128x32xf32>
    %343 = tpu.matmul %340, %342, %cst_457 {dimension_numbers = #tpu.dot_dimension_numbers<[1], [0], [0], [1], [0, 0, 1, 1], [], []>} : vector<128x32xf32>, vector<32x32xf32>, vector<128x32xf32> -> vector<128x32xf32>
    %344 = arith.addf %338, %343 : vector<128x32xf32>
    %c0_458 = arith.constant 0 : index
    %c1_459 = arith.constant 1 : index
    %c1_460 = arith.constant 1 : index
    %c0_461 = arith.constant 0 : index
    %345 = vector.load %arg15[%c0_458, %c1_459, %c1_460, %c0_461] : memref<2x10x10x32xf32, #tpu.memory_space<vmem>>, vector<2x8x8x32xf32>
    %346 = vector.shape_cast %345 : vector<2x8x8x32xf32> to vector<128x32xf32>
    %c4_462 = arith.constant 4 : index
    %c0_463 = arith.constant 0 : index
    %c0_464 = arith.constant 0 : index
    %347 = vector.load %arg10[%c4_462, %c0_463, %c0_464] : memref<9x32x32xf32, #tpu.memory_space<vmem>>, vector<1x32x32xf32>
    %348 = vector.shape_cast %347 : vector<1x32x32xf32> to vector<32x32xf32>
    %cst_465 = arith.constant dense<0.000000e+00> : vector<128x32xf32>
    %349 = tpu.matmul %346, %348, %cst_465 {dimension_numbers = #tpu.dot_dimension_numbers<[1], [0], [0], [1], [0, 0, 1, 1], [], []>} : vector<128x32xf32>, vector<32x32xf32>, vector<128x32xf32> -> vector<128x32xf32>
    %350 = arith.addf %344, %349 : vector<128x32xf32>
    %c0_466 = arith.constant 0 : index
    %c1_467 = arith.constant 1 : index
    %c2_468 = arith.constant 2 : index
    %c0_469 = arith.constant 0 : index
    %351 = vector.load %arg15[%c0_466, %c1_467, %c2_468, %c0_469] : memref<2x10x10x32xf32, #tpu.memory_space<vmem>>, vector<2x8x8x32xf32>
    %352 = vector.shape_cast %351 : vector<2x8x8x32xf32> to vector<128x32xf32>
    %c5_470 = arith.constant 5 : index
    %c0_471 = arith.constant 0 : index
    %c0_472 = arith.constant 0 : index
    %353 = vector.load %arg10[%c5_470, %c0_471, %c0_472] : memref<9x32x32xf32, #tpu.memory_space<vmem>>, vector<1x32x32xf32>
    %354 = vector.shape_cast %353 : vector<1x32x32xf32> to vector<32x32xf32>
    %cst_473 = arith.constant dense<0.000000e+00> : vector<128x32xf32>
    %355 = tpu.matmul %352, %354, %cst_473 {dimension_numbers = #tpu.dot_dimension_numbers<[1], [0], [0], [1], [0, 0, 1, 1], [], []>} : vector<128x32xf32>, vector<32x32xf32>, vector<128x32xf32> -> vector<128x32xf32>
    %356 = arith.addf %350, %355 : vector<128x32xf32>
    %c0_474 = arith.constant 0 : index
    %c2_475 = arith.constant 2 : index
    %c0_476 = arith.constant 0 : index
    %c0_477 = arith.constant 0 : index
    %357 = vector.load %arg15[%c0_474, %c2_475, %c0_476, %c0_477] : memref<2x10x10x32xf32, #tpu.memory_space<vmem>>, vector<2x8x8x32xf32>
    %358 = vector.shape_cast %357 : vector<2x8x8x32xf32> to vector<128x32xf32>
    %c6_478 = arith.constant 6 : index
    %c0_479 = arith.constant 0 : index
    %c0_480 = arith.constant 0 : index
    %359 = vector.load %arg10[%c6_478, %c0_479, %c0_480] : memref<9x32x32xf32, #tpu.memory_space<vmem>>, vector<1x32x32xf32>
    %360 = vector.shape_cast %359 : vector<1x32x32xf32> to vector<32x32xf32>
    %cst_481 = arith.constant dense<0.000000e+00> : vector<128x32xf32>
    %361 = tpu.matmul %358, %360, %cst_481 {dimension_numbers = #tpu.dot_dimension_numbers<[1], [0], [0], [1], [0, 0, 1, 1], [], []>} : vector<128x32xf32>, vector<32x32xf32>, vector<128x32xf32> -> vector<128x32xf32>
    %362 = arith.addf %356, %361 : vector<128x32xf32>
    %c0_482 = arith.constant 0 : index
    %c2_483 = arith.constant 2 : index
    %c1_484 = arith.constant 1 : index
    %c0_485 = arith.constant 0 : index
    %363 = vector.load %arg15[%c0_482, %c2_483, %c1_484, %c0_485] : memref<2x10x10x32xf32, #tpu.memory_space<vmem>>, vector<2x8x8x32xf32>
    %364 = vector.shape_cast %363 : vector<2x8x8x32xf32> to vector<128x32xf32>
    %c7_486 = arith.constant 7 : index
    %c0_487 = arith.constant 0 : index
    %c0_488 = arith.constant 0 : index
    %365 = vector.load %arg10[%c7_486, %c0_487, %c0_488] : memref<9x32x32xf32, #tpu.memory_space<vmem>>, vector<1x32x32xf32>
    %366 = vector.shape_cast %365 : vector<1x32x32xf32> to vector<32x32xf32>
    %cst_489 = arith.constant dense<0.000000e+00> : vector<128x32xf32>
    %367 = tpu.matmul %364, %366, %cst_489 {dimension_numbers = #tpu.dot_dimension_numbers<[1], [0], [0], [1], [0, 0, 1, 1], [], []>} : vector<128x32xf32>, vector<32x32xf32>, vector<128x32xf32> -> vector<128x32xf32>
    %368 = arith.addf %362, %367 : vector<128x32xf32>
    %c0_490 = arith.constant 0 : index
    %c2_491 = arith.constant 2 : index
    %c2_492 = arith.constant 2 : index
    %c0_493 = arith.constant 0 : index
    %369 = vector.load %arg15[%c0_490, %c2_491, %c2_492, %c0_493] : memref<2x10x10x32xf32, #tpu.memory_space<vmem>>, vector<2x8x8x32xf32>
    %370 = vector.shape_cast %369 : vector<2x8x8x32xf32> to vector<128x32xf32>
    %c8_494 = arith.constant 8 : index
    %c0_495 = arith.constant 0 : index
    %c0_496 = arith.constant 0 : index
    %371 = vector.load %arg10[%c8_494, %c0_495, %c0_496] : memref<9x32x32xf32, #tpu.memory_space<vmem>>, vector<1x32x32xf32>
    %372 = vector.shape_cast %371 : vector<1x32x32xf32> to vector<32x32xf32>
    %cst_497 = arith.constant dense<0.000000e+00> : vector<128x32xf32>
    %373 = tpu.matmul %370, %372, %cst_497 {dimension_numbers = #tpu.dot_dimension_numbers<[1], [0], [0], [1], [0, 0, 1, 1], [], []>} : vector<128x32xf32>, vector<32x32xf32>, vector<128x32xf32> -> vector<128x32xf32>
    %374 = arith.addf %368, %373 : vector<128x32xf32>
    %375 = vector.broadcast %317 : vector<1x32xf32> to vector<128x32xf32>
    %376 = arith.addf %374, %375 : vector<128x32xf32>
    %c0_498 = arith.constant 0 : index
    %c0_499 = arith.constant 0 : index
    %377 = vector.load %arg1[%c0_498, %c0_499] : memref<128x32xf32, #tpu.memory_space<vmem>>, vector<128x32xf32>
    %378 = arith.addf %376, %377 : vector<128x32xf32>
    %c0_500 = arith.constant 0 : index
    %c0_501 = arith.constant 0 : index
    %379 = vector.load %arg14[%c0_500, %c0_501] : memref<128x32xf32, #tpu.memory_space<vmem>>, vector<128x32xf32>
    tpu.vector_store %arg14[%c0_500, %c0_501], %378 {strides = array<i32>} : memref<128x32xf32, #tpu.memory_space<vmem>>, vector<128x32xf32>,
    return
  }
  func.func @transform_0(%arg0: i32) -> (i32, i32) {
    %c0_i32 = arith.constant 0 : i32
    %c0_i32_0 = arith.constant 0 : i32
    %c0_i32_1 = arith.constant 0 : i32
    return %c0_i32, %c0_i32_0 : i32, i32
  }
  func.func @transform_1(%arg0: i32) -> (i32, i32, i32, i32) {
    %c0_i32 = arith.constant 0 : i32
    %c0_i32_0 = arith.constant 0 : i32
    %c0_i32_1 = arith.constant 0 : i32
    %c0_i32_2 = arith.constant 0 : i32
    %c0_i32_3 = arith.constant 0 : i32
    return %c0_i32, %c0_i32_0, %c0_i32_1, %c0_i32_2 : i32, i32, i32, i32
  }
  func.func @transform_2(%arg0: i32) -> (i32, i32, i32) {
    %c0_i32 = arith.constant 0 : i32
    %c0_i32_0 = arith.constant 0 : i32
    %c0_i32_1 = arith.constant 0 : i32
    %c0_i32_2 = arith.constant 0 : i32
    return %c0_i32, %c0_i32_0, %c0_i32_1 : i32, i32, i32
  }
  func.func @transform_3(%arg0: i32) -> (i32, i32, i32, i32) {
    %c0_i32 = arith.constant 0 : i32
    %c0_i32_0 = arith.constant 0 : i32
    %c0_i32_1 = arith.constant 0 : i32
    %c0_i32_2 = arith.constant 0 : i32
    %c0_i32_3 = arith.constant 0 : i32
    return %c0_i32, %c0_i32_0, %c0_i32_1, %c0_i32_2 : i32, i32, i32, i32
  }
  func.func @transform_4(%arg0: i32) -> (i32, i32, i32) {
    %c0_i32 = arith.constant 0 : i32
    %c0_i32_0 = arith.constant 0 : i32
    %c0_i32_1 = arith.constant 0 : i32
    %c0_i32_2 = arith.constant 0 : i32
    return %c0_i32, %c0_i32_0, %c0_i32_1 : i32, i32, i32
  }
  func.func @transform_5(%arg0: i32) -> (i32, i32, i32) {
    %c0_i32 = arith.constant 0 : i32
    %c0_i32_0 = arith.constant 0 : i32
    %c0_i32_1 = arith.constant 0 : i32
    %c0_i32_2 = arith.constant 0 : i32
    return %c0_i32, %c0_i32_0, %c0_i32_1 : i32, i32, i32
  }
  func.func @transform_6(%arg0: i32) -> (i32, i32, i32) {
    %c0_i32 = arith.constant 0 : i32
    %c0_i32_0 = arith.constant 0 : i32
    %c0_i32_1 = arith.constant 0 : i32
    %c0_i32_2 = arith.constant 0 : i32
    return %c0_i32, %c0_i32_0, %c0_i32_1 : i32, i32, i32
  }
  func.func @transform_7(%arg0: i32) -> (i32, i32, i32) {
    %c0_i32 = arith.constant 0 : i32
    %c0_i32_0 = arith.constant 0 : i32
    %c0_i32_1 = arith.constant 0 : i32
    %c0_i32_2 = arith.constant 0 : i32
    return %c0_i32, %c0_i32_0, %c0_i32_1 : i32, i32, i32
  }
  func.func @transform_8(%arg0: i32) -> (i32, i32, i32) {
    %c0_i32 = arith.constant 0 : i32
    %c0_i32_0 = arith.constant 0 : i32
    %c0_i32_1 = arith.constant 0 : i32
    %c0_i32_2 = arith.constant 0 : i32
    return %c0_i32, %c0_i32_0, %c0_i32_1 : i32, i32, i32
  }
  func.func @transform_9(%arg0: i32) -> (i32, i32, i32) {
    %c0_i32 = arith.constant 0 : i32
    %c0_i32_0 = arith.constant 0 : i32
    %c0_i32_1 = arith.constant 0 : i32
    %c0_i32_2 = arith.constant 0 : i32
    return %c0_i32, %c0_i32_0, %c0_i32_1 : i32, i32, i32
  }
  func.func @transform_10(%arg0: i32) -> (i32, i32) {
    %c0_i32 = arith.constant 0 : i32
    %c0_i32_0 = arith.constant 0 : i32
    %c0_i32_1 = arith.constant 0 : i32
    return %c0_i32, %c0_i32_0 : i32, i32
  }
  func.func @transform_11(%arg0: i32) -> (i32, i32) {
    %c0_i32 = arith.constant 0 : i32
    %c0_i32_0 = arith.constant 0 : i32
    %c0_i32_1 = arith.constant 0 : i32
    return %c0_i32, %c0_i32_0 : i32, i32
  }
  func.func @transform_12(%arg0: i32) -> (i32, i32) {
    %c0_i32 = arith.constant 0 : i32
    %c0_i32_0 = arith.constant 0 : i32
    %c0_i32_1 = arith.constant 0 : i32
    return %c0_i32, %c0_i32_0 : i32, i32
  }
  func.func @transform_13(%arg0: i32) -> (i32, i32) {
    %c0_i32 = arith.constant 0 : i32
    %c0_i32_0 = arith.constant 0 : i32
    %c0_i32_1 = arith.constant 0 : i32
    return %c0_i32, %c0_i32_0 : i32, i32
  }
}

</mosaic_0001>

<bundles_post_ra>
// kernel: tpu_custom_call.1
= control target key start
LH: loop header
LB: loop body
LE: loop exit
PB: predicated region body
PF: predicated region fallthrough
CT: control target
= control target key end

     0   :  { %18 = vsyncpa [#allocation5], 0  ;;  %s19199_s0 = inlined_call_operand.vmem [shape: f32[128,32], index: 0, kind: input, shape index: {}]   ;;  %s19200_s1 = inlined_call_operand.hbm [shape: f32[2,9,32,32], index: 1, kind: input, shape index: {}]   ;;  %s19201_s2 = inlined_call_operand.vmem [shape: f32[2,1,32], index: 2, kind: input, shape index: {}]   ;;  %s19202_s3 = inlined_call_operand.hbm [shape: f32[2,9,32,32], index: 3, kind: input, shape index: {}]   ;;  %s19203_s4 = inlined_call_operand.vmem [shape: f32[2,1,32], index: 4, kind: input, shape index: {}]   ;;  %s19204_s5 = inlined_call_operand.vmem [shape: f32[2,32,2], index: 5, kind: input, shape index: {}]   ;;  %s19205_s6 = inlined_call_operand.vmem [shape: f32[2,1,2], index: 6, kind: input, shape index: {}]   ;;  %s19206_s7 = inlined_call_operand.vmem [shape: f32[2,2,32], index: 7, kind: input, shape index: {}]   ;;  %s19207_s8 = inlined_call_operand.vmem [shape: f32[2,1,32], index: 8, kind: input, shape index: {}]   ;;  %s19208_s9 = inlined_call_operand.vmem [shape: f32[9,32,32], index: 9, kind: input, shape index: {}]   ;;  %s19209_s10 = inlined_call_operand.vmem [shape: f32[1,32], index: 10, kind: input, shape index: {}]   ;;  %s19210_s11 = inlined_call_operand.vmem [shape: f32[2,128], index: 11, kind: input, shape index: {}]   ;;  %s19211_s12 = inlined_call_operand.vmem [shape: f32[128,2], index: 12, kind: input, shape index: {}]   ;;  %s19212_s13 = inlined_call_operand.vmem [shape: f32[128,32], index: 13, kind: output, shape index: {}]  }
   0x1   :  { %19 = vsyncpa [#allocation7], 0  ;;  %s16229_s25 = smov [#allocation4]   ;;  %s16181_s29 = scalar_lea.hbm %s19200_s1, 9216 }
   0x2   :  { %s27_s26 = sshll.u32 %s16229_s25, 4  ;;  %p16182_p0 = scmp.ne.s32.totalorder %s19200_s1, %s16181_s29  ;;  %s28_s26 = int_to_ptr.vmem [resolvable:$true] %s27_s26 }
   0x3   :  { %p16185_p1 = scmp.lt.u32.totalorder %s16181_s29, %s19200_s1 }
   0x5   :  { %p16187_p2 = pnand %p16185_p1, %p16182_p0 }
   0x7   :  { %16190 = shalt.err (!%p16187_p2)
}
   0x8   :  { %s16191_s17 = scalar_lea.vmem %s28_s26, 9216  ;;  %p16196_p4 = scmp.lt.s32.totalorder %s28_s26, %s28_s26 }
   0x9   :  { %p16192_p3 = scmp.ne.s32.totalorder %s28_s26, %s16191_s17  ;;  %p16197_p5 = scmp.lt.s32.totalorder %s16191_s17, %s16191_s17 }
   0xb   :  { %p16198_p6 = por %p16197_p5, %p16196_p4 }
   0xd   :  { %p16199_p7 = pnand %p16198_p6, %p16192_p3 }
   0xf   :  { %16202 = shalt.err (!%p16199_p7)
}
  0x10   :  { %s16230_s18 = smov 128   ;;  %s16231_s19 = smov 8  }
  0x11   :  { %33 = dma.hbm_to_vmem [thread:$0]  %s19200_s1, 9216, %s28_s26, [#allocation5], %s16230_s18, %s16230_s18, %s16231_s19  }
  0x12   :  { %s16232_s22 = smov [#allocation6]   ;;  %s16203_s27 = scalar_lea.hbm %s19202_s3, 9216 }
  0x13   :  { %s41_s23 = sshll.u32 %s16232_s22, 4  ;;  %p16204_p8 = scmp.ne.s32.totalorder %s19202_s3, %s16203_s27  ;;  %s42_s23 = int_to_ptr.vmem [resolvable:$true] %s41_s23 }
  0x14   :  { %p16207_p9 = scmp.lt.u32.totalorder %s16203_s27, %s19202_s3 }
  0x16   :  { %p16209_p10 = pnand %p16207_p9, %p16204_p8 }
  0x18   :  { %16212 = shalt.err (!%p16209_p10)
}
  0x19   :  { %s16213_s15 = scalar_lea.vmem %s42_s23, 9216  ;;  %p16218_p12 = scmp.lt.s32.totalorder %s42_s23, %s42_s23 }
  0x1a   :  { %p16214_p11 = scmp.ne.s32.totalorder %s42_s23, %s16213_s15  ;;  %p16219_p13 = scmp.lt.s32.totalorder %s16213_s15, %s16213_s15 }
  0x1c   :  { %p16220_p0 = por %p16219_p13, %p16218_p12 }
  0x1e   :  { %p16221_p1 = pnand %p16220_p0, %p16214_p11 }
  0x20   :  { %16224 = shalt.err (!%p16221_p1)
}
  0x21   :  { %47 = dma.hbm_to_vmem [thread:$0]  %s19202_s3, 9216, %s42_s23, [#allocation7], %s16230_s18, %s16230_s18, %s16231_s19  }
  0x22   :  { %16225 = dma.done.wait [#allocation5], 9216  }
  0x23   :  { %16226 = vsyncadd [#allocation5], 4294958080 }
  0x24   :  { %16227 = dma.done.wait [#allocation7], 9216  }
  0x25   :  { %16228 = vsyncadd [#allocation7], 4294958080  ;;  %vm72_vm0 = vcmask 261120   ;;  %vm74_vm1 = vcmask 254976   ;;  %v16233_v0 = vmov 0.0   ;;  %v217_v1 = vld [vmem:[#allocation4 + $0x20] sm:$0xff] }
  0x26   :  { %73 = vst.msk [vmem:[#allocation2] sm:$0xff] %vm72_vm0, %v16233_v0  ;;  %76 = vst.msk [vmem:[#allocation2 + $0x10] sm:$0xff] %vm72_vm0, %v16233_v0  ;;  %v218_v2 = vld [vmem:[#allocation4 + $0x28] sm:$0xff]  ;;  %v219_v3 = vld [vmem:[#allocation4 + $0x30] sm:$0xff]  ;;  %vm16235_vm2 = vmmov 0   ;;  %vm4500_vm3 = vcmask 1041408  }
  0x27   :  { %75 = vst.msk [vmem:[#allocation2 + $0x8] sm:$0x3] %vm74_vm1, %v16233_v0  ;;  %77 = vst.msk [vmem:[#allocation2 + $0x18] sm:$0x3] %vm74_vm1, %v16233_v0  ;;  %v15102_v4 = vpack.c.bf16 %v218_v2, %v217_v1  ;;  %v220_v5 = vld [vmem:[#allocation4 + $0x38] sm:$0xff]  ;;  %v114_v7 = vld [vmem:[%s19199_s0] sm:$0xff] }
  0x28   :  { %78 = vst.msk [vmem:[#allocation2 + $0x20] sm:$0xff] %vm72_vm0, %v16233_v0  ;;  %80 = vst.msk [vmem:[#allocation2 + $0x30] sm:$0xff] %vm72_vm0, %v16233_v0  ;;  %v15106_v8 = vpack.c.bf16 %v220_v5, %v219_v3  ;;  %v196_v9 = vld [vmem:[#allocation4] sm:$0xff]  ;;  %v197_v10 = vld [vmem:[#allocation4 + $0x8] sm:$0xff]  ;;  %vm4496_vm4 = vcmask 15360  }
  0x29   :  { %79 = vst.msk [vmem:[#allocation2 + $0x28] sm:$0x3] %vm74_vm1, %v16233_v0  ;;  %81 = vst.msk [vmem:[#allocation2 + $0x38] sm:$0x3] %vm74_vm1, %v16233_v0  ;;  %v115_v11 = vld [vmem:[%s19199_s0 + $0x8] sm:$0xff]  ;;  %15103 = vmatprep.subr.bf16.mxu0 %v15102_v4  ;;  %v116_v12 = vld [vmem:[%s19199_s0 + $0x10] sm:$0xff]  ;;  %v15110_v17 = vpack.c.bf16 %v197_v10, %v196_v9 }
  0x2a   :  { %82 = vst.msk [vmem:[#allocation2 + $0x40] sm:$0xff] %vm72_vm0, %v16233_v0  ;;  %84 = vst.msk [vmem:[#allocation2 + $0x50] sm:$0xff] %vm72_vm0, %v16233_v0  ;;  %v117_v13 = vld [vmem:[%s19199_s0 + $0x18] sm:$0xff]  ;;  %v118_v14 = vld [vmem:[%s19199_s0 + $0x20] sm:$0xff]  ;;  %15105 = vmatpush3.bf16.msra.mxu0 %v15102_v4 }
  0x2b   :  { %83 = vst.msk [vmem:[#allocation2 + $0x48] sm:$0x3] %vm74_vm1, %v16233_v0  ;;  %85 = vst.msk [vmem:[#allocation2 + $0x58] sm:$0x3] %vm74_vm1, %v16233_v0  ;;  %v119_v15 = vld [vmem:[%s19199_s0 + $0x28] sm:$0xff]  ;;  %v120_v16 = vld [vmem:[%s19199_s0 + $0x30] sm:$0xff]  ;;  %15107 = vmatprep.subr.bf16.mxu0 %v15106_v8 }
  0x2c   :  { %86 = vst.msk [vmem:[#allocation2 + $0x60] sm:$0xff] %vm72_vm0, %v16233_v0  ;;  %88 = vst.msk [vmem:[#allocation2 + $0x70] sm:$0xff] %vm72_vm0, %v16233_v0  ;;  %v122_v18 = vld [vmem:[%s19199_s0 + $0x40] sm:$0xff]  ;;  %v123_v19 = vld [vmem:[%s19199_s0 + $0x48] sm:$0xff] }
  0x2d   :  { %87 = vst.msk [vmem:[#allocation2 + $0x68] sm:$0x3] %vm74_vm1, %v16233_v0  ;;  %89 = vst.msk [vmem:[#allocation2 + $0x78] sm:$0x3] %vm74_vm1, %v16233_v0  ;;  %v124_v20 = vld [vmem:[%s19199_s0 + $0x50] sm:$0xff]  ;;  %v125_v21 = vld [vmem:[%s19199_s0 + $0x58] sm:$0xff] }
  0x2e   :  { %90 = vst.msk [vmem:[#allocation2 + $0x80] sm:$0xff] %vm72_vm0, %v16233_v0  ;;  %92 = vst.msk [vmem:[#allocation2 + $0x90] sm:$0xff] %vm72_vm0, %v16233_v0  ;;  %v200_v6 = vld [vmem:[#allocation2 + $0x1] sm:$0xff]  ;;  %v128_v24 = vld [vmem:[%s19199_s0 + $0x70] sm:$0xff]  ;;  %15109 = vmatpush3.bf16.msra.mxu0 %v15106_v8 }
  0x2f   :  { %91 = vst.msk [vmem:[#allocation2 + $0x88] sm:$0x3] %vm74_vm1, %v16233_v0  ;;  %93 = vst.msk [vmem:[#allocation2 + $0x98] sm:$0x3] %vm74_vm1, %v16233_v0  ;;  %13516 = vmatprep.mubr.msk.f32.mxu0 %vm72_vm0, %v200_v6  ;;  %v126_v22 = vld [vmem:[%s19199_s0 + $0x60] sm:$0xff]  ;;  %v127_v23 = vld [vmem:[%s19199_s0 + $0x68] sm:$0xff]  ;;  %15111 = vmatprep.subr.bf16.mxu0 %v15110_v17 }
  0x30   :  { %94 = vst.msk [vmem:[#allocation2 + $0xa0] sm:$0xff] %vm72_vm0, %v16233_v0  ;;  %96 = vst.msk [vmem:[#allocation2 + $0xb0] sm:$0xff] %vm72_vm0, %v16233_v0  ;;  %v198_v33 = vld [vmem:[#allocation4 + $0x10] sm:$0xff]  ;;  %v199_v34 = vld [vmem:[#allocation4 + $0x18] sm:$0xff] }
  0x31   :  { %95 = vst.msk [vmem:[#allocation2 + $0xa8] sm:$0x3] %vm74_vm1, %v16233_v0  ;;  %97 = vst.msk [vmem:[#allocation2 + $0xb8] sm:$0x3] %vm74_vm1, %v16233_v0  ;;  %v15114_v41 = vpack.c.bf16 %v199_v34, %v198_v33  ;;  %v624_v43 = vld [vmem:[#allocation4 + $0x40] sm:$0xff]  ;;  %v625_v44 = vld [vmem:[#allocation4 + $0x48] sm:$0xff] }
  0x32   :  { %98 = vst.msk [vmem:[#allocation2 + $0xc0] sm:$0xff] %vm72_vm0, %v16233_v0  ;;  %100 = vst.msk [vmem:[#allocation2 + $0xd0] sm:$0xff] %vm72_vm0, %v16233_v0  ;;  %v15118_v48 = vpack.c.bf16 %v625_v44, %v624_v43  ;;  %v121_v54 = vld [vmem:[%s19199_s0 + $0x38] sm:$0xff]  ;;  %v16549_v1 = vld [vmem:[#allocation2] sm:$0xff] }
  0x33   :  { %99 = vst.msk [vmem:[#allocation2 + $0xc8] sm:$0x3] %vm74_vm1, %v16233_v0  ;;  %101 = vst.msk [vmem:[#allocation2 + $0xd8] sm:$0x3] %vm74_vm1, %v16233_v0  ;;  %v129_v56 = vld [vmem:[%s19199_s0 + $0x78] sm:$0xff]  ;;  %v626_v2 = vld [vmem:[#allocation4 + $0x50] sm:$0xff] }
  0x34   :  { %102 = vst.msk [vmem:[#allocation2 + $0xe0] sm:$0xff] %vm72_vm0, %v16233_v0  ;;  %104 = vst.msk [vmem:[#allocation2 + $0xf0] sm:$0xff] %vm72_vm0, %v16233_v0  ;;  %v627_v3 = vld [vmem:[#allocation4 + $0x58] sm:$0xff]  ;;  %v855_v8 = vld [vmem:[#allocation4 + $0x68] sm:$0xff] }
  0x35   :  { %103 = vst.msk [vmem:[#allocation2 + $0xe8] sm:$0x3] %vm74_vm1, %v16233_v0  ;;  %105 = vst.msk [vmem:[#allocation2 + $0xf8] sm:$0x3] %vm74_vm1, %v16233_v0  ;;  %v15122_v6 = vpack.c.bf16 %v627_v3, %v626_v2  ;;  %v1315_v2 = vld [vmem:[#allocation4 + $0xa8] sm:$0xff] }
  0x36   :  { %106 = vst.msk [vmem:[#allocation2 + $0x100] sm:$0xff] %vm72_vm0, %v16233_v0  ;;  %108 = vst.msk [vmem:[#allocation2 + $0x110] sm:$0xff] %vm72_vm0, %v16233_v0 }
  0x37   :  { %107 = vst.msk [vmem:[#allocation2 + $0x108] sm:$0x3] %vm74_vm1, %v16233_v0  ;;  %109 = vst.msk [vmem:[#allocation2 + $0x118] sm:$0x3] %vm74_vm1, %v16233_v0 }
  0x38   :  { %110 = vst.msk [vmem:[#allocation2 + $0x120] sm:$0xff] %vm72_vm0, %v16233_v0  ;;  %112 = vst.msk [vmem:[#allocation2 + $0x130] sm:$0xff] %vm72_vm0, %v16233_v0  ;;  %v16507_v52 = vld [vmem:[#allocation2 + $0xa1] sm:$0xff] }
  0x39   :  { %111 = vst.msk [vmem:[#allocation2 + $0x128] sm:$0x3] %vm74_vm1, %v16233_v0  ;;  %113 = vst.msk [vmem:[#allocation2 + $0x138] sm:$0x3] %vm74_vm1, %v16233_v0 }
  0x3a   :  { %130 = vst.msk [vmem:[#allocation3] sm:$0xff] %vm72_vm0, %v114_v7  ;;  %131 = vst.msk [vmem:[#allocation3 + $0x8] sm:$0xff] %vm72_vm0, %v115_v11  ;;  %v854_v7 = vld [vmem:[#allocation4 + $0x60] sm:$0xff] }
  0x3b   :  { %132 = vst.msk [vmem:[#allocation3 + $0x10] sm:$0xff] %vm72_vm0, %v116_v12  ;;  %133 = vst.msk [vmem:[#allocation3 + $0x18] sm:$0xff] %vm72_vm0, %v117_v13  ;;  %v15126_v11 = vpack.c.bf16 %v855_v8, %v854_v7  ;;  %v1316_v7 = vld [vmem:[#allocation4 + $0xb0] sm:$0xff]  ;;  %v1317_v8 = vld [vmem:[#allocation4 + $0xb8] sm:$0xff] }
  0x3c   :  { %134 = vst.msk [vmem:[#allocation3 + $0x20] sm:$0xff] %vm72_vm0, %v118_v14  ;;  %135 = vst.msk [vmem:[#allocation3 + $0x28] sm:$0xff] %vm72_vm0, %v119_v15  ;;  %v188_v15 = vld [vmem:[#allocation2 + $0xa0] sm:$0xff] }
  0x3d   :  { %136 = vst.msk [vmem:[#allocation3 + $0x30] sm:$0xff] %vm72_vm0, %v120_v16  ;;  %138 = vst.msk [vmem:[#allocation3 + $0x40] sm:$0xff] %vm72_vm0, %v122_v18 }
  0x3e   :  { %139 = vst.msk [vmem:[#allocation3 + $0x48] sm:$0xff] %vm72_vm0, %v123_v19  ;;  %140 = vst.msk [vmem:[#allocation3 + $0x50] sm:$0xff] %vm72_vm0, %v124_v20 }
  0x3f   :  { %141 = vst.msk [vmem:[#allocation3 + $0x58] sm:$0xff] %vm72_vm0, %v125_v21  ;;  %142 = vst.msk [vmem:[#allocation3 + $0x60] sm:$0xff] %vm72_vm0, %v126_v22 }
  0x40   :  { %143 = vst.msk [vmem:[#allocation3 + $0x68] sm:$0xff] %vm72_vm0, %v127_v23  ;;  %144 = vst.msk [vmem:[#allocation3 + $0x70] sm:$0xff] %vm72_vm0, %v128_v24  ;;  %v607_v23 = vld [vmem:[#allocation2 + $0x2] sm:$0xff]  ;;  %v856_v24 = vld [vmem:[#allocation4 + $0x70] sm:$0xff] }
  0x41   :  { %v146_v25 = vld [vmem:[#allocation3] sm:$0xff]  ;;  %v147_v26 = vld [vmem:[#allocation3 + $0x8] sm:$0xff]  ;;  %137 = vst.msk [vmem:[#allocation3 + $0x38] sm:$0xff] %vm72_vm0, %v121_v54  ;;  %145 = vst.msk [vmem:[#allocation3 + $0x78] sm:$0xff] %vm72_vm0, %v129_v56 }
  0x42   :  { %164 = vst.msk [vmem:[#allocation2 + $0x11] sm:$0xff] %vm72_vm0, %v146_v25  ;;  %165 = vst.msk [vmem:[#allocation2 + $0x21] sm:$0xff] %vm72_vm0, %v147_v26  ;;  %v148_v27 = vld [vmem:[#allocation3 + $0x10] sm:$0xff]  ;;  %v149_v28 = vld [vmem:[#allocation3 + $0x18] sm:$0xff] }
  0x43   :  { %v150_v29 = vld [vmem:[#allocation3 + $0x20] sm:$0xff]  ;;  %166 = vst.msk [vmem:[#allocation2 + $0x31] sm:$0xff] %vm72_vm0, %v148_v27  ;;  %167 = vst.msk [vmem:[#allocation2 + $0x41] sm:$0xff] %vm72_vm0, %v149_v28  ;;  %v151_v30 = vld [vmem:[#allocation3 + $0x28] sm:$0xff] }
  0x44   :  { %168 = vst.msk [vmem:[#allocation2 + $0x51] sm:$0xff] %vm72_vm0, %v150_v29  ;;  %v152_v31 = vld [vmem:[#allocation3 + $0x30] sm:$0xff]  ;;  %169 = vst.msk [vmem:[#allocation2 + $0x61] sm:$0xff] %vm72_vm0, %v151_v30  ;;  %v154_v32 = vld [vmem:[#allocation3 + $0x40] sm:$0xff] }
  0x45   :  { %170 = vst.msk [vmem:[#allocation2 + $0x71] sm:$0xff] %vm72_vm0, %v152_v31  ;;  %172 = vst.msk [vmem:[#allocation2 + $0xb1] sm:$0xff] %vm72_vm0, %v154_v32  ;;  %v155_v35 = vld [vmem:[#allocation3 + $0x48] sm:$0xff]  ;;  %v156_v36 = vld [vmem:[#allocation3 + $0x50] sm:$0xff] }
  0x46   :  { %v157_v37 = vld [vmem:[#allocation3 + $0x58] sm:$0xff]  ;;  %173 = vst.msk [vmem:[#allocation2 + $0xc1] sm:$0xff] %vm72_vm0, %v155_v35  ;;  %174 = vst.msk [vmem:[#allocation2 + $0xd1] sm:$0xff] %vm72_vm0, %v156_v36  ;;  %v158_v38 = vld [vmem:[#allocation3 + $0x60] sm:$0xff] }
  0x47   :  { %175 = vst.msk [vmem:[#allocation2 + $0xe1] sm:$0xff] %vm72_vm0, %v157_v37  ;;  %v159_v39 = vld [vmem:[#allocation3 + $0x68] sm:$0xff]  ;;  %v160_v40 = vld [vmem:[#allocation3 + $0x70] sm:$0xff]  ;;  %176 = vst.msk [vmem:[#allocation2 + $0xf1] sm:$0xff] %vm72_vm0, %v158_v38 }
  0x48   :  { %177 = vst.msk [vmem:[#allocation2 + $0x101] sm:$0xff] %vm72_vm0, %v159_v39  ;;  %178 = vst.msk [vmem:[#allocation2 + $0x111] sm:$0xff] %vm72_vm0, %v160_v40  ;;  %v153_v60 = vld [vmem:[#allocation3 + $0x38] sm:$0xff]  ;;  %v1084_v29 = vld [vmem:[#allocation4 + $0x80] sm:$0xff] }
  0x49   :  { %v16481_v42 = vld [vmem:[#allocation2 + $0x11] sm:$0xff]  ;;  %v16485_v45 = vld [vmem:[#allocation2 + $0x21] sm:$0xff]  ;;  %171 = vst.msk [vmem:[#allocation2 + $0x81] sm:$0xff] %vm72_vm0, %v153_v60 }
  0x4a   :  { %13517 = vmatmul.mubr.msk.f32.vlgmr.msra.gmra.mrb[0].mxu0 %vm72_vm0, %v16481_v42  ;;  %v16489_v46 = vld [vmem:[#allocation2 + $0x31] sm:$0xff]  ;;  %v16491_v47 = vld [vmem:[#allocation2 + $0x41] sm:$0xff] }
  0x4b   :  { %13519 = vmatprep.mubr.msk.f32.mxu0 %vm72_vm0, %v16485_v45  ;;  %15113 = vmatpush3.bf16.msra.mxu0 %v15110_v17  ;;  %v16497_v49 = vld [vmem:[#allocation2 + $0x51] sm:$0xff]  ;;  %v16499_v50 = vld [vmem:[#allocation2 + $0x61] sm:$0xff] }
  0x4c   :  { %15115 = vmatprep.subr.bf16.mxu0 %v15114_v41  ;;  %v16505_v51 = vld [vmem:[#allocation2 + $0x71] sm:$0xff]  ;;  %v16557_v5 = vld [vmem:[#allocation2 + $0x20] sm:$0xff]  ;;  %v1085_v30 = vld [vmem:[#allocation4 + $0x88] sm:$0xff] }
  0x4d   :  { %v16513_v53 = vld [vmem:[#allocation2 + $0xb1] sm:$0xff]  ;;  %v16518_v55 = vld [vmem:[#allocation2 + $0xc1] sm:$0xff]  ;;  %v15134_v33 = vpack.c.bf16 %v1085_v30, %v1084_v29 }
  0x4e   :  { %13520 = vmatmul.mubr.msk.f32.gmra.mrb[2].mxu0 %vm72_vm0, %v16489_v46  ;;  %v16529_v57 = vld [vmem:[#allocation2 + $0xd1] sm:$0xff]  ;;  %v16531_v58 = vld [vmem:[#allocation2 + $0xe1] sm:$0xff] }
  0x4f   :  { %13522 = vmatprep.mubr.msk.f32.mxu0 %vm72_vm0, %v16491_v47  ;;  %15117 = vmatpush3.bf16.msra.mxu0 %v15114_v41  ;;  %v16537_v59 = vld [vmem:[#allocation2 + $0xf1] sm:$0xff]  ;;  %v16539_v61 = vld [vmem:[#allocation2 + $0x101] sm:$0xff] }
  0x50   :  { %15119 = vmatprep.subr.bf16.mxu0 %v15118_v48  ;;  %v161_v62 = vld [vmem:[#allocation3 + $0x78] sm:$0xff]  ;;  %v16555_v4 = vld [vmem:[#allocation2 + $0x10] sm:$0xff]  ;;  %v16565_v10 = vld [vmem:[#allocation2 + $0x40] sm:$0xff] }
  0x51   :  { %179 = vst.msk [vmem:[#allocation2 + $0x121] sm:$0xff] %vm72_vm0, %v161_v62  ;;  %v16547_v63 = vld [vmem:[#allocation2 + $0x111] sm:$0xff]  ;;  %v16573_v13 = vld [vmem:[#allocation2 + $0x60] sm:$0xff]  ;;  %v1776_v30 = vld [vmem:[#allocation4 + $0xe8] sm:$0xff] }
  0x52   :  { %13523 = vmatmul.mubr.msk.f32.gmra.mrb[4].mxu0 %vm72_vm0, %v16497_v49  ;;  %v16563_v9 = vld [vmem:[#allocation2 + $0x30] sm:$0xff]  ;;  %v16586_v17 = vld [vmem:[#allocation2 + $0xc0] sm:$0xff]  ;;  %v857_v25 = vld [vmem:[#allocation4 + $0x78] sm:$0xff] }
  0x53   :  { %13525 = vmatprep.mubr.msk.f32.mxu0 %vm72_vm0, %v16499_v50  ;;  %v16571_v12 = vld [vmem:[#allocation2 + $0x50] sm:$0xff]  ;;  %v16594_v19 = vld [vmem:[#allocation2 + $0xe0] sm:$0xff]  ;;  %v15130_v28 = vpack.c.bf16 %v857_v25, %v856_v24  ;;  %v1087_v56 = vld [vmem:[#allocation4 + $0x98] sm:$0xff] }
  0x54   :  { %v16579_v14 = vld [vmem:[#allocation2 + $0x70] sm:$0xff]  ;;  %v16602_v21 = vld [vmem:[#allocation2 + $0x100] sm:$0xff]  ;;  %v1548_v25 = vld [vmem:[#allocation4 + $0xd8] sm:$0xff] }
  0x55   :  { %v16584_v16 = vld [vmem:[#allocation2 + $0xb0] sm:$0xff]  ;;  %v16615_v27 = vld [vmem:[#allocation2 + $0x22] sm:$0xff] }
  0x56   :  { %13526 = vmatmul.mubr.msk.f32.gmra.mrb[6].mxu0 %vm72_vm0, %v16505_v51  ;;  %v16592_v18 = vld [vmem:[#allocation2 + $0xd0] sm:$0xff]  ;;  %v16623_v32 = vld [vmem:[#allocation2 + $0x42] sm:$0xff] }
  0x57   :  { %13528 = vmatprep.mubr.msk.f32.mxu0 %vm72_vm0, %v16507_v52  ;;  %v16600_v20 = vld [vmem:[#allocation2 + $0xf0] sm:$0xff]  ;;  %v16631_v35 = vld [vmem:[#allocation2 + $0x62] sm:$0xff] }
  0x58   :  { %v16608_v22 = vld [vmem:[#allocation2 + $0x110] sm:$0xff]  ;;  %v615_v37 = vld [vmem:[#allocation2 + $0xa2] sm:$0xff] }
  0x59   :  { %v16613_v26 = vld [vmem:[#allocation2 + $0x12] sm:$0xff]  ;;  %v16644_v39 = vld [vmem:[#allocation2 + $0xc2] sm:$0xff] }
  0x5a   :  { %13529 = vmatmul.mubr.msk.f32.gmra.mrb[8].mxu0 %vm72_vm0, %v16513_v53  ;;  %v16621_v31 = vld [vmem:[#allocation2 + $0x32] sm:$0xff]  ;;  %v16652_v41 = vld [vmem:[#allocation2 + $0xe2] sm:$0xff] }
  0x5b   :  { %13531 = vmatprep.mubr.msk.f32.mxu0 %vm72_vm0, %v16518_v55  ;;  %v16629_v34 = vld [vmem:[#allocation2 + $0x52] sm:$0xff]  ;;  %v16660_v44 = vld [vmem:[#allocation2 + $0x102] sm:$0xff] }
  0x5c   :  { %v16637_v36 = vld [vmem:[#allocation2 + $0x72] sm:$0xff]  ;;  %v1314_v62 = vld [vmem:[#allocation4 + $0xa0] sm:$0xff] }
  0x5d   :  { %v16642_v38 = vld [vmem:[#allocation2 + $0xb2] sm:$0xff]  ;;  %v15142_v3 = vpack.c.bf16 %v1315_v2, %v1314_v62  ;;  %v16738_v24 = vld [vmem:[#allocation2 + $0x121] sm:$0xff] }
  0x5e   :  { %13532 = vmatmul.mubr.msk.f32.gmra.mrb[10].mxu0 %vm72_vm0, %v16529_v57  ;;  %v16650_v40 = vld [vmem:[#allocation2 + $0xd2] sm:$0xff]  ;;  %v1775_v29 = vld [vmem:[#allocation4 + $0xe0] sm:$0xff]  ;;  %v2006_v62 = vld [vmem:[#allocation4 + $0x108] sm:$0xff] }
  0x5f   :  { %13534 = vmatprep.mubr.msk.f32.mxu0 %vm72_vm0, %v16531_v58  ;;  %v16658_v43 = vld [vmem:[#allocation2 + $0xf2] sm:$0xff] }
  0x60   :  { %v1086_v54 = vld [vmem:[#allocation4 + $0x90] sm:$0xff] }
  0x61   :  { %v15138_v60 = vpack.c.bf16 %v1087_v56, %v1086_v54  ;;  %v1778_v54 = vld [vmem:[#allocation4 + $0xf8] sm:$0xff] }
  0x62   :  { %13535 = vmatmul.mubr.msk.f32.gmra.mrb[12].mxu0 %vm72_vm0, %v16537_v59 }
  0x63   :  { %13537 = vmatprep.mubr.msk.f32.mxu0 %vm72_vm0, %v16539_v61 }
  0x66   :  { %13538 = vmatmul.mubr.msk.f32.gmra.mrb[14].mxu0 %vm72_vm0, %v16547_v63 }
  0x67   :  { %13548 = vmatprep.mubr.msk.f32.mxu0 %vm72_vm0, %v16549_v1 }
  0x6a   :  { %13549 = vmatmul.mubr.msk.f32.vlgmr.msra.gmra.mrb[0].mxu0 %vm72_vm0, %v16555_v4 }
  0x6b   :  { %13551 = vmatprep.mubr.msk.f32.mxu0 %vm72_vm0, %v16557_v5  ;;  %15121 = vmatpush3.bf16.msra.mxu0 %v15118_v48  ;;  %v16666_v48 = vld [vmem:[#allocation2 + $0x112] sm:$0xff] }
  0x6c   :  { %15123 = vmatprep.subr.bf16.mxu0 %v15122_v6 }
  0x6e   :  { %13552 = vmatmul.mubr.msk.f32.gmra.mrb[2].mxu0 %vm72_vm0, %v16563_v9 }
  0x6f   :  { %13554 = vmatprep.mubr.msk.f32.mxu0 %vm72_vm0, %v16565_v10  ;;  %15125 = vmatpush3.bf16.msra.mxu0 %v15122_v6  ;;  %v16702_v6 = vld [vmem:[#allocation2 + $0x120] sm:$0xff] }
  0x70   :  { %15127 = vmatprep.subr.bf16.mxu0 %v15126_v11 }
  0x72   :  { %13555 = vmatmul.mubr.msk.f32.gmra.mrb[4].mxu0 %vm72_vm0, %v16571_v12 }
  0x73   :  { %13557 = vmatprep.mubr.msk.f32.mxu0 %vm72_vm0, %v16573_v13 }
  0x76   :  { %13558 = vmatmul.mubr.msk.f32.gmra.mrb[6].mxu0 %vm72_vm0, %v16579_v14 }
  0x77   :  { %13560 = vmatprep.mubr.msk.f32.mxu0 %vm72_vm0, %v188_v15  ;;  %v1545_v15 = vld [vmem:[#allocation4 + $0xc0] sm:$0xff] }
  0x7a   :  { %13561 = vmatmul.mubr.msk.f32.gmra.mrb[8].mxu0 %vm72_vm0, %v16584_v16 }
  0x7b   :  { %13563 = vmatprep.mubr.msk.f32.mxu0 %vm72_vm0, %v16586_v17 }
  0x7e   :  { %13564 = vmatmul.mubr.msk.f32.gmra.mrb[10].mxu0 %vm72_vm0, %v16592_v18 }
  0x7f   :  { %13566 = vmatprep.mubr.msk.f32.mxu0 %vm72_vm0, %v16594_v19 }
  0x82   :  { %13567 = vmatmul.mubr.msk.f32.gmra.mrb[12].mxu0 %vm72_vm0, %v16600_v20 }
  0x83   :  { %13569 = vmatprep.mubr.msk.f32.mxu0 %vm72_vm0, %v16602_v21 }
  0x86   :  { %13570 = vmatmul.mubr.msk.f32.gmra.mrb[14].mxu0 %vm72_vm0, %v16608_v22 }
  0x87   :  { %13580 = vmatprep.mubr.msk.f32.mxu0 %vm72_vm0, %v607_v23 }
  0x8a   :  { %13581 = vmatmul.mubr.msk.f32.vlgmr.msra.gmra.mrb[0].mxu0 %vm72_vm0, %v16613_v26 }
  0x8b   :  { %13583 = vmatprep.mubr.msk.f32.mxu0 %vm72_vm0, %v16615_v27  ;;  %15129 = vmatpush3.bf16.msra.mxu0 %v15126_v11  ;;  %v15146_v11 = vpack.c.bf16 %v1317_v8, %v1316_v7 }
  0x8c   :  { %15131 = vmatprep.subr.bf16.mxu0 %v15130_v28 }
  0x8e   :  { %13584 = vmatmul.mubr.msk.f32.gmra.mrb[2].mxu0 %vm72_vm0, %v16621_v31 }
  0x8f   :  { %13586 = vmatprep.mubr.msk.f32.mxu0 %vm72_vm0, %v16623_v32  ;;  %15133 = vmatpush3.bf16.msra.mxu0 %v15130_v28 }
  0x90   :  { %15135 = vmatprep.subr.bf16.mxu0 %v15134_v33 }
  0x92   :  { %13587 = vmatmul.mubr.msk.f32.gmra.mrb[4].mxu0 %vm72_vm0, %v16629_v34 }
  0x93   :  { %13589 = vmatprep.mubr.msk.f32.mxu0 %vm72_vm0, %v16631_v35 }
  0x96   :  { %13590 = vmatmul.mubr.msk.f32.gmra.mrb[6].mxu0 %vm72_vm0, %v16637_v36 }
  0x97   :  { %13592 = vmatprep.mubr.msk.f32.mxu0 %vm72_vm0, %v615_v37  ;;  %v16774_v37 = vld [vmem:[#allocation2 + $0x122] sm:$0xff] }
  0x9a   :  { %13593 = vmatmul.mubr.msk.f32.gmra.mrb[8].mxu0 %vm72_vm0, %v16642_v38 }
  0x9b   :  { %13595 = vmatprep.mubr.msk.f32.mxu0 %vm72_vm0, %v16644_v39 }
  0x9e   :  { %13596 = vmatmul.mubr.msk.f32.gmra.mrb[10].mxu0 %vm72_vm0, %v16650_v40 }
  0x9f   :  { %13598 = vmatprep.mubr.msk.f32.mxu0 %vm72_vm0, %v16652_v41 }
  0xa2   :  { %13599 = vmatmul.mubr.msk.f32.gmra.mrb[12].mxu0 %vm72_vm0, %v16658_v43 }
  0xa3   :  { %13601 = vmatprep.mubr.msk.f32.mxu0 %vm72_vm0, %v16660_v44 }
  0xa6   :  { %13602 = vmatmul.mubr.msk.f32.gmra.mrb[14].mxu0 %vm72_vm0, %v16666_v48 }
  0xa7   :  { %13612 = vmatprep.mubr.msk.f32.mxu0 %vm72_vm0, %v16555_v4  ;;  %v16684_v4 = vld [vmem:[#allocation2 + $0x80] sm:$0xff] }
  0xaa   :  { %13613 = vmatmul.mubr.msk.f32.vlgmr.msra.gmra.mrb[0].mxu0 %vm72_vm0, %v16557_v5 }
  0xab   :  { %13615 = vmatprep.mubr.msk.f32.mxu0 %vm72_vm0, %v16563_v9  ;;  %15137 = vmatpush3.bf16.msra.mxu0 %v15134_v33  ;;  %v15158_v33 = vpack.c.bf16 %v1776_v30, %v1775_v29 }
  0xac   :  { %15139 = vmatprep.subr.bf16.mxu0 %v15138_v60 }
  0xae   :  { %13616 = vmatmul.mubr.msk.f32.gmra.mrb[2].mxu0 %vm72_vm0, %v16565_v10 }
  0xaf   :  { %13618 = vmatprep.mubr.msk.f32.mxu0 %vm72_vm0, %v16571_v12  ;;  %15141 = vmatpush3.bf16.msra.mxu0 %v15138_v60  ;;  %v2005_v60 = vld [vmem:[#allocation4 + $0x100] sm:$0xff] }
  0xb0   :  { %15143 = vmatprep.subr.bf16.mxu0 %v15142_v3  ;;  %v15166_v2 = vpack.c.bf16 %v2006_v62, %v2005_v60  ;;  %v3638_v60 = vld [vmem:[#allocation6 + $0xc8] sm:$0xff] }
  0xb2   :  { %13619 = vmatmul.mubr.msk.f32.gmra.mrb[4].mxu0 %vm72_vm0, %v16573_v13 }
  0xb3   :  { %13621 = vmatprep.mubr.msk.f32.mxu0 %vm72_vm0, %v16579_v14 }
  0xb6   :  { %13622 = vmatmul.mubr.msk.f32.gmra.mrb[6].mxu0 %vm72_vm0, %v16684_v4 }
  0xb7   :  { %13624 = vmatprep.mubr.msk.f32.mxu0 %vm72_vm0, %v16584_v16  ;;  %v1546_v16 = vld [vmem:[#allocation4 + $0xc8] sm:$0xff] }
  0xb8   :  { %v15150_v23 = vpack.c.bf16 %v1546_v16, %v1545_v15 }
  0xba   :  { %13625 = vmatmul.mubr.msk.f32.gmra.mrb[8].mxu0 %vm72_vm0, %v16586_v17 }
  0xbb   :  { %13627 = vmatprep.mubr.msk.f32.mxu0 %vm72_vm0, %v16592_v18 }
  0xbe   :  { %13628 = vmatmul.mubr.msk.f32.gmra.mrb[10].mxu0 %vm72_vm0, %v16594_v19 }
  0xbf   :  { %13630 = vmatprep.mubr.msk.f32.mxu0 %vm72_vm0, %v16600_v20 }
  0xc2   :  { %13631 = vmatmul.mubr.msk.f32.gmra.mrb[12].mxu0 %vm72_vm0, %v16602_v21 }
  0xc3   :  { %13633 = vmatprep.mubr.msk.f32.mxu0 %vm72_vm0, %v16608_v22 }
  0xc6   :  { %13634 = vmatmul.mubr.msk.f32.gmra.mrb[14].mxu0 %vm72_vm0, %v16702_v6 }
  0xc7   :  { %13644 = vmatprep.mubr.msk.f32.mxu0 %vm72_vm0, %v16481_v42  ;;  %v16720_v42 = vld [vmem:[#allocation2 + $0x81] sm:$0xff] }
  0xca   :  { %13645 = vmatmul.mubr.msk.f32.vlgmr.msra.gmra.mrb[0].mxu0 %vm72_vm0, %v16485_v45 }
  0xcb   :  { %13647 = vmatprep.mubr.msk.f32.mxu0 %vm72_vm0, %v16489_v46  ;;  %15145 = vmatpush3.bf16.msra.mxu0 %v15142_v3 }
  0xcc   :  { %15147 = vmatprep.subr.bf16.mxu0 %v15146_v11 }
  0xce   :  { %13648 = vmatmul.mubr.msk.f32.gmra.mrb[2].mxu0 %vm72_vm0, %v16491_v47 }
  0xcf   :  { %13650 = vmatprep.mubr.msk.f32.mxu0 %vm72_vm0, %v16497_v49  ;;  %15149 = vmatpush3.bf16.msra.mxu0 %v15146_v11 }
  0xd0   :  { %15151 = vmatprep.subr.bf16.mxu0 %v15150_v23 }
  0xd2   :  { %13651 = vmatmul.mubr.msk.f32.gmra.mrb[4].mxu0 %vm72_vm0, %v16499_v50 }
  0xd3   :  { %13653 = vmatprep.mubr.msk.f32.mxu0 %vm72_vm0, %v16505_v51 }
  0xd6   :  { %13654 = vmatmul.mubr.msk.f32.gmra.mrb[6].mxu0 %vm72_vm0, %v16720_v42 }
  0xd7   :  { %13656 = vmatprep.mubr.msk.f32.mxu0 %vm72_vm0, %v16513_v53  ;;  %v1547_v53 = vld [vmem:[#allocation4 + $0xd0] sm:$0xff] }
  0xd8   :  { %v15154_v28 = vpack.c.bf16 %v1548_v25, %v1547_v53  ;;  %v2291_v53 = vld [vmem:[#allocation6 + $0x10] sm:$0xff]  ;;  %v2292_v25 = vld [vmem:[#allocation6 + $0x18] sm:$0xff] }
  0xda   :  { %13657 = vmatmul.mubr.msk.f32.gmra.mrb[8].mxu0 %vm72_vm0, %v16518_v55 }
  0xdb   :  { %13659 = vmatprep.mubr.msk.f32.mxu0 %vm72_vm0, %v16529_v57 }
  0xde   :  { %13660 = vmatmul.mubr.msk.f32.gmra.mrb[10].mxu0 %vm72_vm0, %v16531_v58 }
  0xdf   :  { %13662 = vmatprep.mubr.msk.f32.mxu0 %vm72_vm0, %v16537_v59 }
  0xe2   :  { %13663 = vmatmul.mubr.msk.f32.gmra.mrb[12].mxu0 %vm72_vm0, %v16539_v61 }
  0xe3   :  { %13665 = vmatprep.mubr.msk.f32.mxu0 %vm72_vm0, %v16547_v63 }
  0xe6   :  { %13666 = vmatmul.mubr.msk.f32.gmra.mrb[14].mxu0 %vm72_vm0, %v16738_v24 }
  0xe7   :  { %13676 = vmatprep.mubr.msk.f32.mxu0 %vm72_vm0, %v16613_v26  ;;  %v16756_v26 = vld [vmem:[#allocation2 + $0x82] sm:$0xff] }
  0xea   :  { %13677 = vmatmul.mubr.msk.f32.vlgmr.msra.gmra.mrb[0].mxu0 %vm72_vm0, %v16615_v27 }
  0xeb   :  { %13679 = vmatprep.mubr.msk.f32.mxu0 %vm72_vm0, %v16621_v31  ;;  %15153 = vmatpush3.bf16.msra.mxu0 %v15150_v23  ;;  %v3409_v23 = vld [vmem:[#allocation6 + $0xb0] sm:$0xff] }
  0xec   :  { %15155 = vmatprep.subr.bf16.mxu0 %v15154_v28 }
  0xee   :  { %13680 = vmatmul.mubr.msk.f32.gmra.mrb[2].mxu0 %vm72_vm0, %v16623_v32 }
  0xef   :  { %13682 = vmatprep.mubr.msk.f32.mxu0 %vm72_vm0, %v16629_v34  ;;  %15157 = vmatpush3.bf16.msra.mxu0 %v15154_v28 }
  0xf0   :  { %15159 = vmatprep.subr.bf16.mxu0 %v15158_v33 }
  0xf2   :  { %13683 = vmatmul.mubr.msk.f32.gmra.mrb[4].mxu0 %vm72_vm0, %v16631_v35 }
  0xf3   :  { %13685 = vmatprep.mubr.msk.f32.mxu0 %vm72_vm0, %v16637_v36 }
  0xf6   :  { %13686 = vmatmul.mubr.msk.f32.gmra.mrb[6].mxu0 %vm72_vm0, %v16756_v26 }
  0xf7   :  { %13688 = vmatprep.mubr.msk.f32.mxu0 %vm72_vm0, %v16642_v38  ;;  %v1777_v38 = vld [vmem:[#allocation4 + $0xf0] sm:$0xff] }
  0xf8   :  { %v15162_v56 = vpack.c.bf16 %v1778_v54, %v1777_v38  ;;  %v15186_v54 = vpack.c.bf16 %v2292_v25, %v2291_v53 }
  0xfa   :  { %13689 = vmatmul.mubr.msk.f32.gmra.mrb[8].mxu0 %vm72_vm0, %v16644_v39 }
  0xfb   :  { %13691 = vmatprep.mubr.msk.f32.mxu0 %vm72_vm0, %v16650_v40 }
  0xfe   :  { %13692 = vmatmul.mubr.msk.f32.gmra.mrb[10].mxu0 %vm72_vm0, %v16652_v41 }
  0xff   :  { %13694 = vmatprep.mubr.msk.f32.mxu0 %vm72_vm0, %v16658_v43 }
 0x102   :  { %13695 = vmatmul.mubr.msk.f32.gmra.mrb[12].mxu0 %vm72_vm0, %v16660_v44 }
 0x103   :  { %13697 = vmatprep.mubr.msk.f32.mxu0 %vm72_vm0, %v16666_v48 }
 0x106   :  { %13698 = vmatmul.mubr.msk.f32.gmra.mrb[14].mxu0 %vm72_vm0, %v16774_v37 }
 0x107   :  { %13708 = vmatprep.mubr.msk.f32.mxu0 %vm72_vm0, %v16557_v5  ;;  %v16792_v5 = vld [vmem:[#allocation2 + $0x90] sm:$0xff] }
 0x10a   :  { %13709 = vmatmul.mubr.msk.f32.vlgmr.msra.gmra.mrb[0].mxu0 %vm72_vm0, %v16563_v9  ;;  %v16810_v9 = vld [vmem:[#allocation2 + $0x130] sm:$0xff] }
 0x10b   :  { %13711 = vmatprep.mubr.msk.f32.mxu0 %vm72_vm0, %v16565_v10  ;;  %15161 = vmatpush3.bf16.msra.mxu0 %v15158_v33  ;;  %v2007_v10 = vld [vmem:[#allocation4 + $0x110] sm:$0xff] }
 0x10c   :  { %15163 = vmatprep.subr.bf16.mxu0 %v15162_v56 }
 0x10e   :  { %13712 = vmatmul.mubr.msk.f32.gmra.mrb[2].mxu0 %vm72_vm0, %v16571_v12  ;;  %v2008_v12 = vld [vmem:[#allocation4 + $0x118] sm:$0xff] }
 0x10f   :  { %13714 = vmatprep.mubr.msk.f32.mxu0 %vm72_vm0, %v16573_v13  ;;  %15165 = vmatpush3.bf16.msra.mxu0 %v15162_v56  ;;  %v15170_v13 = vpack.c.bf16 %v2008_v12, %v2007_v10  ;;  %v3637_v56 = vld [vmem:[#allocation6 + $0xc0] sm:$0xff]  ;;  %v2718_v12 = vld [vmem:[#allocation6 + $0x48] sm:$0xff] }
 0x110   :  { %15167 = vmatprep.subr.bf16.mxu0 %v15166_v2  ;;  %v2717_v10 = vld [vmem:[#allocation6 + $0x40] sm:$0xff] }
 0x112   :  { %13715 = vmatmul.mubr.msk.f32.gmra.mrb[4].mxu0 %vm72_vm0, %v16579_v14 }
 0x113   :  { %13717 = vmatprep.mubr.msk.f32.mxu0 %vm72_vm0, %v16684_v4 }
 0x116   :  { %13718 = vmatmul.mubr.msk.f32.gmra.mrb[6].mxu0 %vm72_vm0, %v16792_v5 }
 0x117   :  { %13720 = vmatprep.mubr.msk.f32.mxu0 %vm72_vm0, %v16586_v17  ;;  %v3179_v17 = vld [vmem:[#allocation6 + $0x90] sm:$0xff] }
 0x11a   :  { %13721 = vmatmul.mubr.msk.f32.gmra.mrb[8].mxu0 %vm72_vm0, %v16592_v18  ;;  %v3180_v18 = vld [vmem:[#allocation6 + $0x98] sm:$0xff] }
 0x11b   :  { %13723 = vmatprep.mubr.msk.f32.mxu0 %vm72_vm0, %v16594_v19  ;;  %v15210_v19 = vpack.c.bf16 %v3180_v18, %v3179_v17 }
 0x11e   :  { %13724 = vmatmul.mubr.msk.f32.gmra.mrb[10].mxu0 %vm72_vm0, %v16600_v20  ;;  %v2293_v20 = vld [vmem:[#allocation2 + $0x1] sm:$0xff] }
 0x11f   :  { %13726 = vmatprep.mubr.msk.f32.mxu0 %vm72_vm0, %v16602_v21  ;;  %v3407_v21 = vld [vmem:[#allocation6 + $0xa0] sm:$0xff] }
 0x122   :  { %13727 = vmatmul.mubr.msk.f32.gmra.mrb[12].mxu0 %vm72_vm0, %v16608_v22  ;;  %v3408_v22 = vld [vmem:[#allocation6 + $0xa8] sm:$0xff] }
 0x123   :  { %13729 = vmatprep.mubr.msk.f32.mxu0 %vm72_vm0, %v16702_v6 }
 0x126   :  { %13730 = vmatmul.mubr.msk.f32.gmra.mrb[14].mxu0 %vm72_vm0, %v16810_v9 }
 0x127   :  { %13740 = vmatprep.mubr.msk.f32.mxu0 %vm72_vm0, %v16485_v45  ;;  %v16828_v45 = vld [vmem:[#allocation2 + $0x91] sm:$0xff] }
 0x12a   :  { %13741 = vmatmul.mubr.msk.f32.vlgmr.msra.gmra.mrb[0].mxu0 %vm72_vm0, %v16489_v46  ;;  %v16846_v46 = vld [vmem:[#allocation2 + $0x131] sm:$0xff] }
 0x12b   :  { %13743 = vmatprep.mubr.msk.f32.mxu0 %vm72_vm0, %v16491_v47  ;;  %15169 = vmatpush3.bf16.msra.mxu0 %v15166_v2  ;;  %v16864_v47 = vld [vmem:[#allocation2 + $0x92] sm:$0xff] }
 0x12c   :  { %15171 = vmatprep.subr.bf16.mxu0 %v15170_v13 }
 0x12e   :  { %13744 = vmatmul.mubr.msk.f32.gmra.mrb[2].mxu0 %vm72_vm0, %v16497_v49  ;;  %v16882_v49 = vld [vmem:[#allocation2 + $0x132] sm:$0xff] }
 0x12f   :  { %13746 = vmatprep.mubr.msk.f32.mxu0 %vm72_vm0, %v16499_v50  ;;  %15173 = vmatpush3.bf16.msra.mxu0 %v15170_v13  ;;  %v2310_v50 = vld [vmem:[#allocation6 + $0x20] sm:$0xff] }
 0x132   :  { %13747 = vmatmul.mubr.msk.f32.gmra.mrb[4].mxu0 %vm72_vm0, %v16505_v51  ;;  %v2311_v51 = vld [vmem:[#allocation6 + $0x28] sm:$0xff] }
 0x133   :  { %13749 = vmatprep.mubr.msk.f32.mxu0 %vm72_vm0, %v16720_v42 }
 0x136   :  { %13750 = vmatmul.mubr.msk.f32.gmra.mrb[6].mxu0 %vm72_vm0, %v16828_v45 }
 0x137   :  { %13752 = vmatprep.mubr.msk.f32.mxu0 %vm72_vm0, %v16518_v55  ;;  %v15174_v55 = vpack.c.bf16 %v2311_v51, %v2310_v50 }
 0x139   :  { %15175 = vmatprep.subr.bf16.mxu0 %v15174_v55 }
 0x13a   :  { %13753 = vmatmul.mubr.msk.f32.gmra.mrb[8].mxu0 %vm72_vm0, %v16529_v57  ;;  %v3177_v57 = vld [vmem:[#allocation6 + $0x80] sm:$0xff] }
 0x13b   :  { %13755 = vmatprep.mubr.msk.f32.mxu0 %vm72_vm0, %v16531_v58  ;;  %v3178_v58 = vld [vmem:[#allocation6 + $0x88] sm:$0xff] }
 0x13e   :  { %13756 = vmatmul.mubr.msk.f32.gmra.mrb[10].mxu0 %vm72_vm0, %v16537_v59  ;;  %v15206_v59 = vpack.c.bf16 %v3178_v58, %v3177_v57 }
 0x13f   :  { %13758 = vmatprep.mubr.msk.f32.mxu0 %vm72_vm0, %v16539_v61  ;;  %v2312_v61 = vld [vmem:[#allocation6 + $0x30] sm:$0xff] }
 0x140   :  { %15207 = vmatprep.subr.bf16.mxu1 %v15206_v59 }
 0x141   :  { %15209 = vmatpush3.bf16.msra.mxu1 %v15206_v59  ;;  %v16918_v59 = vpack.c.bf16 %v3638_v60, %v3637_v56 }
 0x142   :  { %13759 = vmatmul.mubr.msk.f32.gmra.mrb[12].mxu0 %vm72_vm0, %v16547_v63  ;;  %v2313_v63 = vld [vmem:[#allocation6 + $0x38] sm:$0xff]  ;;  %15211 = vmatprep.subr.bf16.mxu1 %v15210_v19 }
 0x143   :  { %13761 = vmatprep.mubr.msk.f32.mxu0 %vm72_vm0, %v16738_v24  ;;  %v15178_v14 = vpack.c.bf16 %v2313_v63, %v2312_v61  ;;  %v3410_v24 = vld [vmem:[#allocation6 + $0xb8] sm:$0xff]  ;;  %v16920_v61 = vpack.c.bf16 %v2718_v12, %v2717_v10  ;;  %v3868_v10 = vld [vmem:[#allocation6 + $0xe8] sm:$0xff]  ;;  %v2947_v12 = vld [vmem:[#allocation6 + $0x60] sm:$0xff] }
 0x144   :  { %v15218_v38 = vpack.c.bf16 %v3410_v24, %v3409_v23 }
 0x145   :  { %15213 = vmatpush3.bf16.msra.mxu1 %v15210_v19 }
 0x146   :  { %13762 = vmatmul.mubr.msk.f32.gmra.mrb[14].mxu0 %vm72_vm0, %v16846_v46 }
 0x147   :  { %13772 = vmatprep.mubr.msk.f32.mxu0 %vm72_vm0, %v16615_v27  ;;  %v15214_v27 = vpack.c.bf16 %v3408_v22, %v3407_v21 }
 0x149   :  { %15215 = vmatprep.subr.bf16.mxu1 %v15214_v27 }
 0x14a   :  { %13773 = vmatmul.mubr.msk.f32.vlgmr.msra.gmra.mrb[0].mxu0 %vm72_vm0, %v16621_v31  ;;  %v2289_v31 = vld [vmem:[#allocation6] sm:$0xff] }
 0x14b   :  { %13775 = vmatprep.mubr.msk.f32.mxu0 %vm72_vm0, %v16623_v32  ;;  %15177 = vmatpush3.bf16.msra.mxu0 %v15174_v55  ;;  %v2290_v32 = vld [vmem:[#allocation6 + $0x8] sm:$0xff] }
 0x14c   :  { %15179 = vmatprep.subr.bf16.mxu0 %v15178_v14 }
 0x14e   :  { %13776 = vmatmul.mubr.msk.f32.gmra.mrb[2].mxu0 %vm72_vm0, %v16629_v34  ;;  %v15182_v34 = vpack.c.bf16 %v2290_v32, %v2289_v31 }
 0x14f   :  { %13778 = vmatprep.mubr.msk.f32.mxu0 %vm72_vm0, %v16631_v35  ;;  %15181 = vmatpush3.bf16.msra.mxu0 %v15178_v14  ;;  %v16890_v35 = vld [vmem:[%s19201_s2] ss:$0 sm:$0xff] }
 0x150   :  { %15183 = vmatprep.subr.bf16.mxu0 %v15182_v34 }
 0x152   :  { %13779 = vmatmul.mubr.msk.f32.gmra.mrb[4].mxu0 %vm72_vm0, %v16637_v36 }
 0x153   :  { %13781 = vmatprep.mubr.msk.f32.mxu0 %vm72_vm0, %v16756_v26 }
 0x156   :  { %13782 = vmatmul.mubr.msk.f32.gmra.mrb[6].mxu0 %vm72_vm0, %v16864_v47 }
 0x157   :  { %13784 = vmatprep.mubr.msk.f32.mxu0 %vm72_vm0, %v16644_v39 }
 0x15a   :  { %13785 = vmatmul.mubr.msk.f32.gmra.mrb[8].mxu0 %vm72_vm0, %v16650_v40 }
 0x15b   :  { %13787 = vmatprep.mubr.msk.f32.mxu0 %vm72_vm0, %v16652_v41 }
 0x15e   :  { %13788 = vmatmul.mubr.msk.f32.gmra.mrb[10].mxu0 %vm72_vm0, %v16658_v43 }
 0x15f   :  { %13790 = vmatprep.mubr.msk.f32.mxu0 %vm72_vm0, %v16660_v44 }
 0x162   :  { %13791 = vmatmul.mubr.msk.f32.gmra.mrb[12].mxu0 %vm72_vm0, %v16666_v48 }
 0x163   :  { %13793 = vmatprep.mubr.msk.f32.mxu0 %vm72_vm0, %v16774_v37 }
 0x166   :  { %13794 = vmatmul.mubr.msk.f32.gmra.mrb[14].mxu0 %vm72_vm0, %v16882_v49 }
 0x167   :  { %13804 = vmatprep.mubr.msk.f32.mxu0 %vm72_vm0, %v2293_v20 }
 0x21d   :  { %v13774_v36 = vpop.f32.mrb[0].mxu0 }
 0x21e   :  { %v2225_v39 = vadd.f32 %v13774_v36, %v16890_v35  ;;  %v2123_v40 = vpop.f32.mrb[1].mxu0 }
 0x21f   :  { %v2224_v41 = vadd.f32 %v16890_v35, %v2123_v40 }
 0x220   :  { %v2241_v43 = vmax.f32 %v2225_v39, 0.0 }
 0x221   :  { %v2240_v44 = vmax.f32 %v2224_v41, 0.0  ;;  %v13777_v48 = vpop.f32.mrb[2].mxu0 }
 0x222   :  { %2258 = vst.msk [vmem:[#allocation2 + $0x21] sm:$0xff] %vm72_vm0, %v2241_v43  ;;  %v2227_v3 = vadd.f32 %v13777_v48, %v16890_v35  ;;  %v2133_v4 = vpop.f32.mrb[3].mxu0 }
 0x223   :  { %2257 = vst.msk [vmem:[#allocation2 + $0x11] sm:$0xff] %vm72_vm0, %v2240_v44  ;;  %v2226_v6 = vadd.f32 %v16890_v35, %v2133_v4 }
 0x224   :  { %v2243_v7 = vmax.f32 %v2227_v3, 0.0 }
 0x225   :  { %v2242_v8 = vmax.f32 %v2226_v6, 0.0  ;;  %v13780_v11 = vpop.f32.mrb[4].mxu0 }
 0x226   :  { %2260 = vst.msk [vmem:[#allocation2 + $0x41] sm:$0xff] %vm72_vm0, %v2243_v7  ;;  %v2229_v15 = vadd.f32 %v13780_v11, %v16890_v35  ;;  %v2143_v16 = vpop.f32.mrb[5].mxu0 }
 0x227   :  { %2259 = vst.msk [vmem:[#allocation2 + $0x31] sm:$0xff] %vm72_vm0, %v2242_v8  ;;  %v2228_v42 = vadd.f32 %v16890_v35, %v2143_v16 }
 0x228   :  { %v2245_v28 = vmax.f32 %v2229_v15, 0.0 }
 0x229   :  { %v2244_v29 = vmax.f32 %v2228_v42, 0.0  ;;  %v13783_v30 = vpop.f32.mrb[6].mxu0  ;;  %v16908_v2 = vld [vmem:[#allocation2 + $0x21] sm:$0xff] }
 0x22a   :  { %2262 = vst.msk [vmem:[#allocation2 + $0x61] sm:$0xff] %vm72_vm0, %v2245_v28  ;;  %v2231_v33 = vadd.f32 %v13783_v30, %v16890_v35  ;;  %v2153_v26 = vpop.f32.mrb[7].mxu0  ;;  %v2294_v37 = vld [vmem:[#allocation2 + $0x11] sm:$0xff]  ;;  %v17026_v56 = vld [vmem:[#allocation2 + $0x20] sm:$0xff] }
 0x22b   :  { %2261 = vst.msk [vmem:[#allocation2 + $0x51] sm:$0xff] %vm72_vm0, %v2244_v29  ;;  %v2230_v62 = vadd.f32 %v16890_v35, %v2153_v26  ;;  %13805 = vmatmul.mubr.msk.f32.vlgmr.msra.gmra.mrb[16].mxu0 %vm72_vm0, %v2294_v37  ;;  %13932 = vmatprep.mubr.msk.f32.mxu1 %vm72_vm0, %v2294_v37  ;;  %v3639_v28 = vld [vmem:[#allocation6 + $0xd0] sm:$0xff]  ;;  %v3640_v29 = vld [vmem:[#allocation6 + $0xd8] sm:$0xff]  ;;  %v17028_v60 = vld [vmem:[#allocation2 + $0x22] sm:$0xff] }
 0x22c   :  { %v2247_v13 = vmax.f32 %v2231_v33, 0.0  ;;  %13807 = vmatprep.mubr.msk.f32.mxu0 %vm72_vm0, %v16908_v2  ;;  %13933 = vmatmul.mubr.msk.f32.vlgmr.msra.gmra.mrb[0].mxu1 %vm72_vm0, %v16908_v2  ;;  %v17016_v30 = vld [vmem:[#allocation2 + $0x12] sm:$0xff] }
 0x22d   :  { %v2246_v50 = vmax.f32 %v2230_v62, 0.0  ;;  %v13786_v51 = vpop.f32.mrb[8].mxu0  ;;  %15217 = vmatpush3.bf16.msra.mxu1 %v15214_v27  ;;  %15185 = vmatpush3.bf16.msra.mxu0 %v15182_v34  ;;  %v16928_v14 = vld [vmem:[#allocation2 + $0x41] sm:$0xff]  ;;  %v2719_v33 = vld [vmem:[#allocation6 + $0x50] sm:$0xff]  ;;  %v2720_v26 = vld [vmem:[#allocation6 + $0x58] sm:$0xff] }
 0x22e   :  { %2264 = vst.msk [vmem:[#allocation2 + $0x81] sm:$0xff] %vm72_vm0, %v2247_v13  ;;  %v2233_v55 = vadd.f32 %v13786_v51, %v16890_v35  ;;  %v2163_v57 = vpop.f32.mrb[9].mxu0  ;;  %v16916_v58 = vld [vmem:[#allocation2 + $0x31] sm:$0xff]  ;;  %15219 = vmatprep.subr.bf16.mxu1 %v15218_v38  ;;  %15187 = vmatprep.subr.bf16.mxu0 %v15186_v54  ;;  %v15194_v62 = vpack.c.bf16 %v2720_v26, %v2719_v33  ;;  %v2948_v13 = vld [vmem:[#allocation6 + $0x68] sm:$0xff] }
 0x22f   :  { %2263 = vst.msk [vmem:[#allocation2 + $0x71] sm:$0xff] %vm72_vm0, %v2246_v50  ;;  %v2232_v63 = vadd.f32 %v16890_v35, %v2163_v57  ;;  %13808 = vmatmul.mubr.msk.f32.gmra.mrb[18].mxu0 %vm72_vm0, %v16916_v58  ;;  %13935 = vmatprep.mubr.msk.f32.mxu1 %vm72_vm0, %v16916_v58  ;;  %v17022_v37 = vld [vmem:[#allocation2 + $0x10] sm:$0xff]  ;;  %v17048_v57 = vld [vmem:[#allocation2 + $0x42] sm:$0xff]  ;;  %v3870_v33 = vld [vmem:[#allocation6 + $0xf8] sm:$0xff] }
 0x230   :  { %v2249_v17 = vmax.f32 %v2233_v55, 0.0  ;;  %13810 = vmatprep.mubr.msk.f32.mxu0 %vm72_vm0, %v16928_v14  ;;  %13936 = vmatmul.mubr.msk.f32.gmra.mrb[2].mxu1 %vm72_vm0, %v16928_v14  ;;  %v17039_v50 = vld [vmem:[#allocation2 + $0x30] sm:$0xff]  ;;  %v17046_v55 = vld [vmem:[#allocation2 + $0x40] sm:$0xff] }
 0x231   :  { %v2248_v18 = vmax.f32 %v2232_v63, 0.0  ;;  %v13789_v19 = vpop.f32.mrb[10].mxu0  ;;  %15221 = vmatpush3.bf16.msra.mxu1 %v15218_v38  ;;  %15189 = vmatpush3.bf16.msra.mxu0 %v15186_v54  ;;  %v16946_v31 = vld [vmem:[#allocation2 + $0x61] sm:$0xff]  ;;  %v15226_v38 = vpack.c.bf16 %v3640_v29, %v3639_v28  ;;  %v17050_v63 = vpack.c.bf16 %v2948_v13, %v2947_v12  ;;  %v3869_v29 = vld [vmem:[#allocation6 + $0xf0] sm:$0xff] }
 0x232   :  { %2266 = vst.msk [vmem:[#allocation2 + $0xc1] sm:$0xff] %vm72_vm0, %v2249_v17  ;;  %v2235_v20 = vadd.f32 %v13789_v19, %v16890_v35  ;;  %v2173_v21 = vpop.f32.mrb[11].mxu0  ;;  %v16936_v22 = vld [vmem:[#allocation2 + $0x51] sm:$0xff]  ;;  %15223 = vmatprep.subr.bf16.mxu1 %v16918_v59  ;;  %15191 = vmatprep.subr.bf16.mxu0 %v16920_v61  ;;  %v3867_v54 = vld [vmem:[#allocation6 + $0xe0] sm:$0xff]  ;;  %v4098_v12 = vld [vmem:[#allocation6 + $0x108] sm:$0xff] }
 0x233   :  { %2265 = vst.msk [vmem:[#allocation2 + $0xb1] sm:$0xff] %vm72_vm0, %v2248_v18  ;;  %v2234_v27 = vadd.f32 %v16890_v35, %v2173_v21  ;;  %13811 = vmatmul.mubr.msk.f32.gmra.mrb[20].mxu0 %vm72_vm0, %v16936_v22  ;;  %13938 = vmatprep.mubr.msk.f32.mxu1 %vm72_vm0, %v16936_v22  ;;  %v17042_v51 = vpack.c.bf16 %v3868_v10, %v3867_v54  ;;  %v17065_v17 = vld [vmem:[#allocation2 + $0x60] sm:$0xff]  ;;  %v2949_v26 = vld [vmem:[#allocation6 + $0x70] sm:$0xff] }
 0x234   :  { %v2251_v32 = vmax.f32 %v2235_v20, 0.0  ;;  %13813 = vmatprep.mubr.msk.f32.mxu0 %vm72_vm0, %v16946_v31  ;;  %13939 = vmatmul.mubr.msk.f32.gmra.mrb[4].mxu1 %vm72_vm0, %v16946_v31  ;;  %v17067_v18 = vld [vmem:[#allocation2 + $0x62] sm:$0xff]  ;;  %v15234_v54 = vpack.c.bf16 %v3870_v33, %v3869_v29 }
 0x235   :  { %v2250_v34 = vmax.f32 %v2234_v27, 0.0  ;;  %v13792_v36 = vpop.f32.mrb[12].mxu0  ;;  %v16962_v44 = vld [vmem:[#allocation2 + $0x81] sm:$0xff] }
 0x236   :  { %2268 = vst.msk [vmem:[#allocation2 + $0xe1] sm:$0xff] %vm72_vm0, %v2251_v32  ;;  %v2237_v39 = vadd.f32 %v13792_v36, %v16890_v35  ;;  %v2183_v40 = vpop.f32.mrb[13].mxu0  ;;  %v16954_v41 = vld [vmem:[#allocation2 + $0x71] sm:$0xff]  ;;  %v2281_v20 = vld [vmem:[#allocation2 + $0xa0] sm:$0xff] }
 0x237   :  { %2267 = vst.msk [vmem:[#allocation2 + $0xd1] sm:$0xff] %vm72_vm0, %v2250_v34  ;;  %v2236_v43 = vadd.f32 %v16890_v35, %v2183_v40  ;;  %13814 = vmatmul.mubr.msk.f32.gmra.mrb[22].mxu0 %vm72_vm0, %v16954_v41  ;;  %13941 = vmatprep.mubr.msk.f32.mxu1 %vm72_vm0, %v16954_v41  ;;  %v17074_v19 = vld [vmem:[#allocation2 + $0x72] sm:$0xff]  ;;  %v17082_v27 = vld [vmem:[#allocation2 + $0x82] sm:$0xff] }
 0x238   :  { %v2253_v48 = vmax.f32 %v2237_v39, 0.0  ;;  %13942 = vmatmul.mubr.msk.f32.gmra.mrb[6].mxu1 %vm72_vm0, %v16962_v44  ;;  %13816 = vmatprep.mubr.msk.f32.mxu0 %vm72_vm0, %v16507_v52  ;;  %v17078_v21 = vld [vmem:[#allocation2 + $0x70] sm:$0xff]  ;;  %v4097_v10 = vld [vmem:[#allocation6 + $0x100] sm:$0xff] }
 0x239   :  { %v2252_v3 = vmax.f32 %v2236_v43, 0.0  ;;  %v13795_v4 = vpop.f32.mrb[14].mxu0  ;;  %v16974_v15 = vld [vmem:[#allocation2 + $0xc1] sm:$0xff]  ;;  %v15238_v13 = vpack.c.bf16 %v4098_v12, %v4097_v10 }
 0x23a   :  { %2270 = vst.msk [vmem:[#allocation2 + $0x101] sm:$0xff] %vm72_vm0, %v2253_v48  ;;  %v2239_v6 = vadd.f32 %v13795_v4, %v16890_v35  ;;  %v2193_v7 = vpop.f32.mrb[15].mxu0  ;;  %v2302_v8 = vld [vmem:[#allocation2 + $0xb1] sm:$0xff]  ;;  %v17095_v36 = vld [vmem:[#allocation2 + $0xc0] sm:$0xff] }
 0x23b   :  { %2269 = vst.msk [vmem:[#allocation2 + $0xf1] sm:$0xff] %vm72_vm0, %v2252_v3  ;;  %v2238_v11 = vadd.f32 %v16890_v35, %v2193_v7  ;;  %13817 = vmatmul.mubr.msk.f32.gmra.mrb[24].mxu0 %vm72_vm0, %v2302_v8  ;;  %13944 = vmatprep.mubr.msk.f32.mxu1 %vm72_vm0, %v2302_v8  ;;  %v17086_v32 = vld [vmem:[#allocation2 + $0xb2] sm:$0xff]  ;;  %v17097_v39 = vld [vmem:[#allocation2 + $0xc2] sm:$0xff] }
 0x23c   :  { %v2255_v16 = vmax.f32 %v2239_v6, 0.0  ;;  %13819 = vmatprep.mubr.msk.f32.mxu0 %vm72_vm0, %v16974_v15  ;;  %13945 = vmatmul.mubr.msk.f32.gmra.mrb[8].mxu1 %vm72_vm0, %v16974_v15  ;;  %v17091_v34 = vld [vmem:[#allocation2 + $0xb0] sm:$0xff] }
 0x23d   :  { %v2254_v52 = vmax.f32 %v2238_v11, 0.0  ;;  %v16988_v35 = vld [vmem:[#allocation2 + $0xe1] sm:$0xff] }
 0x23e   :  { %2272 = vst.msk [vmem:[#allocation2 + $0x121] sm:$0xff] %vm72_vm0, %v2255_v16  ;;  %v16981_v23 = vld [vmem:[#allocation2 + $0xd1] sm:$0xff]  ;;  %v17111_v48 = vld [vmem:[#allocation2 + $0xe0] sm:$0xff] }
 0x23f   :  { %2271 = vst.msk [vmem:[#allocation2 + $0x111] sm:$0xff] %vm72_vm0, %v2254_v52  ;;  %13820 = vmatmul.mubr.msk.f32.gmra.mrb[26].mxu0 %vm72_vm0, %v16981_v23  ;;  %13947 = vmatprep.mubr.msk.f32.mxu1 %vm72_vm0, %v16981_v23  ;;  %v17103_v40 = vld [vmem:[#allocation2 + $0xd2] sm:$0xff]  ;;  %v17113_v3 = vld [vmem:[#allocation2 + $0xe2] sm:$0xff] }
 0x240   :  { %13822 = vmatprep.mubr.msk.f32.mxu0 %vm72_vm0, %v16988_v35  ;;  %13948 = vmatmul.mubr.msk.f32.gmra.mrb[10].mxu1 %vm72_vm0, %v16988_v35  ;;  %v17107_v43 = vld [vmem:[#allocation2 + $0xd0] sm:$0xff]  ;;  %v2700_v16 = vld [vmem:[#allocation2 + $0x2] sm:$0xff] }
 0x241   :  { %v17000_v24 = vld [vmem:[#allocation2 + $0x101] sm:$0xff] }
 0x242   :  { %v16994_v42 = vld [vmem:[#allocation2 + $0xf1] sm:$0xff]  ;;  %v17127_v7 = vld [vmem:[#allocation2 + $0x100] sm:$0xff] }
 0x243   :  { %13823 = vmatmul.mubr.msk.f32.gmra.mrb[28].mxu0 %vm72_vm0, %v16994_v42  ;;  %13950 = vmatprep.mubr.msk.f32.mxu1 %vm72_vm0, %v16994_v42  ;;  %v17119_v4 = vld [vmem:[#allocation2 + $0xf2] sm:$0xff]  ;;  %v17129_v8 = vld [vmem:[#allocation2 + $0x102] sm:$0xff] }
 0x244   :  { %13825 = vmatprep.mubr.msk.f32.mxu0 %vm72_vm0, %v17000_v24  ;;  %13951 = vmatmul.mubr.msk.f32.gmra.mrb[12].mxu1 %vm72_vm0, %v17000_v24  ;;  %v17123_v6 = vld [vmem:[#allocation2 + $0xf0] sm:$0xff] }
 0x245   :  { %v17012_v25 = vld [vmem:[#allocation2 + $0x121] sm:$0xff] }
 0x246   :  { %v17006_v53 = vld [vmem:[#allocation2 + $0x111] sm:$0xff]  ;;  %v17143_v28 = vld [vmem:[#allocation2 + $0x122] sm:$0xff] }
 0x247   :  { %13826 = vmatmul.mubr.msk.f32.gmra.mrb[30].mxu0 %vm72_vm0, %v17006_v53  ;;  %13953 = vmatprep.mubr.msk.f32.mxu1 %vm72_vm0, %v17006_v53  ;;  %v17135_v11 = vld [vmem:[#allocation2 + $0x112] sm:$0xff] }
 0x248   :  { %13954 = vmatmul.mubr.msk.f32.gmra.mrb[14].mxu1 %vm72_vm0, %v17012_v25  ;;  %13836 = vmatprep.mubr.msk.f32.mxu0 %vm72_vm0, %v16549_v1  ;;  %v17034_v1 = vld [vmem:[#allocation2 + $0x32] sm:$0xff] }
 0x249   :  { %13964 = vmatprep.mubr.msk.f32.mxu1 %vm72_vm0, %v17016_v30  ;;  %v17139_v52 = vld [vmem:[#allocation2 + $0x110] sm:$0xff] }
 0x24b   :  { %13837 = vmatmul.mubr.msk.f32.vlgmr.msra.gmra.mrb[16].mxu0 %vm72_vm0, %v17022_v37 }
 0x24c   :  { %13839 = vmatprep.mubr.msk.f32.mxu0 %vm72_vm0, %v17026_v56  ;;  %13965 = vmatmul.mubr.msk.f32.vlgmr.msra.gmra.mrb[0].mxu1 %vm72_vm0, %v17028_v60 }
 0x24d   :  { %13967 = vmatprep.mubr.msk.f32.mxu1 %vm72_vm0, %v17034_v1  ;;  %15225 = vmatpush3.bf16.msra.mxu1 %v16918_v59  ;;  %v17056_v59 = vld [vmem:[#allocation2 + $0x52] sm:$0xff] }
 0x24e   :  { %15227 = vmatprep.subr.bf16.mxu1 %v15226_v38  ;;  %15193 = vmatpush3.bf16.msra.mxu0 %v16920_v61  ;;  %v17060_v61 = vld [vmem:[#allocation2 + $0x50] sm:$0xff] }
 0x24f   :  { %13840 = vmatmul.mubr.msk.f32.gmra.mrb[18].mxu0 %vm72_vm0, %v17039_v50  ;;  %15195 = vmatprep.subr.bf16.mxu0 %v15194_v62 }
 0x250   :  { %13842 = vmatprep.mubr.msk.f32.mxu0 %vm72_vm0, %v17046_v55  ;;  %13968 = vmatmul.mubr.msk.f32.gmra.mrb[2].mxu1 %vm72_vm0, %v17048_v57 }
 0x251   :  { %13970 = vmatprep.mubr.msk.f32.mxu1 %vm72_vm0, %v17056_v59  ;;  %15229 = vmatpush3.bf16.msra.mxu1 %v15226_v38  ;;  %v2950_v38 = vld [vmem:[#allocation6 + $0x78] sm:$0xff] }
 0x252   :  { %15197 = vmatpush3.bf16.msra.mxu0 %v15194_v62  ;;  %15231 = vmatprep.subr.bf16.mxu1 %v17042_v51  ;;  %v15202_v62 = vpack.c.bf16 %v2950_v38, %v2949_v26 }
 0x253   :  { %13843 = vmatmul.mubr.msk.f32.gmra.mrb[20].mxu0 %vm72_vm0, %v17060_v61  ;;  %15199 = vmatprep.subr.bf16.mxu0 %v17050_v63 }
 0x254   :  { %13845 = vmatprep.mubr.msk.f32.mxu0 %vm72_vm0, %v17065_v17  ;;  %13971 = vmatmul.mubr.msk.f32.gmra.mrb[4].mxu1 %vm72_vm0, %v17067_v18 }
 0x255   :  { %13973 = vmatprep.mubr.msk.f32.mxu1 %vm72_vm0, %v17074_v19 }
 0x257   :  { %13846 = vmatmul.mubr.msk.f32.gmra.mrb[22].mxu0 %vm72_vm0, %v17078_v21 }
 0x258   :  { %13974 = vmatmul.mubr.msk.f32.gmra.mrb[6].mxu1 %vm72_vm0, %v17082_v27  ;;  %13848 = vmatprep.mubr.msk.f32.mxu0 %vm72_vm0, %v2281_v20  ;;  %v4100_v20 = vld [vmem:[#allocation6 + $0x118] sm:$0xff] }
 0x259   :  { %13976 = vmatprep.mubr.msk.f32.mxu1 %vm72_vm0, %v17086_v32 }
 0x25b   :  { %13849 = vmatmul.mubr.msk.f32.gmra.mrb[24].mxu0 %vm72_vm0, %v17091_v34 }
 0x25c   :  { %13851 = vmatprep.mubr.msk.f32.mxu0 %vm72_vm0, %v17095_v36  ;;  %13977 = vmatmul.mubr.msk.f32.gmra.mrb[8].mxu1 %vm72_vm0, %v17097_v39 }
 0x25d   :  { %13979 = vmatprep.mubr.msk.f32.mxu1 %vm72_vm0, %v17103_v40 }
 0x25f   :  { %13852 = vmatmul.mubr.msk.f32.gmra.mrb[26].mxu0 %vm72_vm0, %v17107_v43 }
 0x260   :  { %13854 = vmatprep.mubr.msk.f32.mxu0 %vm72_vm0, %v17111_v48  ;;  %13980 = vmatmul.mubr.msk.f32.gmra.mrb[10].mxu1 %vm72_vm0, %v17113_v3 }
 0x261   :  { %13982 = vmatprep.mubr.msk.f32.mxu1 %vm72_vm0, %v17119_v4 }
 0x263   :  { %13855 = vmatmul.mubr.msk.f32.gmra.mrb[28].mxu0 %vm72_vm0, %v17123_v6 }
 0x264   :  { %13857 = vmatprep.mubr.msk.f32.mxu0 %vm72_vm0, %v17127_v7  ;;  %13983 = vmatmul.mubr.msk.f32.gmra.mrb[12].mxu1 %vm72_vm0, %v17129_v8 }
 0x265   :  { %13985 = vmatprep.mubr.msk.f32.mxu1 %vm72_vm0, %v17135_v11 }
 0x267   :  { %13858 = vmatmul.mubr.msk.f32.gmra.mrb[30].mxu0 %vm72_vm0, %v17139_v52 }
 0x268   :  { %13986 = vmatmul.mubr.msk.f32.gmra.mrb[14].mxu1 %vm72_vm0, %v17143_v28  ;;  %13868 = vmatprep.mubr.msk.f32.mxu0 %vm72_vm0, %v2700_v16 }
 0x269   :  { %13996 = vmatprep.mubr.msk.f32.mxu1 %vm72_vm0, %v17026_v56 }
 0x26b   :  { %13869 = vmatmul.mubr.msk.f32.vlgmr.msra.gmra.mrb[16].mxu0 %vm72_vm0, %v17016_v30  ;;  %v3626_v30 = vld [vmem:[#allocation2 + $0x80] sm:$0xff] }
 0x26c   :  { %13871 = vmatprep.mubr.msk.f32.mxu0 %vm72_vm0, %v17028_v60  ;;  %13997 = vmatmul.mubr.msk.f32.vlgmr.msra.gmra.mrb[0].mxu1 %vm72_vm0, %v17039_v50 }
 0x26d   :  { %13999 = vmatprep.mubr.msk.f32.mxu1 %vm72_vm0, %v17046_v55  ;;  %15233 = vmatpush3.bf16.msra.mxu1 %v17042_v51  ;;  %v2708_v51 = vld [vmem:[#allocation2 + $0xa2] sm:$0xff] }
 0x26e   :  { %15235 = vmatprep.subr.bf16.mxu1 %v15234_v54  ;;  %15201 = vmatpush3.bf16.msra.mxu0 %v17050_v63  ;;  %v4099_v63 = vld [vmem:[#allocation6 + $0x110] sm:$0xff] }
 0x26f   :  { %13872 = vmatmul.mubr.msk.f32.gmra.mrb[18].mxu0 %vm72_vm0, %v17034_v1  ;;  %15203 = vmatprep.subr.bf16.mxu0 %v15202_v62 }
 0x270   :  { %13874 = vmatprep.mubr.msk.f32.mxu0 %vm72_vm0, %v17048_v57  ;;  %14000 = vmatmul.mubr.msk.f32.gmra.mrb[2].mxu1 %vm72_vm0, %v17060_v61 }
 0x271   :  { %14002 = vmatprep.mubr.msk.f32.mxu1 %vm72_vm0, %v17065_v17  ;;  %15237 = vmatpush3.bf16.msra.mxu1 %v15234_v54 }
 0x272   :  { %15205 = vmatpush3.bf16.msra.mxu0 %v15202_v62  ;;  %15239 = vmatprep.subr.bf16.mxu1 %v15238_v13 }
 0x273   :  { %13875 = vmatmul.mubr.msk.f32.gmra.mrb[20].mxu0 %vm72_vm0, %v17056_v59 }
 0x274   :  { %13877 = vmatprep.mubr.msk.f32.mxu0 %vm72_vm0, %v17067_v18  ;;  %14003 = vmatmul.mubr.msk.f32.gmra.mrb[4].mxu1 %vm72_vm0, %v17078_v21 }
 0x275   :  { %14005 = vmatprep.mubr.msk.f32.mxu1 %vm72_vm0, %v3626_v30 }
 0x277   :  { %13878 = vmatmul.mubr.msk.f32.gmra.mrb[22].mxu0 %vm72_vm0, %v17074_v19 }
 0x278   :  { %14006 = vmatmul.mubr.msk.f32.gmra.mrb[6].mxu1 %vm72_vm0, %v16792_v5  ;;  %13880 = vmatprep.mubr.msk.f32.mxu0 %vm72_vm0, %v2708_v51  ;;  %v3634_v5 = vld [vmem:[#allocation2 + $0x120] sm:$0xff] }
 0x279   :  { %14008 = vmatprep.mubr.msk.f32.mxu1 %vm72_vm0, %v17095_v36 }
 0x27b   :  { %13881 = vmatmul.mubr.msk.f32.gmra.mrb[24].mxu0 %vm72_vm0, %v17086_v32  ;;  %v15242_v32 = vpack.c.bf16 %v4100_v20, %v4099_v63 }
 0x27c   :  { %13883 = vmatprep.mubr.msk.f32.mxu0 %vm72_vm0, %v17097_v39  ;;  %14009 = vmatmul.mubr.msk.f32.gmra.mrb[8].mxu1 %vm72_vm0, %v17107_v43 }
 0x27d   :  { %14011 = vmatprep.mubr.msk.f32.mxu1 %vm72_vm0, %v17111_v48 }
 0x27f   :  { %13884 = vmatmul.mubr.msk.f32.gmra.mrb[26].mxu0 %vm72_vm0, %v17103_v40 }
 0x280   :  { %13886 = vmatprep.mubr.msk.f32.mxu0 %vm72_vm0, %v17113_v3  ;;  %14012 = vmatmul.mubr.msk.f32.gmra.mrb[10].mxu1 %vm72_vm0, %v17123_v6 }
 0x281   :  { %14014 = vmatprep.mubr.msk.f32.mxu1 %vm72_vm0, %v17127_v7 }
 0x283   :  { %13887 = vmatmul.mubr.msk.f32.gmra.mrb[28].mxu0 %vm72_vm0, %v17119_v4 }
 0x284   :  { %13889 = vmatprep.mubr.msk.f32.mxu0 %vm72_vm0, %v17129_v8  ;;  %14015 = vmatmul.mubr.msk.f32.gmra.mrb[12].mxu1 %vm72_vm0, %v17139_v52 }
 0x285   :  { %14017 = vmatprep.mubr.msk.f32.mxu1 %vm72_vm0, %v3634_v5 }
 0x287   :  { %13890 = vmatmul.mubr.msk.f32.gmra.mrb[30].mxu0 %vm72_vm0, %v17135_v11 }
 0x288   :  { %13900 = vmatprep.mubr.msk.f32.mxu0 %vm72_vm0, %v17022_v37  ;;  %14018 = vmatmul.mubr.msk.f32.gmra.mrb[14].mxu1 %vm72_vm0, %v16810_v9  ;;  %v16234_v9 = vmov 0.0|0.0  }
 0x289   :  { %14028 = vmatprep.mubr.msk.f32.mxu1 %vm72_vm0, %v16908_v2  ;;  %15246 = vmatprep.subr.bf16.mxu0 %v16234_v9  ;;  %v4406_v2 = vld [vmem:[%s19204_s5 + $0x18] sm:$0xff] }
 0x28b   :  { %13901 = vmatmul.mubr.msk.f32.vlgmr.msra.gmra.mrb[16].mxu0 %vm72_vm0, %v17026_v56 }
 0x28c   :  { %13903 = vmatprep.mubr.msk.f32.mxu0 %vm72_vm0, %v17039_v50  ;;  %14029 = vmatmul.mubr.msk.f32.vlgmr.msra.gmra.mrb[0].mxu1 %vm72_vm0, %v16916_v58  ;;  %v17329_v50 = vld [vmem:[%s19203_s4] ss:$0 sm:$0xff] }
 0x28d   :  { %14031 = vmatprep.mubr.msk.f32.mxu1 %vm72_vm0, %v16928_v14  ;;  %15241 = vmatpush3.bf16.msra.mxu1 %v15238_v13 }
 0x28e   :  { %15243 = vmatprep.subr.bf16.mxu1 %v15242_v32 }
 0x28f   :  { %13904 = vmatmul.mubr.msk.f32.gmra.mrb[18].mxu0 %vm72_vm0, %v17046_v55 }
 0x290   :  { %13906 = vmatprep.mubr.msk.f32.mxu0 %vm72_vm0, %v17060_v61  ;;  %14032 = vmatmul.mubr.msk.f32.gmra.mrb[2].mxu1 %vm72_vm0, %v16936_v22 }
 0x291   :  { %14034 = vmatprep.mubr.msk.f32.mxu1 %vm72_vm0, %v16946_v31  ;;  %15245 = vmatpush3.bf16.msra.mxu1 %v15242_v32 }
 0x292   :  { %15270 = vmatprep.subr.bf16.mxu1 %v16234_v9 }
 0x293   :  { %13907 = vmatmul.mubr.msk.f32.gmra.mrb[20].mxu0 %vm72_vm0, %v17065_v17 }
 0x294   :  { %13909 = vmatprep.mubr.msk.f32.mxu0 %vm72_vm0, %v17078_v21  ;;  %14035 = vmatmul.mubr.msk.f32.gmra.mrb[4].mxu1 %vm72_vm0, %v16954_v41 }
 0x295   :  { %14037 = vmatprep.mubr.msk.f32.mxu1 %vm72_vm0, %v16962_v44 }
 0x297   :  { %13910 = vmatmul.mubr.msk.f32.gmra.mrb[22].mxu0 %vm72_vm0, %v3626_v30 }
 0x298   :  { %13912 = vmatprep.mubr.msk.f32.mxu0 %vm72_vm0, %v17091_v34  ;;  %14038 = vmatmul.mubr.msk.f32.gmra.mrb[6].mxu1 %vm72_vm0, %v16828_v45  ;;  %v4403_v45 = vld [vmem:[%s19204_s5] sm:$0xff] }
 0x299   :  { %14040 = vmatprep.mubr.msk.f32.mxu1 %vm72_vm0, %v16974_v15 }
 0x29b   :  { %13913 = vmatmul.mubr.msk.f32.gmra.mrb[24].mxu0 %vm72_vm0, %v17095_v36 }
 0x29c   :  { %13915 = vmatprep.mubr.msk.f32.mxu0 %vm72_vm0, %v17107_v43  ;;  %14041 = vmatmul.mubr.msk.f32.gmra.mrb[8].mxu1 %vm72_vm0, %v16981_v23 }
 0x29d   :  { %14043 = vmatprep.mubr.msk.f32.mxu1 %vm72_vm0, %v16988_v35 }
 0x29f   :  { %13916 = vmatmul.mubr.msk.f32.gmra.mrb[26].mxu0 %vm72_vm0, %v17111_v48 }
 0x2a0   :  { %13918 = vmatprep.mubr.msk.f32.mxu0 %vm72_vm0, %v17123_v6  ;;  %14044 = vmatmul.mubr.msk.f32.gmra.mrb[10].mxu1 %vm72_vm0, %v16994_v42 }
 0x2a1   :  { %14046 = vmatprep.mubr.msk.f32.mxu1 %vm72_vm0, %v17000_v24 }
 0x2a3   :  { %13919 = vmatmul.mubr.msk.f32.gmra.mrb[28].mxu0 %vm72_vm0, %v17127_v7 }
 0x2a4   :  { %13921 = vmatprep.mubr.msk.f32.mxu0 %vm72_vm0, %v17139_v52  ;;  %14047 = vmatmul.mubr.msk.f32.gmra.mrb[12].mxu1 %vm72_vm0, %v17006_v53 }
 0x2a5   :  { %14049 = vmatprep.mubr.msk.f32.mxu1 %vm72_vm0, %v17012_v25 }
 0x2a7   :  { %13922 = vmatmul.mubr.msk.f32.gmra.mrb[30].mxu0 %vm72_vm0, %v3634_v5 }
 0x2a8   :  { %14050 = vmatmul.mubr.msk.f32.gmra.mrb[14].mxu1 %vm72_vm0, %v16846_v46  ;;  %14116 = vmatprep.mubr.msk.f32.mxu0 %vm16235_vm2, %v16233_v0  ;;  %v4404_v46 = vld [vmem:[%s19204_s5 + $0x8] sm:$0xff] }
 0x2a9   :  { %14060 = vmatprep.mubr.msk.f32.mxu1 %vm72_vm0, %v17028_v60 }
 0x2ac   :  { %14061 = vmatmul.mubr.msk.f32.vlgmr.msra.gmra.mrb[0].mxu1 %vm72_vm0, %v17034_v1 }
 0x2ad   :  { %14063 = vmatprep.mubr.msk.f32.mxu1 %vm72_vm0, %v17048_v57 }
 0x2b0   :  { %14064 = vmatmul.mubr.msk.f32.gmra.mrb[2].mxu1 %vm72_vm0, %v17056_v59 }
 0x2b1   :  { %14066 = vmatprep.mubr.msk.f32.mxu1 %vm72_vm0, %v17067_v18 }
 0x2b4   :  { %14067 = vmatmul.mubr.msk.f32.gmra.mrb[4].mxu1 %vm72_vm0, %v17074_v19 }
 0x2b5   :  { %14069 = vmatprep.mubr.msk.f32.mxu1 %vm72_vm0, %v17082_v27 }
 0x2b8   :  { %14070 = vmatmul.mubr.msk.f32.gmra.mrb[6].mxu1 %vm72_vm0, %v16864_v47  ;;  %v4405_v47 = vld [vmem:[%s19204_s5 + $0x10] sm:$0xff] }
 0x2b9   :  { %14072 = vmatprep.mubr.msk.f32.mxu1 %vm72_vm0, %v17097_v39  ;;  %v15274_v58 = vpack.c.bf16 %v4406_v2, %v4405_v47 }
 0x2bc   :  { %14073 = vmatmul.mubr.msk.f32.gmra.mrb[8].mxu1 %vm72_vm0, %v17103_v40 }
 0x2bd   :  { %14075 = vmatprep.mubr.msk.f32.mxu1 %vm72_vm0, %v17113_v3 }
 0x2c0   :  { %14076 = vmatmul.mubr.msk.f32.gmra.mrb[10].mxu1 %vm72_vm0, %v17119_v4 }
 0x2c1   :  { %14078 = vmatprep.mubr.msk.f32.mxu1 %vm72_vm0, %v17129_v8 }
 0x2c4   :  { %14079 = vmatmul.mubr.msk.f32.gmra.mrb[12].mxu1 %vm72_vm0, %v17135_v11 }
 0x2c5   :  { %14081 = vmatprep.mubr.msk.f32.mxu1 %vm72_vm0, %v17143_v28 }
 0x2c8   :  { %14082 = vmatmul.mubr.msk.f32.gmra.mrb[14].mxu1 %vm72_vm0, %v16882_v49  ;;  %v15271_v49 = vpack.c.bf16 %v4404_v46, %v4403_v45 }
 0x2c9   :  { %14127 = vmatprep.mubr.msk.f32.mxu1 %vm16235_vm2, %v16233_v0 }
 0x2ca   :  { %15272 = vmatpush3.bf16.msra.mxu1 %v15271_v49 }
 0x2cb   :  { %15273 = vmatprep.subr.bf16.mxu1 %v16234_v9 }
 0x2ce   :  { %15275 = vmatpush3.bf16.msra.mxu1 %v15274_v58 }
 0x35e   :  { %v13902_v14 = vpop.f32.mrb[16].mxu0 }
 0x35f   :  { %v3065_v22 = vpop.f32.mrb[17].mxu0 }
 0x362   :  { %v13905_v31 = vpop.f32.mrb[18].mxu0 }
 0x363   :  { %v3075_v41 = vpop.f32.mrb[19].mxu0 }
 0x366   :  { %v13908_v44 = vpop.f32.mrb[20].mxu0 }
 0x367   :  { %v3085_v15 = vpop.f32.mrb[21].mxu0 }
 0x36a   :  { %v13911_v23 = vpop.f32.mrb[22].mxu0 }
 0x36b   :  { %v3095_v35 = vpop.f32.mrb[23].mxu0 }
 0x36e   :  { %v13914_v42 = vpop.f32.mrb[24].mxu0 }
 0x36f   :  { %v3105_v24 = vpop.f32.mrb[25].mxu0 }
 0x372   :  { %v13917_v53 = vpop.f32.mrb[26].mxu0 }
 0x373   :  { %v3115_v25 = vpop.f32.mrb[27].mxu0 }
 0x376   :  { %v13920_v37 = vpop.f32.mrb[28].mxu0 }
 0x377   :  { %v3125_v56 = vpop.f32.mrb[29].mxu0 }
 0x37a   :  { %v17322_v60 = vpop.f32.mrb[30].mxu0 }
 0x37b   :  { %v17324_v1 = vpop.f32.mrb[31].mxu0 }
 0x37f   :  { %v14062_v55 = vpop.f32.mrb[0].mxu1 }
 0x380   :  { %v15526_v57 = vadd.f32 %v14062_v55, %v13902_v14  ;;  %v4215_v59 = vpop.f32.mrb[1].mxu1 }
 0x381   :  { %v15527_v61 = vadd.f32 %v4215_v59, %v3065_v22 }
 0x382   :  { %v17332_v17 = vadd.f32 %v15526_v57, %v17329_v50 }
 0x383   :  { %v17335_v18 = vadd.f32 %v15527_v61, %v17329_v50  ;;  %v14065_v19 = vpop.f32.mrb[2].mxu1  ;;  %v4580_v61 = vld [vmem:[%s19211_s12] sm:$0xff] }
 0x384   :  { %v15528_v21 = vadd.f32 %v14065_v19, %v13905_v31  ;;  %v4225_v27 = vpop.f32.mrb[3].mxu1  ;;  %v12008_v19 = vld [vmem:[%s19207_s8] ss:$0 sm:$0xff] }
 0x385   :  { %v15247_v34 = vpack.c.bf16 %v17332_v17, %v17335_v18  ;;  %v15529_v36 = vadd.f32 %v4225_v27, %v3075_v41 }
 0x386   :  { %v17340_v39 = vadd.f32 %v15528_v21, %v17329_v50 }
 0x387   :  { %v17343_v40 = vadd.f32 %v15529_v36, %v17329_v50  ;;  %v14068_v43 = vpop.f32.mrb[4].mxu1  ;;  %15248 = vmatpush3.bf16.msra.mxu0 %v15247_v34 }
 0x388   :  { %v15530_v48 = vadd.f32 %v14068_v43, %v13908_v44  ;;  %v4235_v3 = vpop.f32.mrb[5].mxu1  ;;  %15249 = vmatprep.subr.bf16.mxu0 %v16234_v9 }
 0x389   :  { %v15250_v4 = vpack.c.bf16 %v17340_v39, %v17343_v40  ;;  %v15531_v6 = vadd.f32 %v4235_v3, %v3085_v15 }
 0x38a   :  { %v17349_v7 = vadd.f32 %v15530_v48, %v17329_v50 }
 0x38b   :  { %v17352_v8 = vadd.f32 %v15531_v6, %v17329_v50  ;;  %v14071_v11 = vpop.f32.mrb[6].mxu1  ;;  %15251 = vmatpush3.bf16.msra.mxu0 %v15250_v4  ;;  %v4581_v6 = vld [vmem:[%s19211_s12 + $0x8] sm:$0xff] }
 0x38c   :  { %v15532_v16 = vadd.f32 %v14071_v11, %v13911_v23  ;;  %v4245_v52 = vpop.f32.mrb[7].mxu1  ;;  %15252 = vmatprep.subr.bf16.mxu0 %v16234_v9  ;;  %v4582_v11 = vld [vmem:[%s19211_s12 + $0x10] sm:$0xff] }
 0x38d   :  { %v15253_v28 = vpack.c.bf16 %v17349_v7, %v17352_v8  ;;  %v15533_v29 = vadd.f32 %v4245_v52, %v3095_v35  ;;  %v4584_v52 = vld [vmem:[%s19211_s12 + $0x20] sm:$0xff] }
 0x38e   :  { %v17358_v33 = vadd.f32 %v15532_v16, %v17329_v50  ;;  %v4583_v16 = vld [vmem:[%s19211_s12 + $0x18] sm:$0xff] }
 0x38f   :  { %v17361_v26 = vadd.f32 %v15533_v29, %v17329_v50  ;;  %v14074_v38 = vpop.f32.mrb[8].mxu1  ;;  %15254 = vmatpush3.bf16.msra.mxu0 %v15253_v28  ;;  %v4585_v28 = vld [vmem:[%s19211_s12 + $0x28] sm:$0xff]  ;;  %v4586_v29 = vld [vmem:[%s19211_s12 + $0x30] sm:$0xff] }
 0x390   :  { %v15534_v54 = vadd.f32 %v14074_v38, %v13914_v42  ;;  %v4255_v62 = vpop.f32.mrb[9].mxu1  ;;  %15255 = vmatprep.subr.bf16.mxu0 %v16234_v9  ;;  %v4587_v38 = vld [vmem:[%s19211_s12 + $0x38] sm:$0xff] }
 0x391   :  { %v15256_v10 = vpack.c.bf16 %v17358_v33, %v17361_v26  ;;  %v15535_v12 = vadd.f32 %v4255_v62, %v3105_v24  ;;  %v4589_v62 = vld [vmem:[%s19211_s12 + $0x48] sm:$0xff] }
 0x392   :  { %v17367_v13 = vadd.f32 %v15534_v54, %v17329_v50  ;;  %v4588_v54 = vld [vmem:[%s19211_s12 + $0x40] sm:$0xff] }
 0x393   :  { %v17370_v30 = vadd.f32 %v15535_v12, %v17329_v50  ;;  %v14077_v51 = vpop.f32.mrb[10].mxu1  ;;  %15257 = vmatpush3.bf16.msra.mxu0 %v15256_v10  ;;  %v4590_v10 = vld [vmem:[%s19211_s12 + $0x50] sm:$0xff]  ;;  %v4591_v12 = vld [vmem:[%s19211_s12 + $0x58] sm:$0xff] }
 0x394   :  { %v15536_v5 = vadd.f32 %v14077_v51, %v13917_v53  ;;  %v4265_v63 = vpop.f32.mrb[11].mxu1  ;;  %15258 = vmatprep.subr.bf16.mxu0 %v16234_v9  ;;  %v4592_v51 = vld [vmem:[%s19211_s12 + $0x60] sm:$0xff] }
 0x395   :  { %v15259_v20 = vpack.c.bf16 %v17367_v13, %v17370_v30  ;;  %v15537_v32 = vadd.f32 %v4265_v63, %v3115_v25  ;;  %v4332_v25 = vld [vmem:[%s19210_s11] sm:$0x3]  ;;  %v4594_v63 = vld [vmem:[%s19211_s12 + $0x70] sm:$0xff] }
 0x396   :  { %v17376_v45 = vadd.f32 %v15536_v5, %v17329_v50  ;;  %v4593_v5 = vld [vmem:[%s19211_s12 + $0x68] sm:$0xff] }
 0x397   :  { %v17379_v46 = vadd.f32 %v15537_v32, %v17329_v50  ;;  %v14080_v47 = vpop.f32.mrb[12].mxu1  ;;  %15260 = vmatpush3.bf16.msra.mxu0 %v15259_v20  ;;  %v4595_v20 = vld [vmem:[%s19211_s12 + $0x78] sm:$0xff]  ;;  %v4928_v32 = vld [vmem:[#allocation4 + $0x140] sm:$0xff] }
 0x398   :  { %v15538_v49 = vadd.f32 %v14080_v47, %v13920_v37  ;;  %v4275_v2 = vpop.f32.mrb[13].mxu1  ;;  %15261 = vmatprep.subr.bf16.mxu0 %v16234_v9  ;;  %v4929_v47 = vld [vmem:[#allocation4 + $0x148] sm:$0xff] }
 0x399   :  { %v15262_v58 = vpack.c.bf16 %v17376_v45, %v17379_v46  ;;  %v15539_v14 = vadd.f32 %v4275_v2, %v3125_v56  ;;  %v4930_v2 = vld [vmem:[#allocation4 + $0x150] sm:$0xff] }
 0x39a   :  { %v17385_v22 = vadd.f32 %v15538_v49, %v17329_v50  ;;  %v15276_v49 = vpack.c.bf16 %v4929_v47, %v4928_v32  ;;  %v4819_v47 = vld [vmem:[#allocation3 + $0x58] sm:$0xff] }
 0x39b   :  { %v17388_v31 = vadd.f32 %v15539_v14, %v17329_v50  ;;  %v14083_v41 = vpop.f32.mrb[14].mxu1  ;;  %15263 = vmatpush3.bf16.msra.mxu0 %v15262_v58  ;;  %v4931_v58 = vld [vmem:[#allocation4 + $0x158] sm:$0xff] }
 0x39c   :  { %v15540_v44 = vadd.f32 %v14083_v41, %v17322_v60  ;;  %v4285_v15 = vpop.f32.mrb[15].mxu1  ;;  %15264 = vmatprep.subr.bf16.mxu0 %v16234_v9  ;;  %v4488_v60 = vld [vmem:[%s19206_s7] sm:$0x3]  ;;  %v15280_v14 = vpack.c.bf16 %v4931_v58, %v4930_v2 }
 0x39d   :  { %v15265_v23 = vpack.c.bf16 %v17385_v22, %v17388_v31  ;;  %v15541_v35 = vadd.f32 %v4285_v15, %v17324_v1  ;;  %v12006_v1 = vld [vmem:[%s19205_s6] ss:$0 sm:$0xff]  ;;  %v4911_v41 = vld [vmem:[#allocation2 + $0x1] sm:$0xff] }
 0x39e   :  { %v17396_v42 = vadd.f32 %v15540_v44, %v17329_v50  ;;  %v4907_v44 = vld [vmem:[#allocation4 + $0x120] sm:$0xff]  ;;  %v4908_v15 = vld [vmem:[#allocation4 + $0x128] sm:$0xff] }
 0x39f   :  { %v17399_v24 = vadd.f32 %v15541_v35, %v17329_v50  ;;  %15266 = vmatpush3.bf16.msra.mxu0 %v15265_v23  ;;  %v17490_v23 = vpack.c.bf16 %v4908_v15, %v4907_v44  ;;  %v5335_v44 = vld [vmem:[#allocation4 + $0x160] sm:$0xff] }
 0x3a0   :  { %15267 = vmatprep.subr.bf16.mxu0 %v16234_v9 }
 0x3a1   :  { %v15268_v53 = vpack.c.bf16 %v17396_v42, %v17399_v24 }
 0x3a3   :  { %15269 = vmatpush3.bf16.msra.mxu0 %v15268_v53  ;;  %v4809_v53 = vld [vmem:[#allocation3 + $0x8] sm:$0xff] }
 0x3a4   :  { %14130 = vmatprep.subr.mxu0 %v16233_v0 }
 0x3a6   :  { %14117 = vmatmul.mubr.f32.vlgmr.msra.gmra.mrb[32].mxu0 %v4332_v25 }
 0x3a7   :  { %14132 = vmatprep.mubr.msk.f32.mxu0 %vm16235_vm2, %v16233_v0  ;;  %14131 = vmatpush3.msk.msra.mxu0 %vm4500_vm3, %v4488_v60 }
 0x3a8   :  { %15277 = vmatprep.subr.bf16.mxu0 %v15276_v49 }
 0x479   :  { %v4399_v37 = vpop.f32.mrb[32].mxu0 }
 0x47a   :  { %v14118_v56 = vpop.f32.mrb[33].mxu0  ;;  %14128 = vmatmul.mubr.msk.f32.vlgmr.msra.gmra.mrb[16].mxu1 %vm72_vm0, %v4399_v37 }
 0x47b   :  { %14137 = vmatprep.mubr.msk.f32.mxu1 %vm4496_vm4, %v4580_v61  ;;  %v4808_v56 = vld [vmem:[#allocation3] sm:$0xff] }
 0x54d   :  { %v4483_v50 = vpop.f32.mrb[16].mxu1 }
 0x54e   :  { %v4484_v55 = vadd.f32 %v12006_v1, %v4483_v50  ;;  %v14129_v57 = vpop.f32.mrb[17].mxu1 }
 0x54f   :  { %v4811_v57 = vld [vmem:[#allocation3 + $0x18] sm:$0xff] }
 0x550   :  { %v4487_v59 = vmax.f32 %v4484_v55, 0.0 }
 0x552   :  { %14133 = vmatmul.mubr.msk.f32.vlgmr.msra.gmra.mrb[34].mxu0 %vm4496_vm4, %v4487_v59 }
 0x553   :  { %15279 = vmatpush3.bf16.msra.mxu0 %v15276_v49  ;;  %14169 = vmatprep.mubr.msk.f32.mxu0 %vm72_vm0, %v4911_v41 }
 0x554   :  { %15281 = vmatprep.subr.bf16.mxu0 %v15280_v14 }
 0x557   :  { %15283 = vmatpush3.bf16.msra.mxu0 %v15280_v14  ;;  %v4818_v14 = vld [vmem:[#allocation3 + $0x50] sm:$0xff] }
 0x558   :  { %15285 = vmatprep.subr.bf16.mxu0 %v17490_v23 }
 0x625   :  { %v4570_v21 = vpop.f32.mrb[34].mxu0 }
 0x626   :  { %v4571_v27 = vadd.f32 %v12008_v19, %v4570_v21  ;;  %v14134_v34 = vpop.f32.mrb[35].mxu0  ;;  %v4810_v19 = vld [vmem:[#allocation3 + $0x10] sm:$0xff] }
 0x628   :  { %v4574_v36 = vsub.f32 0.0, %v4571_v27 }
 0x62a   :  { %v4575_v43 = vmul.f32 1.442695, %v4574_v36  ;;  %v4813_v36 = vld [vmem:[#allocation3 + $0x28] sm:$0xff] }
 0x62c   :  { %16173 = vpow2.f32 %v4575_v43 }
 0x636   :  { %v16174_v48 = vpop.eup %16173 }
 0x637   :  { %v4577_v3 = vadd.f32 1.0, %v16174_v48  ;;  %v4812_v48 = vld [vmem:[#allocation3 + $0x20] sm:$0xff] }
 0x639   :  { %16175 = vrcp.f32 %v4577_v3 }
 0x643   :  { %v16176_v4 = vpop.eup %16175 }
 0x644   :  { %14135 = vmatprep.subr.msk.mxu1 %vm4500_vm3, %v16176_v4 }
 0x645   :  { %14136 = vmatpush3.msk.msra.mxu1 %vm4500_vm3, %v16176_v4 }
 0x646   :  { %14138 = vmatmul.mubr.msk.f32.vlgmr.msra.gmra.mrb[18].mxu1 %vm4496_vm4, %v4581_v6 }
 0x647   :  { %14140 = vmatprep.mubr.msk.f32.mxu1 %vm4496_vm4, %v4582_v11 }
 0x64a   :  { %14141 = vmatmul.mubr.msk.f32.gmra.mrb[20].mxu1 %vm4496_vm4, %v4583_v16  ;;  %v4815_v16 = vld [vmem:[#allocation3 + $0x38] sm:$0xff] }
 0x64b   :  { %14143 = vmatprep.mubr.msk.f32.mxu1 %vm4496_vm4, %v4584_v52 }
 0x64e   :  { %14144 = vmatmul.mubr.msk.f32.gmra.mrb[22].mxu1 %vm4496_vm4, %v4585_v28 }
 0x64f   :  { %14146 = vmatprep.mubr.msk.f32.mxu1 %vm4496_vm4, %v4586_v29 }
 0x652   :  { %14147 = vmatmul.mubr.msk.f32.gmra.mrb[24].mxu1 %vm4496_vm4, %v4587_v38 }
 0x653   :  { %14149 = vmatprep.mubr.msk.f32.mxu1 %vm4496_vm4, %v4588_v54 }
 0x656   :  { %14150 = vmatmul.mubr.msk.f32.gmra.mrb[26].mxu1 %vm4496_vm4, %v4589_v62 }
 0x657   :  { %14152 = vmatprep.mubr.msk.f32.mxu1 %vm4496_vm4, %v4590_v10  ;;  %v4817_v10 = vld [vmem:[#allocation3 + $0x48] sm:$0xff] }
 0x65a   :  { %14153 = vmatmul.mubr.msk.f32.gmra.mrb[28].mxu1 %vm4496_vm4, %v4591_v12  ;;  %v4816_v12 = vld [vmem:[#allocation3 + $0x40] sm:$0xff] }
 0x65b   :  { %14155 = vmatprep.mubr.msk.f32.mxu1 %vm4496_vm4, %v4592_v51 }
 0x65e   :  { %14156 = vmatmul.mubr.msk.f32.gmra.mrb[30].mxu1 %vm4496_vm4, %v4593_v5 }
 0x65f   :  { %14158 = vmatprep.mubr.msk.f32.mxu1 %vm4496_vm4, %v4594_v63  ;;  %v4909_v63 = vld [vmem:[#allocation4 + $0x130] sm:$0xff] }
 0x662   :  { %14159 = vmatmul.mubr.msk.f32.gmra.mrb[32].mxu1 %vm4496_vm4, %v4595_v20  ;;  %v4910_v20 = vld [vmem:[#allocation4 + $0x138] sm:$0xff] }
 0x663   :  { %14457 = vmatprep.mubr.msk.f32.mxu1 %vm72_vm0, %v4911_v41  ;;  %v15288_v41 = vpack.c.bf16 %v4910_v20, %v4909_v63  ;;  %v5338_v63 = vld [vmem:[#allocation4 + $0x178] sm:$0xff] }
 0x719   :  { %v14139_v35 = vpop.f32.mrb[18].mxu1 }
 0x71a   :  { %v4793_v25 = vmul.f32 %v14139_v35, %v17332_v17  ;;  %v4713_v37 = vpop.f32.mrb[19].mxu1 }
 0x71b   :  { %v4792_v60 = vmul.f32 %v4713_v37, %v17335_v18 }
 0x71c   :  { %v4825_v1 = vadd.f32 %v4809_v53, %v4793_v25  ;;  %v5336_v25 = vld [vmem:[#allocation4 + $0x168] sm:$0xff] }
 0x71d   :  { %v4824_v50 = vadd.f32 %v4808_v56, %v4792_v60  ;;  %v14142_v55 = vpop.f32.mrb[20].mxu1 }
 0x71e   :  { %4841 = vst.msk [vmem:[#allocation3 + $0x8] sm:$0xff] %vm72_vm0, %v4825_v1  ;;  %v4795_v59 = vmul.f32 %v14142_v55, %v17340_v39  ;;  %v4723_v61 = vpop.f32.mrb[21].mxu1  ;;  %v17530_v55 = vpack.c.bf16 %v5336_v25, %v5335_v44 }
 0x71f   :  { %4840 = vst.msk [vmem:[#allocation3] sm:$0xff] %vm72_vm0, %v4824_v50  ;;  %v4794_v21 = vmul.f32 %v4723_v61, %v17343_v40  ;;  %v4821_v50 = vld [vmem:[#allocation3 + $0x68] sm:$0xff]  ;;  %v4820_v61 = vld [vmem:[#allocation3 + $0x60] sm:$0xff] }
 0x720   :  { %v4827_v27 = vadd.f32 %v4811_v57, %v4795_v59 }
 0x721   :  { %v4826_v17 = vadd.f32 %v4810_v19, %v4794_v21  ;;  %v14145_v34 = vpop.f32.mrb[22].mxu1 }
 0x722   :  { %4843 = vst.msk [vmem:[#allocation3 + $0x18] sm:$0xff] %vm72_vm0, %v4827_v27  ;;  %v4797_v18 = vmul.f32 %v14145_v34, %v17349_v7  ;;  %v4733_v43 = vpop.f32.mrb[23].mxu1  ;;  %v4814_v7 = vld [vmem:[#allocation3 + $0x30] sm:$0xff] }
 0x723   :  { %4842 = vst.msk [vmem:[#allocation3 + $0x10] sm:$0xff] %vm72_vm0, %v4826_v17  ;;  %v4796_v39 = vmul.f32 %v4733_v43, %v17352_v8 }
 0x724   :  { %v4829_v3 = vadd.f32 %v4813_v36, %v4797_v18  ;;  %v4823_v36 = vld [vmem:[#allocation3 + $0x78] sm:$0xff] }
 0x725   :  { %v4857_v4 = vld [vmem:[#allocation3 + $0x8] sm:$0xff]  ;;  %v4828_v6 = vadd.f32 %v4812_v48, %v4796_v39  ;;  %v14148_v11 = vpop.f32.mrb[24].mxu1  ;;  %v4822_v48 = vld [vmem:[#allocation3 + $0x70] sm:$0xff] }
 0x726   :  { %4875 = vst.msk [vmem:[#allocation2 + $0x21] sm:$0xff] %vm72_vm0, %v4857_v4  ;;  %v4856_v40 = vld [vmem:[#allocation3] sm:$0xff]  ;;  %4845 = vst.msk [vmem:[#allocation3 + $0x28] sm:$0xff] %vm72_vm0, %v4829_v3  ;;  %v4799_v52 = vmul.f32 %v14148_v11, %v17358_v33  ;;  %v4743_v28 = vpop.f32.mrb[25].mxu1 }
 0x727   :  { %4874 = vst.msk [vmem:[#allocation2 + $0x11] sm:$0xff] %vm72_vm0, %v4856_v40  ;;  %4844 = vst.msk [vmem:[#allocation3 + $0x20] sm:$0xff] %vm72_vm0, %v4828_v6  ;;  %v4798_v8 = vmul.f32 %v4743_v28, %v17361_v26 }
 0x728   :  { %v4831_v29 = vadd.f32 %v4815_v16, %v4799_v52  ;;  %v17561_v16 = vld [vmem:[#allocation2 + $0xa1] sm:$0xff] }
 0x729   :  { %v4859_v38 = vld [vmem:[#allocation3 + $0x18] sm:$0xff]  ;;  %v4830_v54 = vadd.f32 %v4814_v7, %v4798_v8  ;;  %v14151_v62 = vpop.f32.mrb[26].mxu1 }
 0x72a   :  { %4877 = vst.msk [vmem:[#allocation2 + $0x41] sm:$0xff] %vm72_vm0, %v4859_v38  ;;  %v4858_v51 = vld [vmem:[#allocation3 + $0x10] sm:$0xff]  ;;  %4847 = vst.msk [vmem:[#allocation3 + $0x38] sm:$0xff] %vm72_vm0, %v4831_v29  ;;  %v4801_v33 = vmul.f32 %v14151_v62, %v17367_v13  ;;  %v4753_v5 = vpop.f32.mrb[27].mxu1 }
 0x72b   :  { %4876 = vst.msk [vmem:[#allocation2 + $0x31] sm:$0xff] %vm72_vm0, %v4858_v51  ;;  %4846 = vst.msk [vmem:[#allocation3 + $0x30] sm:$0xff] %vm72_vm0, %v4830_v54  ;;  %v4800_v26 = vmul.f32 %v4753_v5, %v17370_v30  ;;  %v17601_v51 = vld [vmem:[#allocation2] sm:$0xff]  ;;  %v5337_v5 = vld [vmem:[#allocation4 + $0x170] sm:$0xff] }
 0x72c   :  { %v4833_v32 = vadd.f32 %v4817_v10, %v4801_v33  ;;  %v15296_v20 = vpack.c.bf16 %v5338_v63, %v5337_v5  ;;  %v6025_v5 = vld [vmem:[#allocation4 + $0x1c0] sm:$0xff]  ;;  %v6026_v63 = vld [vmem:[#allocation4 + $0x1c8] sm:$0xff] }
 0x72d   :  { %v4861_v49 = vld [vmem:[#allocation3 + $0x28] sm:$0xff]  ;;  %v4832_v2 = vadd.f32 %v4816_v12, %v4800_v26  ;;  %v14154_v58 = vpop.f32.mrb[28].mxu1 }
 0x72e   :  { %4879 = vst.msk [vmem:[#allocation2 + $0x61] sm:$0xff] %vm72_vm0, %v4861_v49  ;;  %v4860_v13 = vld [vmem:[#allocation3 + $0x20] sm:$0xff]  ;;  %4849 = vst.msk [vmem:[#allocation3 + $0x48] sm:$0xff] %vm72_vm0, %v4833_v32  ;;  %v4803_v15 = vmul.f32 %v14154_v58, %v17376_v45  ;;  %v4763_v35 = vpop.f32.mrb[29].mxu1  ;;  %v17518_v53 = vld [vmem:[#allocation2 + $0x11] sm:$0xff] }
 0x72f   :  { %4878 = vst.msk [vmem:[#allocation2 + $0x51] sm:$0xff] %vm72_vm0, %v4860_v13  ;;  %4848 = vst.msk [vmem:[#allocation3 + $0x40] sm:$0xff] %vm72_vm0, %v4832_v2  ;;  %v4802_v30 = vmul.f32 %v4763_v35, %v17379_v46  ;;  %14170 = vmatmul.mubr.msk.f32.vlgmr.msra.gmra.mrb[36].mxu0 %vm72_vm0, %v17518_v53  ;;  %v17525_v37 = vld [vmem:[#allocation2 + $0x21] sm:$0xff]  ;;  %v17609_v26 = vld [vmem:[#allocation2 + $0x10] sm:$0xff] }
 0x730   :  { %v4835_v56 = vadd.f32 %v4819_v47, %v4803_v15  ;;  %14172 = vmatprep.mubr.msk.f32.mxu0 %vm72_vm0, %v17525_v37  ;;  %15287 = vmatpush3.bf16.msra.mxu0 %v17490_v23  ;;  %v5565_v32 = vld [vmem:[#allocation4 + $0x180] sm:$0xff]  ;;  %v5566_v47 = vld [vmem:[#allocation4 + $0x188] sm:$0xff] }
 0x731   :  { %v4863_v45 = vld [vmem:[#allocation3 + $0x38] sm:$0xff]  ;;  %v4834_v60 = vadd.f32 %v4818_v14, %v4802_v30  ;;  %v14157_v1 = vpop.f32.mrb[30].mxu1  ;;  %15289 = vmatprep.subr.bf16.mxu0 %v15288_v41  ;;  %v17542_v21 = vld [vmem:[#allocation2 + $0x41] sm:$0xff]  ;;  %v15300_v2 = vpack.c.bf16 %v5566_v47, %v5565_v32  ;;  %v6027_v47 = vld [vmem:[#allocation4 + $0x1d0] sm:$0xff] }
 0x732   :  { %4881 = vst.msk [vmem:[#allocation2 + $0x81] sm:$0xff] %vm72_vm0, %v4863_v45  ;;  %v4862_v46 = vld [vmem:[#allocation3 + $0x30] sm:$0xff]  ;;  %4851 = vst.msk [vmem:[#allocation3 + $0x58] sm:$0xff] %vm72_vm0, %v4835_v56  ;;  %v4805_v57 = vmul.f32 %v14157_v1, %v17385_v22  ;;  %v4773_v59 = vpop.f32.mrb[31].mxu1  ;;  %v17613_v49 = vld [vmem:[#allocation2 + $0x20] sm:$0xff] }
 0x733   :  { %v17535_v19 = vld [vmem:[#allocation2 + $0x31] sm:$0xff]  ;;  %4880 = vst.msk [vmem:[#allocation2 + $0x71] sm:$0xff] %vm72_vm0, %v4862_v46  ;;  %4850 = vst.msk [vmem:[#allocation3 + $0x50] sm:$0xff] %vm72_vm0, %v4834_v60  ;;  %v4804_v23 = vmul.f32 %v4773_v59, %v17388_v31  ;;  %v17622_v14 = vld [vmem:[#allocation2 + $0x40] sm:$0xff] }
 0x734   :  { %14173 = vmatmul.mubr.msk.f32.gmra.mrb[38].mxu0 %vm72_vm0, %v17535_v19  ;;  %v4837_v27 = vadd.f32 %v4821_v50, %v4805_v57  ;;  %v17618_v58 = vld [vmem:[#allocation2 + $0x30] sm:$0xff]  ;;  %v17634_v13 = vld [vmem:[#allocation2 + $0xa0] sm:$0xff]  ;;  %v5568_v46 = vld [vmem:[#allocation4 + $0x198] sm:$0xff] }
 0x735   :  { %14175 = vmatprep.mubr.msk.f32.mxu0 %vm72_vm0, %v17542_v21  ;;  %15291 = vmatpush3.bf16.msra.mxu0 %v15288_v41  ;;  %v4865_v22 = vld [vmem:[#allocation3 + $0x48] sm:$0xff]  ;;  %v4836_v17 = vadd.f32 %v4820_v61, %v4804_v23  ;;  %v14160_v34 = vpop.f32.mrb[32].mxu1  ;;  %v17630_v44 = vld [vmem:[#allocation2 + $0x60] sm:$0xff]  ;;  %v17674_v59 = vld [vmem:[#allocation2 + $0x12] sm:$0xff] }
 0x736   :  { %15293 = vmatprep.subr.bf16.mxu0 %v17530_v55  ;;  %4883 = vst.msk [vmem:[#allocation2 + $0xc1] sm:$0xff] %vm72_vm0, %v4865_v22  ;;  %v4864_v18 = vld [vmem:[#allocation3 + $0x40] sm:$0xff]  ;;  %4853 = vst.msk [vmem:[#allocation3 + $0x68] sm:$0xff] %vm72_vm0, %v4837_v27  ;;  %v4807_v31 = vmul.f32 %v14160_v34, %v17396_v42  ;;  %v4783_v43 = vpop.f32.mrb[33].mxu1  ;;  %v17550_v39 = vld [vmem:[#allocation2 + $0x51] sm:$0xff] }
 0x737   :  { %4882 = vst.msk [vmem:[#allocation2 + $0xb1] sm:$0xff] %vm72_vm0, %v4864_v18  ;;  %4852 = vst.msk [vmem:[#allocation3 + $0x60] sm:$0xff] %vm72_vm0, %v4836_v17  ;;  %v4806_v3 = vmul.f32 %v4783_v43, %v17399_v24  ;;  %v17557_v4 = vld [vmem:[#allocation2 + $0x61] sm:$0xff]  ;;  %v17626_v41 = vld [vmem:[#allocation2 + $0x50] sm:$0xff] }
 0x738   :  { %14176 = vmatmul.mubr.msk.f32.gmra.mrb[40].mxu0 %vm72_vm0, %v17550_v39  ;;  %v4839_v6 = vadd.f32 %v4823_v36, %v4807_v31  ;;  %v17666_v1 = vld [vmem:[#allocation2 + $0x2] sm:$0xff]  ;;  %v17682_v17 = vld [vmem:[#allocation2 + $0x32] sm:$0xff] }
 0x739   :  { %14178 = vmatprep.mubr.msk.f32.mxu0 %vm72_vm0, %v17557_v4  ;;  %v4867_v42 = vld [vmem:[#allocation3 + $0x58] sm:$0xff]  ;;  %v4838_v11 = vadd.f32 %v4822_v48, %v4806_v3  ;;  %v5795_v61 = vld [vmem:[#allocation4 + $0x1a0] sm:$0xff]  ;;  %v5796_v23 = vld [vmem:[#allocation4 + $0x1a8] sm:$0xff] }
 0x73a   :  { %4885 = vst.msk [vmem:[#allocation2 + $0xe1] sm:$0xff] %vm72_vm0, %v4867_v42  ;;  %v4866_v40 = vld [vmem:[#allocation3 + $0x50] sm:$0xff]  ;;  %4855 = vst.msk [vmem:[#allocation3 + $0x78] sm:$0xff] %vm72_vm0, %v4839_v6  ;;  %v17678_v27 = vld [vmem:[#allocation2 + $0x22] sm:$0xff]  ;;  %v15308_v22 = vpack.c.bf16 %v5796_v23, %v5795_v61 }
 0x73b   :  { %v17565_v52 = vld [vmem:[#allocation2 + $0x71] sm:$0xff]  ;;  %4884 = vst.msk [vmem:[#allocation2 + $0xd1] sm:$0xff] %vm72_vm0, %v4866_v40  ;;  %4854 = vst.msk [vmem:[#allocation3 + $0x70] sm:$0xff] %vm72_vm0, %v4838_v11  ;;  %v17686_v34 = vld [vmem:[#allocation2 + $0x42] sm:$0xff] }
 0x73c   :  { %14179 = vmatmul.mubr.msk.f32.gmra.mrb[42].mxu0 %vm72_vm0, %v17565_v52  ;;  %v17636_v15 = vld [vmem:[#allocation2 + $0x70] sm:$0xff]  ;;  %v17694_v18 = vld [vmem:[#allocation2 + $0x62] sm:$0xff]  ;;  %v6258_v23 = vld [vmem:[#allocation4 + $0x1f8] sm:$0xff] }
 0x73d   :  { %14181 = vmatprep.mubr.msk.f32.mxu0 %vm72_vm0, %v17561_v16  ;;  %v4869_v24 = vld [vmem:[#allocation3 + $0x68] sm:$0xff]  ;;  %v17646_v25 = vld [vmem:[#allocation2 + $0xc0] sm:$0xff]  ;;  %v17690_v36 = vld [vmem:[#allocation2 + $0x52] sm:$0xff] }
 0x73e   :  { %4887 = vst.msk [vmem:[#allocation2 + $0x101] sm:$0xff] %vm72_vm0, %v4869_v24  ;;  %v4868_v28 = vld [vmem:[#allocation3 + $0x60] sm:$0xff]  ;;  %v17574_v7 = vld [vmem:[#allocation2 + $0xb1] sm:$0xff] }
 0x73f   :  { %4886 = vst.msk [vmem:[#allocation2 + $0xf1] sm:$0xff] %vm72_vm0, %v4868_v28  ;;  %v17579_v8 = vld [vmem:[#allocation2 + $0xc1] sm:$0xff]  ;;  %v17642_v35 = vld [vmem:[#allocation2 + $0xb0] sm:$0xff] }
 0x740   :  { %14182 = vmatmul.mubr.msk.f32.gmra.mrb[44].mxu0 %vm72_vm0, %v17574_v7  ;;  %v17698_v31 = vld [vmem:[#allocation2 + $0xa2] sm:$0xff]  ;;  %v17700_v43 = vld [vmem:[#allocation2 + $0x72] sm:$0xff] }
 0x741   :  { %14184 = vmatprep.mubr.msk.f32.mxu0 %vm72_vm0, %v17579_v8  ;;  %v4871_v29 = vld [vmem:[#allocation3 + $0x78] sm:$0xff]  ;;  %v17589_v62 = vld [vmem:[#allocation2 + $0xe1] sm:$0xff]  ;;  %v5797_v28 = vld [vmem:[#allocation4 + $0x1b0] sm:$0xff] }
 0x742   :  { %4889 = vst.msk [vmem:[#allocation2 + $0x121] sm:$0xff] %vm72_vm0, %v4871_v29  ;;  %v4870_v38 = vld [vmem:[#allocation3 + $0x70] sm:$0xff]  ;;  %v17654_v56 = vld [vmem:[#allocation2 + $0xe0] sm:$0xff]  ;;  %v5798_v29 = vld [vmem:[#allocation4 + $0x1b8] sm:$0xff] }
 0x743   :  { %v17584_v54 = vld [vmem:[#allocation2 + $0xd1] sm:$0xff]  ;;  %4888 = vst.msk [vmem:[#allocation2 + $0x111] sm:$0xff] %vm72_vm0, %v4870_v38  ;;  %v17710_v3 = vld [vmem:[#allocation2 + $0xc2] sm:$0xff]  ;;  %v15312_v38 = vpack.c.bf16 %v5798_v29, %v5797_v28 }
 0x744   :  { %14185 = vmatmul.mubr.msk.f32.gmra.mrb[46].mxu0 %vm72_vm0, %v17584_v54  ;;  %v17650_v30 = vld [vmem:[#allocation2 + $0xd0] sm:$0xff]  ;;  %v17718_v42 = vld [vmem:[#allocation2 + $0xe2] sm:$0xff] }
 0x745   :  { %14187 = vmatprep.mubr.msk.f32.mxu0 %vm72_vm0, %v17589_v62  ;;  %v17597_v12 = vld [vmem:[#allocation2 + $0x101] sm:$0xff]  ;;  %v17706_v48 = vld [vmem:[#allocation2 + $0xb2] sm:$0xff] }
 0x746   :  { %v17593_v10 = vld [vmem:[#allocation2 + $0xf1] sm:$0xff]  ;;  %v17662_v60 = vld [vmem:[#allocation2 + $0x100] sm:$0xff]  ;;  %v7023_v28 = vld [vmem:[#allocation6 + $0x148] sm:$0xff] }
 0x747   :  { %v17658_v45 = vld [vmem:[#allocation2 + $0xf0] sm:$0xff]  ;;  %v17726_v40 = vld [vmem:[#allocation2 + $0x102] sm:$0xff] }
 0x748   :  { %14188 = vmatmul.mubr.msk.f32.gmra.mrb[48].mxu0 %vm72_vm0, %v17593_v10  ;;  %v17714_v6 = vld [vmem:[#allocation2 + $0xd2] sm:$0xff] }
 0x749   :  { %14190 = vmatprep.mubr.msk.f32.mxu0 %vm72_vm0, %v17597_v12  ;;  %v17722_v11 = vld [vmem:[#allocation2 + $0xf2] sm:$0xff]  ;;  %v17766_v32 = vld [vmem:[#allocation2 + $0x120] sm:$0xff] }
 0x74a   :  { %v17603_v33 = vld [vmem:[#allocation2 + $0x111] sm:$0xff]  ;;  %v17802_v61 = vld [vmem:[#allocation2 + $0x121] sm:$0xff] }
 0x74b   :  { %v17668_v50 = vld [vmem:[#allocation2 + $0x110] sm:$0xff] }
 0x74c   :  { %14191 = vmatmul.mubr.msk.f32.gmra.mrb[50].mxu0 %vm72_vm0, %v17603_v33  ;;  %v17730_v24 = vld [vmem:[#allocation2 + $0x112] sm:$0xff] }
 0x74d   :  { %14201 = vmatprep.mubr.msk.f32.mxu0 %vm72_vm0, %v17601_v51 }
 0x750   :  { %14202 = vmatmul.mubr.msk.f32.vlgmr.msra.gmra.mrb[36].mxu0 %vm72_vm0, %v17609_v26 }
 0x751   :  { %14204 = vmatprep.mubr.msk.f32.mxu0 %vm72_vm0, %v17613_v49  ;;  %15295 = vmatpush3.bf16.msra.mxu0 %v17530_v55  ;;  %v5567_v55 = vld [vmem:[#allocation4 + $0x190] sm:$0xff] }
 0x752   :  { %15297 = vmatprep.subr.bf16.mxu0 %v15296_v20  ;;  %v15304_v57 = vpack.c.bf16 %v5568_v46, %v5567_v55  ;;  %v6255_v55 = vld [vmem:[#allocation4 + $0x1e0] sm:$0xff]  ;;  %v6256_v46 = vld [vmem:[#allocation4 + $0x1e8] sm:$0xff] }
 0x754   :  { %14205 = vmatmul.mubr.msk.f32.gmra.mrb[38].mxu0 %vm72_vm0, %v17618_v58 }
 0x755   :  { %14207 = vmatprep.mubr.msk.f32.mxu0 %vm72_vm0, %v17622_v14  ;;  %15299 = vmatpush3.bf16.msra.mxu0 %v15296_v20  ;;  %v15316_v20 = vpack.c.bf16 %v6026_v63, %v6025_v5  ;;  %v6485_v5 = vld [vmem:[#allocation4 + $0x200] sm:$0xff]  ;;  %v6486_v63 = vld [vmem:[#allocation4 + $0x208] sm:$0xff] }
 0x756   :  { %15301 = vmatprep.subr.bf16.mxu0 %v15300_v2 }
 0x758   :  { %14208 = vmatmul.mubr.msk.f32.gmra.mrb[40].mxu0 %vm72_vm0, %v17626_v41 }
 0x759   :  { %14210 = vmatprep.mubr.msk.f32.mxu0 %vm72_vm0, %v17630_v44 }
 0x75c   :  { %14211 = vmatmul.mubr.msk.f32.gmra.mrb[42].mxu0 %vm72_vm0, %v17636_v15 }
 0x75d   :  { %14213 = vmatprep.mubr.msk.f32.mxu0 %vm72_vm0, %v17634_v13 }
 0x760   :  { %14214 = vmatmul.mubr.msk.f32.gmra.mrb[44].mxu0 %vm72_vm0, %v17642_v35 }
 0x761   :  { %14216 = vmatprep.mubr.msk.f32.mxu0 %vm72_vm0, %v17646_v25 }
 0x764   :  { %14217 = vmatmul.mubr.msk.f32.gmra.mrb[46].mxu0 %vm72_vm0, %v17650_v30 }
 0x765   :  { %14219 = vmatprep.mubr.msk.f32.mxu0 %vm72_vm0, %v17654_v56 }
 0x768   :  { %14220 = vmatmul.mubr.msk.f32.gmra.mrb[48].mxu0 %vm72_vm0, %v17658_v45 }
 0x769   :  { %14222 = vmatprep.mubr.msk.f32.mxu0 %vm72_vm0, %v17662_v60 }
 0x76c   :  { %14223 = vmatmul.mubr.msk.f32.gmra.mrb[50].mxu0 %vm72_vm0, %v17668_v50 }
 0x76d   :  { %14233 = vmatprep.mubr.msk.f32.mxu0 %vm72_vm0, %v17666_v1 }
 0x770   :  { %14234 = vmatmul.mubr.msk.f32.vlgmr.msra.gmra.mrb[36].mxu0 %vm72_vm0, %v17674_v59 }
 0x771   :  { %14236 = vmatprep.mubr.msk.f32.mxu0 %vm72_vm0, %v17678_v27  ;;  %15303 = vmatpush3.bf16.msra.mxu0 %v15300_v2  ;;  %v6028_v2 = vld [vmem:[#allocation4 + $0x1d8] sm:$0xff] }
 0x772   :  { %15305 = vmatprep.subr.bf16.mxu0 %v15304_v57 }
 0x774   :  { %14237 = vmatmul.mubr.msk.f32.gmra.mrb[38].mxu0 %vm72_vm0, %v17682_v17 }
 0x775   :  { %14239 = vmatprep.mubr.msk.f32.mxu0 %vm72_vm0, %v17686_v34  ;;  %15307 = vmatpush3.bf16.msra.mxu0 %v15304_v57  ;;  %v15324_v57 = vpack.c.bf16 %v6256_v46, %v6255_v55  ;;  %v6715_v55 = vld [vmem:[#allocation4 + $0x220] sm:$0xff]  ;;  %v6716_v46 = vld [vmem:[#allocation4 + $0x228] sm:$0xff] }
 0x776   :  { %15309 = vmatprep.subr.bf16.mxu0 %v15308_v22 }
 0x778   :  { %14240 = vmatmul.mubr.msk.f32.gmra.mrb[40].mxu0 %vm72_vm0, %v17690_v36 }
 0x779   :  { %14242 = vmatprep.mubr.msk.f32.mxu0 %vm72_vm0, %v17694_v18 }
 0x77c   :  { %14243 = vmatmul.mubr.msk.f32.gmra.mrb[42].mxu0 %vm72_vm0, %v17700_v43 }
 0x77d   :  { %14245 = vmatprep.mubr.msk.f32.mxu0 %vm72_vm0, %v17698_v31 }
 0x780   :  { %14246 = vmatmul.mubr.msk.f32.gmra.mrb[44].mxu0 %vm72_vm0, %v17706_v48 }
 0x781   :  { %14248 = vmatprep.mubr.msk.f32.mxu0 %vm72_vm0, %v17710_v3 }
 0x784   :  { %14249 = vmatmul.mubr.msk.f32.gmra.mrb[46].mxu0 %vm72_vm0, %v17714_v6 }
 0x785   :  { %14251 = vmatprep.mubr.msk.f32.mxu0 %vm72_vm0, %v17718_v42 }
 0x788   :  { %14252 = vmatmul.mubr.msk.f32.gmra.mrb[48].mxu0 %vm72_vm0, %v17722_v11 }
 0x789   :  { %14254 = vmatprep.mubr.msk.f32.mxu0 %vm72_vm0, %v17726_v40 }
 0x78c   :  { %14255 = vmatmul.mubr.msk.f32.gmra.mrb[50].mxu0 %vm72_vm0, %v17730_v24 }
 0x78d   :  { %14265 = vmatprep.mubr.msk.f32.mxu0 %vm72_vm0, %v17609_v26  ;;  %v17748_v26 = vld [vmem:[#allocation2 + $0x80] sm:$0xff] }
 0x790   :  { %14266 = vmatmul.mubr.msk.f32.vlgmr.msra.gmra.mrb[36].mxu0 %vm72_vm0, %v17613_v49 }
 0x791   :  { %14268 = vmatprep.mubr.msk.f32.mxu0 %vm72_vm0, %v17618_v58  ;;  %15311 = vmatpush3.bf16.msra.mxu0 %v15308_v22  ;;  %v7022_v22 = vld [vmem:[#allocation6 + $0x140] sm:$0xff] }
 0x792   :  { %15313 = vmatprep.subr.bf16.mxu0 %v15312_v38  ;;  %v15348_v29 = vpack.c.bf16 %v7023_v28, %v7022_v22  ;;  %v7430_v22 = vld [vmem:[#allocation6 + $0x168] sm:$0xff] }
 0x794   :  { %14269 = vmatmul.mubr.msk.f32.gmra.mrb[38].mxu0 %vm72_vm0, %v17622_v14  ;;  %15349 = vmatprep.subr.bf16.mxu1 %v15348_v29 }
 0x795   :  { %14271 = vmatprep.mubr.msk.f32.mxu0 %vm72_vm0, %v17626_v41  ;;  %15315 = vmatpush3.bf16.msra.mxu0 %v15312_v38 }
 0x796   :  { %15317 = vmatprep.subr.bf16.mxu0 %v15316_v20  ;;  %15351 = vmatpush3.bf16.msra.mxu1 %v15348_v29 }
 0x798   :  { %14272 = vmatmul.mubr.msk.f32.gmra.mrb[40].mxu0 %vm72_vm0, %v17630_v44 }
 0x799   :  { %14274 = vmatprep.mubr.msk.f32.mxu0 %vm72_vm0, %v17636_v15 }
 0x79c   :  { %14275 = vmatmul.mubr.msk.f32.gmra.mrb[42].mxu0 %vm72_vm0, %v17748_v26 }
 0x79d   :  { %14277 = vmatprep.mubr.msk.f32.mxu0 %vm72_vm0, %v17642_v35  ;;  %v15320_v35 = vpack.c.bf16 %v6028_v2, %v6027_v47  ;;  %v17838_v47 = vld [vmem:[#allocation2 + $0x122] sm:$0xff]  ;;  %v6488_v2 = vld [vmem:[#allocation4 + $0x218] sm:$0xff] }
 0x7a0   :  { %14278 = vmatmul.mubr.msk.f32.gmra.mrb[44].mxu0 %vm72_vm0, %v17646_v25 }
 0x7a1   :  { %14280 = vmatprep.mubr.msk.f32.mxu0 %vm72_vm0, %v17650_v30 }
 0x7a4   :  { %14281 = vmatmul.mubr.msk.f32.gmra.mrb[46].mxu0 %vm72_vm0, %v17654_v56 }
 0x7a5   :  { %14283 = vmatprep.mubr.msk.f32.mxu0 %vm72_vm0, %v17658_v45 }
 0x7a8   :  { %14284 = vmatmul.mubr.msk.f32.gmra.mrb[48].mxu0 %vm72_vm0, %v17662_v60 }
 0x7a9   :  { %14286 = vmatprep.mubr.msk.f32.mxu0 %vm72_vm0, %v17668_v50 }
 0x7ac   :  { %14287 = vmatmul.mubr.msk.f32.gmra.mrb[50].mxu0 %vm72_vm0, %v17766_v32 }
 0x7ad   :  { %14297 = vmatprep.mubr.msk.f32.mxu0 %vm72_vm0, %v17518_v53  ;;  %v17784_v53 = vld [vmem:[#allocation2 + $0x81] sm:$0xff] }
 0x7b0   :  { %14298 = vmatmul.mubr.msk.f32.vlgmr.msra.gmra.mrb[36].mxu0 %vm72_vm0, %v17525_v37 }
 0x7b1   :  { %14300 = vmatprep.mubr.msk.f32.mxu0 %vm72_vm0, %v17535_v19  ;;  %15319 = vmatpush3.bf16.msra.mxu0 %v15316_v20  ;;  %v15332_v20 = vpack.c.bf16 %v6486_v63, %v6485_v5 }
 0x7b2   :  { %15321 = vmatprep.subr.bf16.mxu0 %v15320_v35 }
 0x7b4   :  { %14301 = vmatmul.mubr.msk.f32.gmra.mrb[38].mxu0 %vm72_vm0, %v17542_v21 }
 0x7b5   :  { %14303 = vmatprep.mubr.msk.f32.mxu0 %vm72_vm0, %v17550_v39  ;;  %15323 = vmatpush3.bf16.msra.mxu0 %v15320_v35 }
 0x7b6   :  { %15325 = vmatprep.subr.bf16.mxu0 %v15324_v57 }
 0x7b8   :  { %14304 = vmatmul.mubr.msk.f32.gmra.mrb[40].mxu0 %vm72_vm0, %v17557_v4 }
 0x7b9   :  { %14306 = vmatprep.mubr.msk.f32.mxu0 %vm72_vm0, %v17565_v52 }
 0x7bc   :  { %14307 = vmatmul.mubr.msk.f32.gmra.mrb[42].mxu0 %vm72_vm0, %v17784_v53 }
 0x7bd   :  { %14309 = vmatprep.mubr.msk.f32.mxu0 %vm72_vm0, %v17574_v7  ;;  %v6257_v7 = vld [vmem:[#allocation4 + $0x1f0] sm:$0xff] }
 0x7be   :  { %v15328_v38 = vpack.c.bf16 %v6258_v23, %v6257_v7  ;;  %v7429_v23 = vld [vmem:[#allocation6 + $0x160] sm:$0xff] }
 0x7c0   :  { %14310 = vmatmul.mubr.msk.f32.gmra.mrb[44].mxu0 %vm72_vm0, %v17579_v8 }
 0x7c1   :  { %14312 = vmatprep.mubr.msk.f32.mxu0 %vm72_vm0, %v17584_v54 }
 0x7c4   :  { %14313 = vmatmul.mubr.msk.f32.gmra.mrb[46].mxu0 %vm72_vm0, %v17589_v62 }
 0x7c5   :  { %14315 = vmatprep.mubr.msk.f32.mxu0 %vm72_vm0, %v17593_v10 }
 0x7c8   :  { %14316 = vmatmul.mubr.msk.f32.gmra.mrb[48].mxu0 %vm72_vm0, %v17597_v12 }
 0x7c9   :  { %14318 = vmatprep.mubr.msk.f32.mxu0 %vm72_vm0, %v17603_v33 }
 0x7cc   :  { %14319 = vmatmul.mubr.msk.f32.gmra.mrb[50].mxu0 %vm72_vm0, %v17802_v61 }
 0x7cd   :  { %14329 = vmatprep.mubr.msk.f32.mxu0 %vm72_vm0, %v17674_v59  ;;  %v17820_v59 = vld [vmem:[#allocation2 + $0x82] sm:$0xff] }
 0x7d0   :  { %14330 = vmatmul.mubr.msk.f32.vlgmr.msra.gmra.mrb[36].mxu0 %vm72_vm0, %v17678_v27 }
 0x7d1   :  { %14332 = vmatprep.mubr.msk.f32.mxu0 %vm72_vm0, %v17682_v17  ;;  %15327 = vmatpush3.bf16.msra.mxu0 %v15324_v57  ;;  %v15340_v57 = vpack.c.bf16 %v6716_v46, %v6715_v55 }
 0x7d2   :  { %15329 = vmatprep.subr.bf16.mxu0 %v15328_v38 }
 0x7d4   :  { %14333 = vmatmul.mubr.msk.f32.gmra.mrb[38].mxu0 %vm72_vm0, %v17686_v34 }
 0x7d5   :  { %14335 = vmatprep.mubr.msk.f32.mxu0 %vm72_vm0, %v17690_v36  ;;  %15331 = vmatpush3.bf16.msra.mxu0 %v15328_v38 }
 0x7d6   :  { %15333 = vmatprep.subr.bf16.mxu0 %v15332_v20 }
 0x7d8   :  { %14336 = vmatmul.mubr.msk.f32.gmra.mrb[40].mxu0 %vm72_vm0, %v17694_v18 }
 0x7d9   :  { %14338 = vmatprep.mubr.msk.f32.mxu0 %vm72_vm0, %v17700_v43 }
 0x7dc   :  { %14339 = vmatmul.mubr.msk.f32.gmra.mrb[42].mxu0 %vm72_vm0, %v17820_v59 }
 0x7dd   :  { %14341 = vmatprep.mubr.msk.f32.mxu0 %vm72_vm0, %v17706_v48  ;;  %v6487_v48 = vld [vmem:[#allocation4 + $0x210] sm:$0xff] }
 0x7de   :  { %v15336_v35 = vpack.c.bf16 %v6488_v2, %v6487_v48 }
 0x7e0   :  { %14342 = vmatmul.mubr.msk.f32.gmra.mrb[44].mxu0 %vm72_vm0, %v17710_v3 }
 0x7e1   :  { %14344 = vmatprep.mubr.msk.f32.mxu0 %vm72_vm0, %v17714_v6 }
 0x7e4   :  { %14345 = vmatmul.mubr.msk.f32.gmra.mrb[46].mxu0 %vm72_vm0, %v17718_v42 }
 0x7e5   :  { %14347 = vmatprep.mubr.msk.f32.mxu0 %vm72_vm0, %v17722_v11 }
 0x7e8   :  { %14348 = vmatmul.mubr.msk.f32.gmra.mrb[48].mxu0 %vm72_vm0, %v17726_v40 }
 0x7e9   :  { %14350 = vmatprep.mubr.msk.f32.mxu0 %vm72_vm0, %v17730_v24 }
 0x7ec   :  { %14351 = vmatmul.mubr.msk.f32.gmra.mrb[50].mxu0 %vm72_vm0, %v17838_v47 }
 0x7ed   :  { %14361 = vmatprep.mubr.msk.f32.mxu0 %vm72_vm0, %v17613_v49  ;;  %v17856_v49 = vld [vmem:[#allocation2 + $0x90] sm:$0xff] }
 0x7f0   :  { %14362 = vmatmul.mubr.msk.f32.vlgmr.msra.gmra.mrb[36].mxu0 %vm72_vm0, %v17618_v58  ;;  %v17874_v58 = vld [vmem:[#allocation2 + $0x130] sm:$0xff] }
 0x7f1   :  { %14364 = vmatprep.mubr.msk.f32.mxu0 %vm72_vm0, %v17622_v14  ;;  %15335 = vmatpush3.bf16.msra.mxu0 %v15332_v20  ;;  %v6717_v14 = vld [vmem:[#allocation4 + $0x230] sm:$0xff]  ;;  %v17980_v20 = vpack.c.bf16 %v7430_v22, %v7429_v23 }
 0x7f2   :  { %15337 = vmatprep.subr.bf16.mxu0 %v15336_v35 }
 0x7f4   :  { %14365 = vmatmul.mubr.msk.f32.gmra.mrb[38].mxu0 %vm72_vm0, %v17626_v41  ;;  %v6718_v41 = vld [vmem:[#allocation4 + $0x238] sm:$0xff] }
 0x7f5   :  { %14367 = vmatprep.mubr.msk.f32.mxu0 %vm72_vm0, %v17630_v44  ;;  %15339 = vmatpush3.bf16.msra.mxu0 %v15336_v35  ;;  %v15344_v44 = vpack.c.bf16 %v6718_v41, %v6717_v14 }
 0x7f6   :  { %15341 = vmatprep.subr.bf16.mxu0 %v15340_v57 }
 0x7f8   :  { %14368 = vmatmul.mubr.msk.f32.gmra.mrb[40].mxu0 %vm72_vm0, %v17636_v15 }
 0x7f9   :  { %14370 = vmatprep.mubr.msk.f32.mxu0 %vm72_vm0, %v17748_v26 }
 0x7fc   :  { %14371 = vmatmul.mubr.msk.f32.gmra.mrb[42].mxu0 %vm72_vm0, %v17856_v49 }
 0x7fd   :  { %14373 = vmatprep.mubr.msk.f32.mxu0 %vm72_vm0, %v17646_v25 }
 0x800   :  { %14374 = vmatmul.mubr.msk.f32.gmra.mrb[44].mxu0 %vm72_vm0, %v17650_v30 }
 0x801   :  { %14376 = vmatprep.mubr.msk.f32.mxu0 %vm72_vm0, %v17654_v56 }
 0x804   :  { %14377 = vmatmul.mubr.msk.f32.gmra.mrb[46].mxu0 %vm72_vm0, %v17658_v45 }
 0x805   :  { %14379 = vmatprep.mubr.msk.f32.mxu0 %vm72_vm0, %v17662_v60 }
 0x808   :  { %14380 = vmatmul.mubr.msk.f32.gmra.mrb[48].mxu0 %vm72_vm0, %v17668_v50 }
 0x809   :  { %14382 = vmatprep.mubr.msk.f32.mxu0 %vm72_vm0, %v17766_v32 }
 0x80c   :  { %14383 = vmatmul.mubr.msk.f32.gmra.mrb[50].mxu0 %vm72_vm0, %v17874_v58 }
 0x80d   :  { %14393 = vmatprep.mubr.msk.f32.mxu0 %vm72_vm0, %v17525_v37  ;;  %v17893_v37 = vld [vmem:[#allocation2 + $0x91] sm:$0xff] }
 0x810   :  { %14394 = vmatmul.mubr.msk.f32.vlgmr.msra.gmra.mrb[36].mxu0 %vm72_vm0, %v17535_v19  ;;  %v17911_v19 = vld [vmem:[#allocation2 + $0x131] sm:$0xff] }
 0x811   :  { %14396 = vmatprep.mubr.msk.f32.mxu0 %vm72_vm0, %v17542_v21  ;;  %15343 = vmatpush3.bf16.msra.mxu0 %v15340_v57  ;;  %v17929_v21 = vld [vmem:[#allocation2 + $0x92] sm:$0xff] }
 0x812   :  { %15345 = vmatprep.subr.bf16.mxu0 %v15344_v44 }
 0x814   :  { %14397 = vmatmul.mubr.msk.f32.gmra.mrb[38].mxu0 %vm72_vm0, %v17550_v39  ;;  %v17947_v39 = vld [vmem:[#allocation2 + $0x132] sm:$0xff] }
 0x815   :  { %14399 = vmatprep.mubr.msk.f32.mxu0 %vm72_vm0, %v17557_v4  ;;  %15347 = vmatpush3.bf16.msra.mxu0 %v15344_v44  ;;  %v7024_v4 = vld [vmem:[#allocation6 + $0x150] sm:$0xff] }
 0x816   :  { %15420 = vmatprep.subr.bf16.mxu0 %v16234_v9 }
 0x818   :  { %14400 = vmatmul.mubr.msk.f32.gmra.mrb[40].mxu0 %vm72_vm0, %v17565_v52  ;;  %v7025_v52 = vld [vmem:[#allocation6 + $0x158] sm:$0xff] }
 0x819   :  { %14402 = vmatprep.mubr.msk.f32.mxu0 %vm72_vm0, %v17784_v53 }
 0x81c   :  { %14403 = vmatmul.mubr.msk.f32.gmra.mrb[42].mxu0 %vm72_vm0, %v17893_v37 }
 0x81d   :  { %14405 = vmatprep.mubr.msk.f32.mxu0 %vm72_vm0, %v17579_v8  ;;  %v15352_v8 = vpack.c.bf16 %v7025_v52, %v7024_v4 }
 0x81f   :  { %15353 = vmatprep.subr.bf16.mxu1 %v15352_v8 }
 0x820   :  { %14406 = vmatmul.mubr.msk.f32.gmra.mrb[44].mxu0 %vm72_vm0, %v17584_v54  ;;  %15355 = vmatpush3.bf16.msra.mxu1 %v15352_v8  ;;  %v7001_v54 = vld [vmem:[#allocation6 + $0x120] sm:$0xff] }
 0x821   :  { %14408 = vmatprep.mubr.msk.f32.mxu0 %vm72_vm0, %v17589_v62  ;;  %v7002_v62 = vld [vmem:[#allocation6 + $0x128] sm:$0xff] }
 0x824   :  { %14409 = vmatmul.mubr.msk.f32.gmra.mrb[46].mxu0 %vm72_vm0, %v17593_v10  ;;  %v15356_v10 = vpack.c.bf16 %v7002_v62, %v7001_v54 }
 0x825   :  { %14411 = vmatprep.mubr.msk.f32.mxu0 %vm72_vm0, %v17597_v12  ;;  %v17956_v12 = vld [vmem:[%s19201_s2 + $0x1] ss:$0 sm:$0xff] }
 0x826   :  { %15357 = vmatprep.subr.bf16.mxu1 %v15356_v10 }
 0x828   :  { %14412 = vmatmul.mubr.msk.f32.gmra.mrb[48].mxu0 %vm72_vm0, %v17603_v33 }
 0x829   :  { %14414 = vmatprep.mubr.msk.f32.mxu0 %vm72_vm0, %v17802_v61 }
 0x82c   :  { %14415 = vmatmul.mubr.msk.f32.gmra.mrb[50].mxu0 %vm72_vm0, %v17911_v19 }
 0x82d   :  { %14425 = vmatprep.mubr.msk.f32.mxu0 %vm72_vm0, %v17678_v27 }
 0x830   :  { %14426 = vmatmul.mubr.msk.f32.vlgmr.msra.gmra.mrb[36].mxu0 %vm72_vm0, %v17682_v17 }
 0x831   :  { %14428 = vmatprep.mubr.msk.f32.mxu0 %vm72_vm0, %v17686_v34 }
 0x834   :  { %14429 = vmatmul.mubr.msk.f32.gmra.mrb[38].mxu0 %vm72_vm0, %v17690_v36 }
 0x835   :  { %14431 = vmatprep.mubr.msk.f32.mxu0 %vm72_vm0, %v17694_v18 }
 0x838   :  { %14432 = vmatmul.mubr.msk.f32.gmra.mrb[40].mxu0 %vm72_vm0, %v17700_v43 }
 0x839   :  { %14434 = vmatprep.mubr.msk.f32.mxu0 %vm72_vm0, %v17820_v59 }
 0x83c   :  { %14435 = vmatmul.mubr.msk.f32.gmra.mrb[42].mxu0 %vm72_vm0, %v17929_v21 }
 0x83d   :  { %14437 = vmatprep.mubr.msk.f32.mxu0 %vm72_vm0, %v17710_v3 }
 0x840   :  { %14438 = vmatmul.mubr.msk.f32.gmra.mrb[44].mxu0 %vm72_vm0, %v17714_v6  ;;  %v7003_v6 = vld [vmem:[#allocation6 + $0x130] sm:$0xff] }
 0x841   :  { %14440 = vmatprep.mubr.msk.f32.mxu0 %vm72_vm0, %v17718_v42  ;;  %v7004_v42 = vld [vmem:[#allocation6 + $0x138] sm:$0xff] }
 0x842   :  { %v15360_v32 = vpack.c.bf16 %v7004_v42, %v7003_v6  ;;  %v7431_v42 = vld [vmem:[#allocation6 + $0x170] sm:$0xff] }
 0x844   :  { %14441 = vmatmul.mubr.msk.f32.gmra.mrb[46].mxu0 %vm72_vm0, %v17722_v11 }
 0x845   :  { %14443 = vmatprep.mubr.msk.f32.mxu0 %vm72_vm0, %v17726_v40 }
 0x848   :  { %14444 = vmatmul.mubr.msk.f32.gmra.mrb[48].mxu0 %vm72_vm0, %v17730_v24 }
 0x849   :  { %14446 = vmatprep.mubr.msk.f32.mxu0 %vm72_vm0, %v17838_v47 }
 0x84c   :  { %14447 = vmatmul.mubr.msk.f32.gmra.mrb[50].mxu0 %vm72_vm0, %v17947_v39 }
 0x84d   :  { %14769 = vmatprep.mubr.msk.f32.mxu0 %vm16235_vm2, %v16233_v0 }
 0x903   :  { %v14427_v33 = vpop.f32.mrb[36].mxu0 }
 0x904   :  { %v6935_v15 = vadd.f32 %v14427_v33, %v17956_v12  ;;  %v6833_v25 = vpop.f32.mrb[37].mxu0 }
 0x905   :  { %v6934_v30 = vadd.f32 %v17956_v12, %v6833_v25 }
 0x906   :  { %v6951_v56 = vmax.f32 %v6935_v15, 0.0 }
 0x907   :  { %v6950_v45 = vmax.f32 %v6934_v30, 0.0  ;;  %v14430_v60 = vpop.f32.mrb[38].mxu0 }
 0x908   :  { %6969 = vst.msk [vmem:[#allocation2 + $0x21] sm:$0xff] %vm72_vm0, %v6951_v56  ;;  %v6937_v50 = vadd.f32 %v14430_v60, %v17956_v12  ;;  %v6843_v27 = vpop.f32.mrb[39].mxu0 }
 0x909   :  { %6968 = vst.msk [vmem:[#allocation2 + $0x11] sm:$0xff] %vm72_vm0, %v6950_v45  ;;  %v6936_v17 = vadd.f32 %v17956_v12, %v6843_v27 }
 0x90a   :  { %v6953_v34 = vmax.f32 %v6937_v50, 0.0 }
 0x90b   :  { %v6952_v36 = vmax.f32 %v6936_v17, 0.0  ;;  %v14433_v18 = vpop.f32.mrb[40].mxu0 }
 0x90c   :  { %6971 = vst.msk [vmem:[#allocation2 + $0x41] sm:$0xff] %vm72_vm0, %v6953_v34  ;;  %v6939_v43 = vadd.f32 %v14433_v18, %v17956_v12  ;;  %v6853_v3 = vpop.f32.mrb[41].mxu0 }
 0x90d   :  { %6970 = vst.msk [vmem:[#allocation2 + $0x31] sm:$0xff] %vm72_vm0, %v6952_v36  ;;  %v6938_v11 = vadd.f32 %v17956_v12, %v6853_v3 }
 0x90e   :  { %v6955_v40 = vmax.f32 %v6939_v43, 0.0 }
 0x90f   :  { %v6954_v24 = vmax.f32 %v6938_v11, 0.0  ;;  %v14436_v26 = vpop.f32.mrb[42].mxu0  ;;  %v17976_v29 = vld [vmem:[#allocation2 + $0x21] sm:$0xff]  ;;  %v7432_v11 = vld [vmem:[#allocation6 + $0x178] sm:$0xff] }
 0x910   :  { %6973 = vst.msk [vmem:[#allocation2 + $0x61] sm:$0xff] %vm72_vm0, %v6955_v40  ;;  %v6941_v53 = vadd.f32 %v14436_v26, %v17956_v12  ;;  %v6863_v61 = vpop.f32.mrb[43].mxu0  ;;  %v17970_v7 = vld [vmem:[#allocation2 + $0x11] sm:$0xff]  ;;  %v15368_v40 = vpack.c.bf16 %v7432_v11, %v7431_v42  ;;  %v7659_v26 = vld [vmem:[#allocation6 + $0x180] sm:$0xff] }
 0x911   :  { %6972 = vst.msk [vmem:[#allocation2 + $0x51] sm:$0xff] %vm72_vm0, %v6954_v24  ;;  %v6940_v28 = vadd.f32 %v17956_v12, %v6863_v61  ;;  %14458 = vmatmul.mubr.msk.f32.vlgmr.msra.gmra.mrb[34].mxu1 %vm72_vm0, %v17970_v7  ;;  %v18053_v24 = vld [vmem:[#allocation2 + $0x10] sm:$0xff]  ;;  %v8119_v11 = vld [vmem:[#allocation6 + $0x1c0] sm:$0xff] }
 0x912   :  { %v6957_v38 = vmax.f32 %v6941_v53, 0.0  ;;  %14460 = vmatprep.mubr.msk.f32.mxu1 %vm72_vm0, %v17976_v29  ;;  %15359 = vmatpush3.bf16.msra.mxu1 %v15356_v10  ;;  %v18057_v53 = vld [vmem:[#allocation2 + $0x20] sm:$0xff] }
 0x913   :  { %v6956_v5 = vmax.f32 %v6940_v28, 0.0  ;;  %v14439_v63 = vpop.f32.mrb[44].mxu0  ;;  %15361 = vmatprep.subr.bf16.mxu1 %v15360_v32  ;;  %v17990_v35 = vld [vmem:[#allocation2 + $0x41] sm:$0xff] }
 0x914   :  { %6975 = vst.msk [vmem:[#allocation2 + $0x81] sm:$0xff] %vm72_vm0, %v6957_v38  ;;  %v6943_v59 = vadd.f32 %v14439_v63, %v17956_v12  ;;  %v6873_v47 = vpop.f32.mrb[45].mxu0  ;;  %v17984_v48 = vld [vmem:[#allocation2 + $0x31] sm:$0xff] }
 0x915   :  { %6974 = vst.msk [vmem:[#allocation2 + $0x71] sm:$0xff] %vm72_vm0, %v6956_v5  ;;  %v6942_v2 = vadd.f32 %v17956_v12, %v6873_v47  ;;  %14461 = vmatmul.mubr.msk.f32.gmra.mrb[36].mxu1 %vm72_vm0, %v17984_v48  ;;  %v18062_v23 = vld [vmem:[#allocation2 + $0x30] sm:$0xff] }
 0x916   :  { %v6959_v55 = vmax.f32 %v6943_v59, 0.0  ;;  %14463 = vmatprep.mubr.msk.f32.mxu1 %vm72_vm0, %v17990_v35  ;;  %15363 = vmatpush3.bf16.msra.mxu1 %v15360_v32  ;;  %v7660_v32 = vld [vmem:[#allocation6 + $0x188] sm:$0xff] }
 0x917   :  { %v6958_v46 = vmax.f32 %v6942_v2, 0.0  ;;  %v14442_v57 = vpop.f32.mrb[46].mxu0  ;;  %15365 = vmatprep.subr.bf16.mxu1 %v17980_v20  ;;  %v18003_v52 = vld [vmem:[#allocation2 + $0x61] sm:$0xff]  ;;  %v15372_v61 = vpack.c.bf16 %v7660_v32, %v7659_v26 }
 0x918   :  { %6977 = vst.msk [vmem:[#allocation2 + $0xc1] sm:$0xff] %vm72_vm0, %v6959_v55  ;;  %v6945_v14 = vadd.f32 %v14442_v57, %v17956_v12  ;;  %v6883_v41 = vpop.f32.mrb[47].mxu0  ;;  %v17997_v44 = vld [vmem:[#allocation2 + $0x51] sm:$0xff]  ;;  %v18074_v28 = vld [vmem:[#allocation2 + $0x60] sm:$0xff] }
 0x919   :  { %6976 = vst.msk [vmem:[#allocation2 + $0xb1] sm:$0xff] %vm72_vm0, %v6958_v46  ;;  %v6944_v4 = vadd.f32 %v17956_v12, %v6883_v41  ;;  %14464 = vmatmul.mubr.msk.f32.gmra.mrb[38].mxu1 %vm72_vm0, %v17997_v44  ;;  %v18070_v22 = vld [vmem:[#allocation2 + $0x50] sm:$0xff]  ;;  %v7662_v46 = vld [vmem:[#allocation6 + $0x198] sm:$0xff]  ;;  %v7889_v41 = vld [vmem:[#allocation6 + $0x1a0] sm:$0xff] }
 0x91a   :  { %v6961_v8 = vmax.f32 %v6945_v14, 0.0  ;;  %14466 = vmatprep.mubr.msk.f32.mxu1 %vm72_vm0, %v18003_v52  ;;  %v7661_v55 = vld [vmem:[#allocation6 + $0x190] sm:$0xff] }
 0x91b   :  { %v6960_v54 = vmax.f32 %v6944_v4, 0.0  ;;  %v14445_v62 = vpop.f32.mrb[48].mxu0  ;;  %v15376_v57 = vpack.c.bf16 %v7662_v46, %v7661_v55  ;;  %v18114_v14 = vld [vmem:[#allocation2 + $0x12] sm:$0xff]  ;;  %v7890_v4 = vld [vmem:[#allocation6 + $0x1a8] sm:$0xff]  ;;  %v8349_v46 = vld [vmem:[#allocation6 + $0x1e0] sm:$0xff] }
 0x91c   :  { %6979 = vst.msk [vmem:[#allocation2 + $0xe1] sm:$0xff] %vm72_vm0, %v6961_v8  ;;  %v6947_v10 = vadd.f32 %v14445_v62, %v17956_v12  ;;  %v6893_v33 = vpop.f32.mrb[49].mxu0  ;;  %v18009_v15 = vld [vmem:[#allocation2 + $0x71] sm:$0xff]  ;;  %v18118_v8 = vld [vmem:[#allocation2 + $0x22] sm:$0xff] }
 0x91d   :  { %6978 = vst.msk [vmem:[#allocation2 + $0xd1] sm:$0xff] %vm72_vm0, %v6960_v54  ;;  %v6946_v25 = vadd.f32 %v17956_v12, %v6893_v33  ;;  %14467 = vmatmul.mubr.msk.f32.gmra.mrb[40].mxu1 %vm72_vm0, %v18009_v15  ;;  %v18078_v38 = vld [vmem:[#allocation2 + $0x70] sm:$0xff]  ;;  %v15380_v54 = vpack.c.bf16 %v7890_v4, %v7889_v41  ;;  %v18134_v33 = vld [vmem:[#allocation2 + $0x62] sm:$0xff] }
 0x91e   :  { %v6963_v30 = vmax.f32 %v6947_v10, 0.0  ;;  %14469 = vmatprep.mubr.msk.f32.mxu1 %vm72_vm0, %v17561_v16  ;;  %v18122_v62 = vld [vmem:[#allocation2 + $0x32] sm:$0xff] }
 0x91f   :  { %v6962_v56 = vmax.f32 %v6946_v25, 0.0  ;;  %v14448_v45 = vpop.f32.mrb[50].mxu0  ;;  %v18025_v34 = vld [vmem:[#allocation2 + $0xc1] sm:$0xff]  ;;  %v18130_v10 = vld [vmem:[#allocation2 + $0x52] sm:$0xff] }
 0x920   :  { %6981 = vst.msk [vmem:[#allocation2 + $0x101] sm:$0xff] %vm72_vm0, %v6963_v30  ;;  %v6949_v60 = vadd.f32 %v14448_v45, %v17956_v12  ;;  %v6903_v50 = vpop.f32.mrb[51].mxu0  ;;  %v18019_v27 = vld [vmem:[#allocation2 + $0xb1] sm:$0xff]  ;;  %v18088_v63 = vld [vmem:[#allocation2 + $0xc0] sm:$0xff] }
 0x921   :  { %6980 = vst.msk [vmem:[#allocation2 + $0xf1] sm:$0xff] %vm72_vm0, %v6962_v56  ;;  %v6948_v17 = vadd.f32 %v17956_v12, %v6903_v50  ;;  %14470 = vmatmul.mubr.msk.f32.gmra.mrb[42].mxu1 %vm72_vm0, %v18019_v27  ;;  %v18084_v5 = vld [vmem:[#allocation2 + $0xb0] sm:$0xff]  ;;  %v18148_v56 = vld [vmem:[#allocation2 + $0xc2] sm:$0xff] }
 0x922   :  { %v6965_v36 = vmax.f32 %v6949_v60, 0.0  ;;  %14472 = vmatprep.mubr.msk.f32.mxu1 %vm72_vm0, %v18025_v34  ;;  %v18138_v25 = vld [vmem:[#allocation2 + $0x72] sm:$0xff] }
 0x923   :  { %v6964_v16 = vmax.f32 %v6948_v17, 0.0  ;;  %v18035_v12 = vld [vmem:[#allocation2 + $0xe1] sm:$0xff]  ;;  %v18144_v30 = vld [vmem:[#allocation2 + $0xb2] sm:$0xff] }
 0x924   :  { %6983 = vst.msk [vmem:[#allocation2 + $0x121] sm:$0xff] %vm72_vm0, %v6965_v36  ;;  %v18030_v18 = vld [vmem:[#allocation2 + $0xd1] sm:$0xff]  ;;  %v18096_v59 = vld [vmem:[#allocation2 + $0xe0] sm:$0xff] }
 0x925   :  { %6982 = vst.msk [vmem:[#allocation2 + $0x111] sm:$0xff] %vm72_vm0, %v6964_v16  ;;  %14473 = vmatmul.mubr.msk.f32.gmra.mrb[44].mxu1 %vm72_vm0, %v18030_v18  ;;  %v18152_v45 = vld [vmem:[#allocation2 + $0xd2] sm:$0xff]  ;;  %v18156_v60 = vld [vmem:[#allocation2 + $0xe2] sm:$0xff] }
 0x926   :  { %14475 = vmatprep.mubr.msk.f32.mxu1 %vm72_vm0, %v18035_v12  ;;  %v7891_v36 = vld [vmem:[#allocation6 + $0x1b0] sm:$0xff]  ;;  %v7892_v16 = vld [vmem:[#allocation6 + $0x1b8] sm:$0xff] }
 0x927   :  { %v18043_v3 = vld [vmem:[#allocation2 + $0x101] sm:$0xff]  ;;  %v15384_v42 = vpack.c.bf16 %v7892_v16, %v7891_v36 }
 0x928   :  { %v18039_v43 = vld [vmem:[#allocation2 + $0xf1] sm:$0xff]  ;;  %v18104_v47 = vld [vmem:[#allocation2 + $0x100] sm:$0xff] }
 0x929   :  { %14476 = vmatmul.mubr.msk.f32.gmra.mrb[46].mxu1 %vm72_vm0, %v18039_v43  ;;  %v18164_v50 = vld [vmem:[#allocation2 + $0x102] sm:$0xff] }
 0x92a   :  { %14478 = vmatprep.mubr.msk.f32.mxu1 %vm72_vm0, %v18043_v3  ;;  %v8579_v16 = vld [vmem:[#allocation6 + $0x200] sm:$0xff] }
 0x92b   :  { %v18204_v32 = vld [vmem:[#allocation2 + $0x120] sm:$0xff] }
 0x92c   :  { %v18047_v6 = vld [vmem:[#allocation2 + $0x111] sm:$0xff]  ;;  %v18240_v4 = vld [vmem:[#allocation2 + $0x121] sm:$0xff] }
 0x92d   :  { %14479 = vmatmul.mubr.msk.f32.gmra.mrb[48].mxu1 %vm72_vm0, %v18047_v6  ;;  %v18108_v2 = vld [vmem:[#allocation2 + $0x110] sm:$0xff] }
 0x92e   :  { %14489 = vmatprep.mubr.msk.f32.mxu1 %vm72_vm0, %v17601_v51  ;;  %v18066_v51 = vld [vmem:[#allocation2 + $0x40] sm:$0xff]  ;;  %v18168_v17 = vld [vmem:[#allocation2 + $0x112] sm:$0xff] }
 0x931   :  { %14490 = vmatmul.mubr.msk.f32.vlgmr.msra.gmra.mrb[34].mxu1 %vm72_vm0, %v18053_v24 }
 0x932   :  { %14492 = vmatprep.mubr.msk.f32.mxu1 %vm72_vm0, %v18057_v53  ;;  %15367 = vmatpush3.bf16.msra.mxu1 %v17980_v20  ;;  %v18092_v20 = vld [vmem:[#allocation2 + $0xd0] sm:$0xff] }
 0x933   :  { %15369 = vmatprep.subr.bf16.mxu1 %v15368_v40 }
 0x935   :  { %14493 = vmatmul.mubr.msk.f32.gmra.mrb[36].mxu1 %vm72_vm0, %v18062_v23 }
 0x936   :  { %14495 = vmatprep.mubr.msk.f32.mxu1 %vm72_vm0, %v18066_v51  ;;  %15371 = vmatpush3.bf16.msra.mxu1 %v15368_v40  ;;  %v8120_v40 = vld [vmem:[#allocation6 + $0x1c8] sm:$0xff] }
 0x937   :  { %15373 = vmatprep.subr.bf16.mxu1 %v15372_v61  ;;  %v15388_v26 = vpack.c.bf16 %v8120_v40, %v8119_v11  ;;  %v18276_v40 = vld [vmem:[#allocation2 + $0x122] sm:$0xff] }
 0x939   :  { %14496 = vmatmul.mubr.msk.f32.gmra.mrb[38].mxu1 %vm72_vm0, %v18070_v22 }
 0x93a   :  { %14498 = vmatprep.mubr.msk.f32.mxu1 %vm72_vm0, %v18074_v28 }
 0x93d   :  { %14499 = vmatmul.mubr.msk.f32.gmra.mrb[40].mxu1 %vm72_vm0, %v18078_v38 }
 0x93e   :  { %14501 = vmatprep.mubr.msk.f32.mxu1 %vm72_vm0, %v17634_v13  ;;  %v18100_v13 = vld [vmem:[#allocation2 + $0xf0] sm:$0xff] }
 0x941   :  { %14502 = vmatmul.mubr.msk.f32.gmra.mrb[42].mxu1 %vm72_vm0, %v18084_v5 }
 0x942   :  { %14504 = vmatprep.mubr.msk.f32.mxu1 %vm72_vm0, %v18088_v63 }
 0x945   :  { %14505 = vmatmul.mubr.msk.f32.gmra.mrb[44].mxu1 %vm72_vm0, %v18092_v20 }
 0x946   :  { %14507 = vmatprep.mubr.msk.f32.mxu1 %vm72_vm0, %v18096_v59 }
 0x949   :  { %14508 = vmatmul.mubr.msk.f32.gmra.mrb[46].mxu1 %vm72_vm0, %v18100_v13 }
 0x94a   :  { %14510 = vmatprep.mubr.msk.f32.mxu1 %vm72_vm0, %v18104_v47 }
 0x94d   :  { %14511 = vmatmul.mubr.msk.f32.gmra.mrb[48].mxu1 %vm72_vm0, %v18108_v2 }
 0x94e   :  { %14521 = vmatprep.mubr.msk.f32.mxu1 %vm72_vm0, %v17666_v1  ;;  %v18126_v1 = vld [vmem:[#allocation2 + $0x42] sm:$0xff] }
 0x951   :  { %14522 = vmatmul.mubr.msk.f32.vlgmr.msra.gmra.mrb[34].mxu1 %vm72_vm0, %v18114_v14 }
 0x952   :  { %14524 = vmatprep.mubr.msk.f32.mxu1 %vm72_vm0, %v18118_v8  ;;  %15375 = vmatpush3.bf16.msra.mxu1 %v15372_v61  ;;  %v8121_v61 = vld [vmem:[#allocation6 + $0x1d0] sm:$0xff] }
 0x953   :  { %15377 = vmatprep.subr.bf16.mxu1 %v15376_v57 }
 0x955   :  { %14525 = vmatmul.mubr.msk.f32.gmra.mrb[36].mxu1 %vm72_vm0, %v18122_v62 }
 0x956   :  { %14527 = vmatprep.mubr.msk.f32.mxu1 %vm72_vm0, %v18126_v1  ;;  %15379 = vmatpush3.bf16.msra.mxu1 %v15376_v57  ;;  %v8350_v57 = vld [vmem:[#allocation6 + $0x1e8] sm:$0xff] }
 0x957   :  { %15381 = vmatprep.subr.bf16.mxu1 %v15380_v54  ;;  %v15396_v41 = vpack.c.bf16 %v8350_v57, %v8349_v46  ;;  %v12321_v57 = vld [vmem:[%s19204_s5 + $0x28] sm:$0xff] }
 0x959   :  { %14528 = vmatmul.mubr.msk.f32.gmra.mrb[38].mxu1 %vm72_vm0, %v18130_v10 }
 0x95a   :  { %14530 = vmatprep.mubr.msk.f32.mxu1 %vm72_vm0, %v18134_v33 }
 0x95d   :  { %14531 = vmatmul.mubr.msk.f32.gmra.mrb[40].mxu1 %vm72_vm0, %v18138_v25 }
 0x95e   :  { %14533 = vmatprep.mubr.msk.f32.mxu1 %vm72_vm0, %v17698_v31  ;;  %v18160_v31 = vld [vmem:[#allocation2 + $0xf2] sm:$0xff] }
 0x961   :  { %14534 = vmatmul.mubr.msk.f32.gmra.mrb[42].mxu1 %vm72_vm0, %v18144_v30 }
 0x962   :  { %14536 = vmatprep.mubr.msk.f32.mxu1 %vm72_vm0, %v18148_v56 }
 0x965   :  { %14537 = vmatmul.mubr.msk.f32.gmra.mrb[44].mxu1 %vm72_vm0, %v18152_v45 }
 0x966   :  { %14539 = vmatprep.mubr.msk.f32.mxu1 %vm72_vm0, %v18156_v60 }
 0x969   :  { %14540 = vmatmul.mubr.msk.f32.gmra.mrb[46].mxu1 %vm72_vm0, %v18160_v31 }
 0x96a   :  { %14542 = vmatprep.mubr.msk.f32.mxu1 %vm72_vm0, %v18164_v50 }
 0x96d   :  { %14543 = vmatmul.mubr.msk.f32.gmra.mrb[48].mxu1 %vm72_vm0, %v18168_v17 }
 0x96e   :  { %14553 = vmatprep.mubr.msk.f32.mxu1 %vm72_vm0, %v18053_v24  ;;  %v18186_v24 = vld [vmem:[#allocation2 + $0x80] sm:$0xff] }
 0x971   :  { %14554 = vmatmul.mubr.msk.f32.vlgmr.msra.gmra.mrb[34].mxu1 %vm72_vm0, %v18057_v53 }
 0x972   :  { %14556 = vmatprep.mubr.msk.f32.mxu1 %vm72_vm0, %v18062_v23  ;;  %15383 = vmatpush3.bf16.msra.mxu1 %v15380_v54  ;;  %v8352_v54 = vld [vmem:[#allocation6 + $0x1f8] sm:$0xff] }
 0x973   :  { %15385 = vmatprep.subr.bf16.mxu1 %v15384_v42 }
 0x975   :  { %14557 = vmatmul.mubr.msk.f32.gmra.mrb[36].mxu1 %vm72_vm0, %v18066_v51 }
 0x976   :  { %14559 = vmatprep.mubr.msk.f32.mxu1 %vm72_vm0, %v18070_v22  ;;  %15387 = vmatpush3.bf16.msra.mxu1 %v15384_v42  ;;  %v8580_v42 = vld [vmem:[#allocation6 + $0x208] sm:$0xff] }
 0x977   :  { %15389 = vmatprep.subr.bf16.mxu1 %v15388_v26  ;;  %v15404_v11 = vpack.c.bf16 %v8580_v42, %v8579_v16 }
 0x979   :  { %14560 = vmatmul.mubr.msk.f32.gmra.mrb[38].mxu1 %vm72_vm0, %v18074_v28 }
 0x97a   :  { %14562 = vmatprep.mubr.msk.f32.mxu1 %vm72_vm0, %v18078_v38 }
 0x97d   :  { %14563 = vmatmul.mubr.msk.f32.gmra.mrb[40].mxu1 %vm72_vm0, %v18186_v24 }
 0x97e   :  { %14565 = vmatprep.mubr.msk.f32.mxu1 %vm72_vm0, %v18084_v5  ;;  %v8122_v5 = vld [vmem:[#allocation6 + $0x1d8] sm:$0xff] }
 0x97f   :  { %v15392_v55 = vpack.c.bf16 %v8122_v5, %v8121_v61  ;;  %v8809_v5 = vld [vmem:[#allocation6 + $0x220] sm:$0xff] }
 0x981   :  { %14566 = vmatmul.mubr.msk.f32.gmra.mrb[42].mxu1 %vm72_vm0, %v18088_v63 }
 0x982   :  { %14568 = vmatprep.mubr.msk.f32.mxu1 %vm72_vm0, %v18092_v20 }
 0x985   :  { %14569 = vmatmul.mubr.msk.f32.gmra.mrb[44].mxu1 %vm72_vm0, %v18096_v59 }
 0x986   :  { %14571 = vmatprep.mubr.msk.f32.mxu1 %vm72_vm0, %v18100_v13 }
 0x989   :  { %14572 = vmatmul.mubr.msk.f32.gmra.mrb[46].mxu1 %vm72_vm0, %v18104_v47 }
 0x98a   :  { %14574 = vmatprep.mubr.msk.f32.mxu1 %vm72_vm0, %v18108_v2 }
 0x98d   :  { %14575 = vmatmul.mubr.msk.f32.gmra.mrb[48].mxu1 %vm72_vm0, %v18204_v32 }
 0x98e   :  { %14585 = vmatprep.mubr.msk.f32.mxu1 %vm72_vm0, %v17970_v7  ;;  %v18222_v7 = vld [vmem:[#allocation2 + $0x81] sm:$0xff] }
 0x991   :  { %14586 = vmatmul.mubr.msk.f32.vlgmr.msra.gmra.mrb[34].mxu1 %vm72_vm0, %v17976_v29 }
 0x992   :  { %14588 = vmatprep.mubr.msk.f32.mxu1 %vm72_vm0, %v17984_v48  ;;  %15391 = vmatpush3.bf16.msra.mxu1 %v15388_v26  ;;  %v8582_v26 = vld [vmem:[#allocation6 + $0x218] sm:$0xff] }
 0x993   :  { %15393 = vmatprep.subr.bf16.mxu1 %v15392_v55 }
 0x995   :  { %14589 = vmatmul.mubr.msk.f32.gmra.mrb[36].mxu1 %vm72_vm0, %v17990_v35 }
 0x996   :  { %14591 = vmatprep.mubr.msk.f32.mxu1 %vm72_vm0, %v17997_v44  ;;  %15395 = vmatpush3.bf16.msra.mxu1 %v15392_v55  ;;  %v8810_v55 = vld [vmem:[#allocation6 + $0x228] sm:$0xff] }
 0x997   :  { %15397 = vmatprep.subr.bf16.mxu1 %v15396_v41  ;;  %v15412_v46 = vpack.c.bf16 %v8810_v55, %v8809_v5  ;;  %v12350_v5 = vld [vmem:[%s19208_s9 + $0x28] sm:$0xff] }
 0x999   :  { %14592 = vmatmul.mubr.msk.f32.gmra.mrb[38].mxu1 %vm72_vm0, %v18003_v52 }
 0x99a   :  { %14594 = vmatprep.mubr.msk.f32.mxu1 %vm72_vm0, %v18009_v15 }
 0x99d   :  { %14595 = vmatmul.mubr.msk.f32.gmra.mrb[40].mxu1 %vm72_vm0, %v18222_v7 }
 0x99e   :  { %14597 = vmatprep.mubr.msk.f32.mxu1 %vm72_vm0, %v18019_v27  ;;  %v8351_v27 = vld [vmem:[#allocation6 + $0x1f0] sm:$0xff] }
 0x99f   :  { %v15400_v36 = vpack.c.bf16 %v8352_v54, %v8351_v27  ;;  %v12322_v27 = vld [vmem:[%s19204_s5 + $0x30] sm:$0xff]  ;;  %v12323_v54 = vld [vmem:[%s19204_s5 + $0x38] sm:$0xff] }
 0x9a1   :  { %14598 = vmatmul.mubr.msk.f32.gmra.mrb[42].mxu1 %vm72_vm0, %v18025_v34 }
 0x9a2   :  { %14600 = vmatprep.mubr.msk.f32.mxu1 %vm72_vm0, %v18030_v18 }
 0x9a5   :  { %14601 = vmatmul.mubr.msk.f32.gmra.mrb[44].mxu1 %vm72_vm0, %v18035_v12 }
 0x9a6   :  { %14603 = vmatprep.mubr.msk.f32.mxu1 %vm72_vm0, %v18039_v43 }
 0x9a9   :  { %14604 = vmatmul.mubr.msk.f32.gmra.mrb[46].mxu1 %vm72_vm0, %v18043_v3 }
 0x9aa   :  { %14606 = vmatprep.mubr.msk.f32.mxu1 %vm72_vm0, %v18047_v6 }
 0x9ad   :  { %14607 = vmatmul.mubr.msk.f32.gmra.mrb[48].mxu1 %vm72_vm0, %v18240_v4 }
 0x9ae   :  { %14617 = vmatprep.mubr.msk.f32.mxu1 %vm72_vm0, %v18114_v14  ;;  %v18258_v14 = vld [vmem:[#allocation2 + $0x82] sm:$0xff] }
 0x9b1   :  { %14618 = vmatmul.mubr.msk.f32.vlgmr.msra.gmra.mrb[34].mxu1 %vm72_vm0, %v18118_v8 }
 0x9b2   :  { %14620 = vmatprep.mubr.msk.f32.mxu1 %vm72_vm0, %v18122_v62  ;;  %15399 = vmatpush3.bf16.msra.mxu1 %v15396_v41 }
 0x9b3   :  { %15401 = vmatprep.subr.bf16.mxu1 %v15400_v36 }
 0x9b5   :  { %14621 = vmatmul.mubr.msk.f32.gmra.mrb[36].mxu1 %vm72_vm0, %v18126_v1 }
 0x9b6   :  { %14623 = vmatprep.mubr.msk.f32.mxu1 %vm72_vm0, %v18130_v10  ;;  %15403 = vmatpush3.bf16.msra.mxu1 %v15400_v36  ;;  %v15448_v36 = vpack.c.bf16 %v12323_v54, %v12322_v27  ;;  %v9523_v54 = vld [vmem:[#allocation3 + $0x8] sm:$0xff] }
 0x9b7   :  { %15405 = vmatprep.subr.bf16.mxu1 %v15404_v11 }
 0x9b9   :  { %14624 = vmatmul.mubr.msk.f32.gmra.mrb[38].mxu1 %vm72_vm0, %v18134_v33 }
 0x9ba   :  { %14626 = vmatprep.mubr.msk.f32.mxu1 %vm72_vm0, %v18138_v25 }
 0x9bd   :  { %14627 = vmatmul.mubr.msk.f32.gmra.mrb[40].mxu1 %vm72_vm0, %v18258_v14 }
 0x9be   :  { %14629 = vmatprep.mubr.msk.f32.mxu1 %vm72_vm0, %v18144_v30  ;;  %v8581_v30 = vld [vmem:[#allocation6 + $0x210] sm:$0xff] }
 0x9bf   :  { %v15408_v61 = vpack.c.bf16 %v8582_v26, %v8581_v30 }
 0x9c1   :  { %14630 = vmatmul.mubr.msk.f32.gmra.mrb[42].mxu1 %vm72_vm0, %v18148_v56 }
 0x9c2   :  { %14632 = vmatprep.mubr.msk.f32.mxu1 %vm72_vm0, %v18152_v45 }
 0x9c5   :  { %14633 = vmatmul.mubr.msk.f32.gmra.mrb[44].mxu1 %vm72_vm0, %v18156_v60 }
 0x9c6   :  { %14635 = vmatprep.mubr.msk.f32.mxu1 %vm72_vm0, %v18160_v31 }
 0x9c9   :  { %14636 = vmatmul.mubr.msk.f32.gmra.mrb[46].mxu1 %vm72_vm0, %v18164_v50 }
 0x9ca   :  { %14638 = vmatprep.mubr.msk.f32.mxu1 %vm72_vm0, %v18168_v17 }
 0x9cd   :  { %14639 = vmatmul.mubr.msk.f32.gmra.mrb[48].mxu1 %vm72_vm0, %v18276_v40 }
 0x9ce   :  { %14649 = vmatprep.mubr.msk.f32.mxu1 %vm72_vm0, %v18057_v53  ;;  %v8812_v53 = vld [vmem:[#allocation6 + $0x238] sm:$0xff] }
 0x9d1   :  { %14650 = vmatmul.mubr.msk.f32.vlgmr.msra.gmra.mrb[34].mxu1 %vm72_vm0, %v18062_v23 }
 0x9d2   :  { %14652 = vmatprep.mubr.msk.f32.mxu1 %vm72_vm0, %v18066_v51  ;;  %15407 = vmatpush3.bf16.msra.mxu1 %v15404_v11  ;;  %v12327_v11 = vld [vmem:[%s19206_s7 + $0x2] sm:$0x3] }
 0x9d3   :  { %15409 = vmatprep.subr.bf16.mxu1 %v15408_v61 }
 0x9d5   :  { %14653 = vmatmul.mubr.msk.f32.gmra.mrb[36].mxu1 %vm72_vm0, %v18070_v22 }
 0x9d6   :  { %14655 = vmatprep.mubr.msk.f32.mxu1 %vm72_vm0, %v18074_v28  ;;  %15411 = vmatpush3.bf16.msra.mxu1 %v15408_v61  ;;  %v12349_v61 = vld [vmem:[%s19208_s9 + $0x20] sm:$0xff] }
 0x9d7   :  { %15413 = vmatprep.subr.bf16.mxu1 %v15412_v46  ;;  %v15450_v55 = vpack.c.bf16 %v12350_v5, %v12349_v61 }
 0x9d9   :  { %14656 = vmatmul.mubr.msk.f32.gmra.mrb[38].mxu1 %vm72_vm0, %v18078_v38 }
 0x9da   :  { %14658 = vmatprep.mubr.msk.f32.mxu1 %vm72_vm0, %v18186_v24 }
 0x9dd   :  { %14659 = vmatmul.mubr.msk.f32.gmra.mrb[40].mxu1 %vm72_vm0, %v17856_v49  ;;  %v8811_v49 = vld [vmem:[#allocation6 + $0x230] sm:$0xff] }
 0x9de   :  { %14661 = vmatprep.mubr.msk.f32.mxu1 %vm72_vm0, %v18088_v63  ;;  %v15416_v23 = vpack.c.bf16 %v8812_v53, %v8811_v49 }
 0x9e1   :  { %14662 = vmatmul.mubr.msk.f32.gmra.mrb[42].mxu1 %vm72_vm0, %v18092_v20 }
 0x9e2   :  { %14664 = vmatprep.mubr.msk.f32.mxu1 %vm72_vm0, %v18096_v59 }
 0x9e5   :  { %14665 = vmatmul.mubr.msk.f32.gmra.mrb[44].mxu1 %vm72_vm0, %v18100_v13 }
 0x9e6   :  { %14667 = vmatprep.mubr.msk.f32.mxu1 %vm72_vm0, %v18104_v47 }
 0x9e9   :  { %14668 = vmatmul.mubr.msk.f32.gmra.mrb[46].mxu1 %vm72_vm0, %v18108_v2 }
 0x9ea   :  { %14670 = vmatprep.mubr.msk.f32.mxu1 %vm72_vm0, %v18204_v32  ;;  %v12320_v32 = vld [vmem:[%s19204_s5 + $0x20] sm:$0xff] }
 0x9ed   :  { %14671 = vmatmul.mubr.msk.f32.gmra.mrb[48].mxu1 %vm72_vm0, %v17874_v58  ;;  %v12319_v58 = vld [vmem:[%s19203_s4 + $0x1] ss:$0 sm:$0xff] }
 0x9ee   :  { %14681 = vmatprep.mubr.msk.f32.mxu1 %vm72_vm0, %v17976_v29 }
 0x9f1   :  { %14682 = vmatmul.mubr.msk.f32.vlgmr.msra.gmra.mrb[34].mxu1 %vm72_vm0, %v17984_v48 }
 0x9f2   :  { %14684 = vmatprep.mubr.msk.f32.mxu1 %vm72_vm0, %v17990_v35  ;;  %15415 = vmatpush3.bf16.msra.mxu1 %v15412_v46  ;;  %v12329_v46 = vld [vmem:[%s19207_s8 + $0x1] ss:$0 sm:$0xff] }
 0x9f3   :  { %15417 = vmatprep.subr.bf16.mxu1 %v15416_v23 }
 0x9f5   :  { %14685 = vmatmul.mubr.msk.f32.gmra.mrb[36].mxu1 %vm72_vm0, %v17997_v44 }
 0x9f6   :  { %14687 = vmatprep.mubr.msk.f32.mxu1 %vm72_vm0, %v18003_v52  ;;  %15419 = vmatpush3.bf16.msra.mxu1 %v15416_v23 }
 0x9f7   :  { %15522 = vmatprep.subr.bf16.mxu1 %v15450_v55 }
 0x9f9   :  { %14688 = vmatmul.mubr.msk.f32.gmra.mrb[38].mxu1 %vm72_vm0, %v18009_v15 }
 0x9fa   :  { %14690 = vmatprep.mubr.msk.f32.mxu1 %vm72_vm0, %v18222_v7  ;;  %v9044_v7 = vld [vmem:[%s19210_s11] sm:$0x3] }
 0x9fd   :  { %14691 = vmatmul.mubr.msk.f32.gmra.mrb[40].mxu1 %vm72_vm0, %v17893_v37 }
 0x9fe   :  { %14693 = vmatprep.mubr.msk.f32.mxu1 %vm72_vm0, %v18025_v34 }
 0xa01   :  { %14694 = vmatmul.mubr.msk.f32.gmra.mrb[42].mxu1 %vm72_vm0, %v18030_v18 }
 0xa02   :  { %14696 = vmatprep.mubr.msk.f32.mxu1 %vm72_vm0, %v18035_v12 }
 0xa05   :  { %14697 = vmatmul.mubr.msk.f32.gmra.mrb[44].mxu1 %vm72_vm0, %v18039_v43 }
 0xa06   :  { %14699 = vmatprep.mubr.msk.f32.mxu1 %vm72_vm0, %v18043_v3 }
 0xa09   :  { %14700 = vmatmul.mubr.msk.f32.gmra.mrb[46].mxu1 %vm72_vm0, %v18047_v6 }
 0xa0a   :  { %14702 = vmatprep.mubr.msk.f32.mxu1 %vm72_vm0, %v18240_v4  ;;  %v15445_v4 = vpack.c.bf16 %v12321_v57, %v12320_v32  ;;  %v9619_v32 = vld [vmem:[%s19208_s9] sm:$0xff]  ;;  %v9620_v57 = vld [vmem:[%s19208_s9 + $0x8] sm:$0xff] }
 0xa0d   :  { %14703 = vmatmul.mubr.msk.f32.gmra.mrb[48].mxu1 %vm72_vm0, %v17911_v19 }
 0xa0e   :  { %14713 = vmatprep.mubr.msk.f32.mxu1 %vm72_vm0, %v18118_v8 }
 0xa11   :  { %14714 = vmatmul.mubr.msk.f32.vlgmr.msra.gmra.mrb[34].mxu1 %vm72_vm0, %v18122_v62 }
 0xa12   :  { %14716 = vmatprep.mubr.msk.f32.mxu1 %vm72_vm0, %v18126_v1  ;;  %15524 = vmatpush3.bf16.msra.mxu1 %v15450_v55 }
 0xa15   :  { %14717 = vmatmul.mubr.msk.f32.gmra.mrb[36].mxu1 %vm72_vm0, %v18130_v10 }
 0xa16   :  { %14719 = vmatprep.mubr.msk.f32.mxu1 %vm72_vm0, %v18134_v33 }
 0xa19   :  { %14720 = vmatmul.mubr.msk.f32.gmra.mrb[38].mxu1 %vm72_vm0, %v18138_v25 }
 0xa1a   :  { %14722 = vmatprep.mubr.msk.f32.mxu1 %vm72_vm0, %v18258_v14 }
 0xa1d   :  { %14723 = vmatmul.mubr.msk.f32.gmra.mrb[40].mxu1 %vm72_vm0, %v17929_v21 }
 0xa1e   :  { %14725 = vmatprep.mubr.msk.f32.mxu1 %vm72_vm0, %v18148_v56 }
 0xa21   :  { %14726 = vmatmul.mubr.msk.f32.gmra.mrb[42].mxu1 %vm72_vm0, %v18152_v45 }
 0xa22   :  { %14728 = vmatprep.mubr.msk.f32.mxu1 %vm72_vm0, %v18156_v60 }
 0xa25   :  { %14729 = vmatmul.mubr.msk.f32.gmra.mrb[44].mxu1 %vm72_vm0, %v18160_v31 }
 0xa26   :  { %14731 = vmatprep.mubr.msk.f32.mxu1 %vm72_vm0, %v18164_v50 }
 0xa29   :  { %14732 = vmatmul.mubr.msk.f32.gmra.mrb[46].mxu1 %vm72_vm0, %v18168_v17 }
 0xa2a   :  { %14734 = vmatprep.mubr.msk.f32.mxu1 %vm72_vm0, %v18276_v40 }
 0xa2d   :  { %14735 = vmatmul.mubr.msk.f32.gmra.mrb[48].mxu1 %vm72_vm0, %v17947_v39 }
 0xae4   :  { %v14715_v37 = vpop.f32.mrb[34].mxu1 }
 0xae5   :  { %v18379_v19 = vadd.f32 %v14715_v37, %v12319_v58  ;;  %v8927_v21 = vpop.f32.mrb[35].mxu1 }
 0xae6   :  { %v18381_v29 = vadd.f32 %v12319_v58, %v8927_v21 }
 0xae8   :  { %v15421_v48 = vpack.c.bf16 %v18379_v19, %v18381_v29  ;;  %v14718_v35 = vpop.f32.mrb[36].mxu1 }
 0xae9   :  { %v18385_v44 = vadd.f32 %v14718_v35, %v12319_v58  ;;  %v8937_v52 = vpop.f32.mrb[37].mxu1 }
 0xaea   :  { %v18387_v15 = vadd.f32 %v12319_v58, %v8937_v52  ;;  %15422 = vmatpush3.bf16.msra.mxu0 %v15421_v48  ;;  %v9295_v52 = vld [vmem:[%s19211_s12 + $0x8] sm:$0xff] }
 0xaeb   :  { %15423 = vmatprep.subr.bf16.mxu0 %v16234_v9 }
 0xaec   :  { %v15424_v39 = vpack.c.bf16 %v18385_v44, %v18387_v15  ;;  %v14721_v34 = vpop.f32.mrb[38].mxu1 }
 0xaed   :  { %v18392_v18 = vadd.f32 %v14721_v34, %v12319_v58  ;;  %v8947_v12 = vpop.f32.mrb[39].mxu1  ;;  %v9297_v34 = vld [vmem:[%s19211_s12 + $0x18] sm:$0xff] }
 0xaee   :  { %v18394_v43 = vadd.f32 %v12319_v58, %v8947_v12  ;;  %15425 = vmatpush3.bf16.msra.mxu0 %v15424_v39  ;;  %v9296_v39 = vld [vmem:[%s19211_s12 + $0x10] sm:$0xff]  ;;  %v9298_v12 = vld [vmem:[%s19211_s12 + $0x20] sm:$0xff] }
 0xaef   :  { %15426 = vmatprep.subr.bf16.mxu0 %v16234_v9 }
 0xaf0   :  { %v15427_v3 = vpack.c.bf16 %v18392_v18, %v18394_v43  ;;  %v14724_v6 = vpop.f32.mrb[40].mxu1 }
 0xaf1   :  { %v18399_v51 = vadd.f32 %v14724_v6, %v12319_v58  ;;  %v8957_v22 = vpop.f32.mrb[41].mxu1  ;;  %v9300_v6 = vld [vmem:[%s19211_s12 + $0x30] sm:$0xff] }
 0xaf2   :  { %v18401_v28 = vadd.f32 %v12319_v58, %v8957_v22  ;;  %15428 = vmatpush3.bf16.msra.mxu0 %v15427_v3  ;;  %v9299_v3 = vld [vmem:[%s19211_s12 + $0x28] sm:$0xff]  ;;  %v9301_v22 = vld [vmem:[%s19211_s12 + $0x38] sm:$0xff] }
 0xaf3   :  { %15429 = vmatprep.subr.bf16.mxu0 %v16234_v9 }
 0xaf4   :  { %v15430_v38 = vpack.c.bf16 %v18399_v51, %v18401_v28  ;;  %v14727_v63 = vpop.f32.mrb[42].mxu1 }
 0xaf5   :  { %v18406_v20 = vadd.f32 %v14727_v63, %v12319_v58  ;;  %v8967_v59 = vpop.f32.mrb[43].mxu1  ;;  %v9303_v63 = vld [vmem:[%s19211_s12 + $0x48] sm:$0xff] }
 0xaf6   :  { %v18408_v13 = vadd.f32 %v12319_v58, %v8967_v59  ;;  %15431 = vmatpush3.bf16.msra.mxu0 %v15430_v38  ;;  %v9302_v38 = vld [vmem:[%s19211_s12 + $0x40] sm:$0xff]  ;;  %v9304_v59 = vld [vmem:[%s19211_s12 + $0x50] sm:$0xff] }
 0xaf7   :  { %15432 = vmatprep.subr.bf16.mxu0 %v16234_v9 }
 0xaf8   :  { %v15433_v47 = vpack.c.bf16 %v18406_v20, %v18408_v13  ;;  %v14730_v2 = vpop.f32.mrb[44].mxu1 }
 0xaf9   :  { %v18413_v8 = vadd.f32 %v14730_v2, %v12319_v58  ;;  %v8977_v62 = vpop.f32.mrb[45].mxu1  ;;  %v9306_v2 = vld [vmem:[%s19211_s12 + $0x60] sm:$0xff] }
 0xafa   :  { %v18415_v1 = vadd.f32 %v12319_v58, %v8977_v62  ;;  %15434 = vmatpush3.bf16.msra.mxu0 %v15433_v47  ;;  %v9305_v47 = vld [vmem:[%s19211_s12 + $0x58] sm:$0xff]  ;;  %v9307_v62 = vld [vmem:[%s19211_s12 + $0x68] sm:$0xff] }
 0xafb   :  { %15435 = vmatprep.subr.bf16.mxu0 %v16234_v9 }
 0xafc   :  { %v15436_v10 = vpack.c.bf16 %v18413_v8, %v18415_v1  ;;  %v14733_v33 = vpop.f32.mrb[46].mxu1 }
 0xafd   :  { %v18420_v25 = vadd.f32 %v14733_v33, %v12319_v58  ;;  %v8987_v56 = vpop.f32.mrb[47].mxu1  ;;  %v9309_v33 = vld [vmem:[%s19211_s12 + $0x78] sm:$0xff] }
 0xafe   :  { %v18422_v45 = vadd.f32 %v12319_v58, %v8987_v56  ;;  %15437 = vmatpush3.bf16.msra.mxu0 %v15436_v10  ;;  %v9308_v10 = vld [vmem:[%s19211_s12 + $0x70] sm:$0xff] }
 0xaff   :  { %15438 = vmatprep.subr.bf16.mxu0 %v16234_v9  ;;  %v12351_v56 = vld [vmem:[%s19208_s9 + $0x30] sm:$0xff] }
 0xb00   :  { %v15439_v60 = vpack.c.bf16 %v18420_v25, %v18422_v45  ;;  %v14736_v31 = vpop.f32.mrb[48].mxu1 }
 0xb01   :  { %v18427_v50 = vadd.f32 %v14736_v31, %v12319_v58  ;;  %v8997_v17 = vpop.f32.mrb[49].mxu1 }
 0xb02   :  { %v18429_v24 = vadd.f32 %v12319_v58, %v8997_v17  ;;  %15440 = vmatpush3.bf16.msra.mxu0 %v15439_v60  ;;  %v12352_v60 = vld [vmem:[%s19208_s9 + $0x38] sm:$0xff]  ;;  %v9623_v17 = vld [vmem:[#allocation2 + $0x1] sm:$0xff] }
 0xb03   :  { %15441 = vmatprep.subr.bf16.mxu0 %v16234_v9  ;;  %v15454_v31 = vpack.c.bf16 %v12352_v60, %v12351_v56  ;;  %v9622_v60 = vld [vmem:[%s19208_s9 + $0x18] sm:$0xff] }
 0xb04   :  { %v15442_v41 = vpack.c.bf16 %v18427_v50, %v18429_v24 }
 0xb05   :  { %15523 = vmatprep.subr.bf16.mxu1 %v15454_v31 }
 0xb06   :  { %15443 = vmatpush3.bf16.msra.mxu0 %v15442_v41  ;;  %15525 = vmatpush3.bf16.msra.mxu1 %v15454_v31  ;;  %v18553_v41 = vpack.c.bf16 %v9620_v57, %v9619_v32  ;;  %v9532_v32 = vld [vmem:[#allocation3 + $0x50] sm:$0xff] }
 0xb07   :  { %15444 = vmatprep.subr.bf16.mxu0 %v16234_v9 }
 0xb08   :  { %15459 = vmatprep.subr.bf16.mxu1 %v18553_v41 }
 0xb09   :  { %14770 = vmatmul.mubr.f32.vlgmr.msra.gmra.mrb[52].mxu0 %v9044_v7 }
 0xb0a   :  { %15446 = vmatpush3.bf16.msra.mxu0 %v15445_v4  ;;  %14780 = vmatprep.mubr.msk.f32.mxu0 %vm16235_vm2, %v16233_v0 }
 0xb0b   :  { %15447 = vmatprep.subr.bf16.mxu0 %v16234_v9  ;;  %v12325_v9 = vld [vmem:[%s19205_s6 + $0x1] ss:$0 sm:$0xff] }
 0xb0e   :  { %15449 = vmatpush3.bf16.msra.mxu0 %v15448_v36 }
 0xb0f   :  { %14783 = vmatprep.subr.mxu0 %v16233_v0 }
 0xbdc   :  { %v9111_v16 = vpop.f32.mrb[52].mxu0 }
 0xbdd   :  { %v14771_v42 = vpop.f32.mrb[53].mxu0  ;;  %14781 = vmatmul.mubr.msk.f32.vlgmr.msra.gmra.mrb[54].mxu0 %vm72_vm0, %v9111_v16 }
 0xbde   :  { %14785 = vmatprep.mubr.msk.f32.mxu0 %vm16235_vm2, %v16233_v0  ;;  %14784 = vmatpush3.msk.msra.mxu0 %vm4500_vm3, %v12327_v11  ;;  %v9294_v0 = vld [vmem:[%s19211_s12] sm:$0xff] }
 0xbdf   :  { %v9522_v42 = vld [vmem:[#allocation3] sm:$0xff] }
 0xcb0   :  { %v9197_v14 = vpop.f32.mrb[54].mxu0 }
 0xcb1   :  { %v9198_v40 = vadd.f32 %v12325_v9, %v9197_v14  ;;  %v14782_v30 = vpop.f32.mrb[55].mxu0 }
 0xcb2   :  { %v9525_v30 = vld [vmem:[#allocation3 + $0x18] sm:$0xff] }
 0xcb3   :  { %v9201_v26 = vmax.f32 %v9198_v40, 0.0 }
 0xcb5   :  { %14786 = vmatmul.mubr.msk.f32.vlgmr.msra.gmra.mrb[56].mxu0 %vm4496_vm4, %v9201_v26 }
 0xcb6   :  { %14790 = vmatprep.mubr.msk.f32.mxu0 %vm4496_vm4, %v9294_v0 }
 0xd88   :  { %v9284_v49 = vpop.f32.mrb[56].mxu0 }
 0xd89   :  { %v9285_v53 = vadd.f32 %v12329_v46, %v9284_v49  ;;  %v14787_v23 = vpop.f32.mrb[57].mxu0  ;;  %v9527_v46 = vld [vmem:[#allocation3 + $0x28] sm:$0xff] }
 0xd8b   :  { %v9288_v58 = vsub.f32 0.0, %v9285_v53  ;;  %v9526_v53 = vld [vmem:[#allocation3 + $0x20] sm:$0xff] }
 0xd8d   :  { %v9289_v37 = vmul.f32 1.442695, %v9288_v58 }
 0xd8f   :  { %16177 = vpow2.f32 %v9289_v37 }
 0xd99   :  { %v16178_v21 = vpop.eup %16177 }
 0xd9a   :  { %v9291_v48 = vadd.f32 1.0, %v16178_v21 }
 0xd9c   :  { %16179 = vrcp.f32 %v9291_v48 }
 0xda6   :  { %v16180_v35 = vpop.eup %16179 }
 0xda7   :  { %14788 = vmatprep.subr.msk.mxu0 %vm4500_vm3, %v16180_v35 }
 0xda8   :  { %14789 = vmatpush3.msk.msra.mxu0 %vm4500_vm3, %v16180_v35 }
 0xda9   :  { %14791 = vmatmul.mubr.msk.f32.vlgmr.msra.gmra.mrb[58].mxu0 %vm4496_vm4, %v9295_v52  ;;  %15451 = vmatprep.subr.bf16.mxu0 %v15450_v55  ;;  %v9528_v52 = vld [vmem:[#allocation3 + $0x30] sm:$0xff] }
 0xdaa   :  { %14793 = vmatprep.mubr.msk.f32.mxu0 %vm4496_vm4, %v9296_v39  ;;  %15453 = vmatpush3.bf16.msra.mxu0 %v15450_v55 }
 0xdab   :  { %15455 = vmatprep.subr.bf16.mxu0 %v15454_v31 }
 0xdad   :  { %14794 = vmatmul.mubr.msk.f32.gmra.mrb[60].mxu0 %vm4496_vm4, %v9297_v34 }
 0xdae   :  { %14796 = vmatprep.mubr.msk.f32.mxu0 %vm4496_vm4, %v9298_v12  ;;  %15457 = vmatpush3.bf16.msra.mxu0 %v15454_v31  ;;  %v9533_v31 = vld [vmem:[#allocation3 + $0x58] sm:$0xff] }
 0xdb1   :  { %14797 = vmatmul.mubr.msk.f32.gmra.mrb[62].mxu0 %vm4496_vm4, %v9299_v3 }
 0xdb2   :  { %14799 = vmatprep.mubr.msk.f32.mxu0 %vm4496_vm4, %v9300_v6 }
 0xdb5   :  { %14800 = vmatmul.mubr.msk.f32.gmra.mrb[64].mxu0 %vm4496_vm4, %v9301_v22  ;;  %v9531_v22 = vld [vmem:[#allocation3 + $0x48] sm:$0xff] }
 0xdb6   :  { %14802 = vmatprep.mubr.msk.f32.mxu0 %vm4496_vm4, %v9302_v38 }
 0xdb9   :  { %14803 = vmatmul.mubr.msk.f32.gmra.mrb[66].mxu0 %vm4496_vm4, %v9303_v63  ;;  %v9530_v63 = vld [vmem:[#allocation3 + $0x40] sm:$0xff] }
 0xdba   :  { %14805 = vmatprep.mubr.msk.f32.mxu0 %vm4496_vm4, %v9304_v59 }
 0xdbd   :  { %14806 = vmatmul.mubr.msk.f32.gmra.mrb[68].mxu0 %vm4496_vm4, %v9305_v47 }
 0xdbe   :  { %14808 = vmatprep.mubr.msk.f32.mxu0 %vm4496_vm4, %v9306_v2 }
 0xdc1   :  { %14809 = vmatmul.mubr.msk.f32.gmra.mrb[70].mxu0 %vm4496_vm4, %v9307_v62 }
 0xdc2   :  { %14811 = vmatprep.mubr.msk.f32.mxu0 %vm4496_vm4, %v9308_v10  ;;  %v9621_v10 = vld [vmem:[%s19208_s9 + $0x10] sm:$0xff] }
 0xdc5   :  { %14812 = vmatmul.mubr.msk.f32.gmra.mrb[72].mxu0 %vm4496_vm4, %v9309_v33 }
 0xdc6   :  { %14822 = vmatprep.mubr.msk.f32.mxu0 %vm72_vm0, %v9623_v17 }
 0xe7c   :  { %v14792_v7 = vpop.f32.mrb[58].mxu0 }
 0xe7d   :  { %v9507_v4 = vmul.f32 %v14792_v7, %v18379_v19  ;;  %v9427_v27 = vpop.f32.mrb[59].mxu0  ;;  %v9524_v19 = vld [vmem:[#allocation3 + $0x10] sm:$0xff] }
 0xe7e   :  { %v9506_v36 = vmul.f32 %v9427_v27, %v18381_v29  ;;  %v15462_v27 = vpack.c.bf16 %v9622_v60, %v9621_v10  ;;  %v9611_v60 = vld [vmem:[#allocation2 + $0xa0] sm:$0xff] }
 0xe7f   :  { %v9539_v16 = vadd.f32 %v9523_v54, %v9507_v4  ;;  %v12385_v54 = vld [vmem:[%s19208_s9 + $0x40] sm:$0xff] }
 0xe80   :  { %v9538_v11 = vadd.f32 %v9522_v42, %v9506_v36  ;;  %v14795_v9 = vpop.f32.mrb[60].mxu0 }
 0xe81   :  { %9555 = vst.msk [vmem:[#allocation3 + $0x8] sm:$0xff] %vm72_vm0, %v9539_v16  ;;  %v9509_v14 = vmul.f32 %v14795_v9, %v18385_v44  ;;  %v9437_v40 = vpop.f32.mrb[61].mxu0  ;;  %v9535_v9 = vld [vmem:[#allocation3 + $0x68] sm:$0xff] }
 0xe82   :  { %9554 = vst.msk [vmem:[#allocation3] sm:$0xff] %vm72_vm0, %v9538_v11  ;;  %v9508_v26 = vmul.f32 %v9437_v40, %v18387_v15  ;;  %v12386_v11 = vld [vmem:[%s19208_s9 + $0x48] sm:$0xff] }
 0xe83   :  { %v9541_v0 = vadd.f32 %v9525_v30, %v9509_v14  ;;  %v9534_v30 = vld [vmem:[#allocation3 + $0x60] sm:$0xff] }
 0xe84   :  { %v9540_v61 = vadd.f32 %v9524_v19, %v9508_v26  ;;  %v14798_v5 = vpop.f32.mrb[62].mxu0 }
 0xe85   :  { %9557 = vst.msk [vmem:[#allocation3 + $0x18] sm:$0xff] %vm72_vm0, %v9541_v0  ;;  %v9511_v29 = vmul.f32 %v14798_v5, %v18392_v18  ;;  %v9447_v55 = vpop.f32.mrb[63].mxu0  ;;  %v9529_v18 = vld [vmem:[#allocation3 + $0x38] sm:$0xff] }
 0xe86   :  { %9556 = vst.msk [vmem:[#allocation3 + $0x10] sm:$0xff] %vm72_vm0, %v9540_v61  ;;  %v9510_v44 = vmul.f32 %v9447_v55, %v18394_v43  ;;  %v15466_v61 = vpack.c.bf16 %v12386_v11, %v12385_v54 }
 0xe87   :  { %v9543_v49 = vadd.f32 %v9527_v46, %v9511_v29 }
 0xe88   :  { %v9571_v23 = vld [vmem:[#allocation3 + $0x8] sm:$0xff]  ;;  %v9542_v58 = vadd.f32 %v9526_v53, %v9510_v44  ;;  %v14801_v37 = vpop.f32.mrb[64].mxu0  ;;  %v9536_v53 = vld [vmem:[#allocation3 + $0x70] sm:$0xff] }
 0xe89   :  { %9588 = vst.msk [vmem:[#allocation2 + $0x21] sm:$0xff] %vm72_vm0, %v9571_v23  ;;  %v9570_v15 = vld [vmem:[#allocation3] sm:$0xff]  ;;  %9559 = vst.msk [vmem:[#allocation3 + $0x28] sm:$0xff] %vm72_vm0, %v9543_v49  ;;  %v9513_v21 = vmul.f32 %v14801_v37, %v18399_v51  ;;  %v9457_v48 = vpop.f32.mrb[65].mxu0 }
 0xe8a   :  { %9587 = vst.msk [vmem:[#allocation2 + $0x11] sm:$0xff] %vm72_vm0, %v9570_v15  ;;  %9558 = vst.msk [vmem:[#allocation3 + $0x20] sm:$0xff] %vm72_vm0, %v9542_v58  ;;  %v9512_v43 = vmul.f32 %v9457_v48, %v18401_v28  ;;  %v9631_v58 = vld [vmem:[#allocation2 + $0xa1] sm:$0xff] }
 0xe8b   :  { %v9545_v35 = vadd.f32 %v9529_v18, %v9513_v21 }
 0xe8c   :  { %v9573_v39 = vld [vmem:[#allocation3 + $0x18] sm:$0xff]  ;;  %v9544_v34 = vadd.f32 %v9528_v52, %v9512_v43  ;;  %v14804_v12 = vpop.f32.mrb[66].mxu0 }
 0xe8d   :  { %9590 = vst.msk [vmem:[#allocation2 + $0x41] sm:$0xff] %vm72_vm0, %v9573_v39  ;;  %v9572_v3 = vld [vmem:[#allocation3 + $0x10] sm:$0xff]  ;;  %9561 = vst.msk [vmem:[#allocation3 + $0x38] sm:$0xff] %vm72_vm0, %v9545_v35  ;;  %v9515_v51 = vmul.f32 %v14804_v12, %v18406_v20  ;;  %v9467_v6 = vpop.f32.mrb[67].mxu0 }
 0xe8e   :  { %9589 = vst.msk [vmem:[#allocation2 + $0x31] sm:$0xff] %vm72_vm0, %v9572_v3  ;;  %9560 = vst.msk [vmem:[#allocation3 + $0x30] sm:$0xff] %vm72_vm0, %v9544_v34  ;;  %v9514_v28 = vmul.f32 %v9467_v6, %v18408_v13  ;;  %v9603_v3 = vld [vmem:[#allocation2] sm:$0xff]  ;;  %v12387_v6 = vld [vmem:[%s19208_s9 + $0x50] sm:$0xff] }
 0xe8f   :  { %v9547_v38 = vadd.f32 %v9531_v22, %v9515_v51  ;;  %v12388_v22 = vld [vmem:[%s19208_s9 + $0x58] sm:$0xff] }
 0xe90   :  { %v9575_v59 = vld [vmem:[#allocation3 + $0x28] sm:$0xff]  ;;  %v9546_v47 = vadd.f32 %v9530_v63, %v9514_v28  ;;  %v14807_v2 = vpop.f32.mrb[68].mxu0  ;;  %v15470_v28 = vpack.c.bf16 %v12388_v22, %v12387_v6  ;;  %v12405_v63 = vld [vmem:[%s19208_s9 + $0x60] sm:$0xff]  ;;  %v12447_v22 = vld [vmem:[%s19208_s9 + $0xb0] sm:$0xff] }
 0xe91   :  { %v18578_v62 = vld [vmem:[#allocation2 + $0x21] sm:$0xff]  ;;  %9592 = vst.msk [vmem:[#allocation2 + $0x61] sm:$0xff] %vm72_vm0, %v9575_v59  ;;  %9563 = vst.msk [vmem:[#allocation3 + $0x48] sm:$0xff] %vm72_vm0, %v9547_v38  ;;  %v9517_v33 = vmul.f32 %v14807_v2, %v18413_v8  ;;  %v9477_v56 = vpop.f32.mrb[69].mxu0  ;;  %v18588_v13 = vld [vmem:[#allocation2 + $0x11] sm:$0xff] }
 0xe92   :  { %v9574_v20 = vld [vmem:[#allocation3 + $0x20] sm:$0xff]  ;;  %14825 = vmatprep.mubr.msk.f32.mxu1 %vm72_vm0, %v18578_v62  ;;  %9562 = vst.msk [vmem:[#allocation3 + $0x40] sm:$0xff] %vm72_vm0, %v9546_v47  ;;  %v9516_v17 = vmul.f32 %v9477_v56, %v18415_v1  ;;  %14823 = vmatmul.mubr.msk.f32.vlgmr.msra.gmra.mrb[74].mxu0 %vm72_vm0, %v18588_v13  ;;  %v18681_v38 = vld [vmem:[#allocation2 + $0x10] sm:$0xff]  ;;  %v12406_v59 = vld [vmem:[%s19208_s9 + $0x68] sm:$0xff] }
 0xe93   :  { %9591 = vst.msk [vmem:[#allocation2 + $0x51] sm:$0xff] %vm72_vm0, %v9574_v20  ;;  %v9549_v8 = vadd.f32 %v9533_v31, %v9517_v33  ;;  %v18691_v47 = vld [vmem:[#allocation2 + $0x20] sm:$0xff]  ;;  %v15474_v2 = vpack.c.bf16 %v12406_v59, %v12405_v63  ;;  %v18751_v11 = vld [vmem:[#allocation2 + $0x12] sm:$0xff]  ;;  %v12466_v59 = vld [vmem:[%s19208_s9 + $0xc8] sm:$0xff] }
 0xe94   :  { %v9577_v57 = vld [vmem:[#allocation3 + $0x38] sm:$0xff]  ;;  %v9548_v7 = vadd.f32 %v9532_v32, %v9516_v17  ;;  %v14810_v4 = vpop.f32.mrb[70].mxu0  ;;  %v18614_v40 = vld [vmem:[#allocation2 + $0x41] sm:$0xff] }
 0xe95   :  { %9594 = vst.msk [vmem:[#allocation2 + $0x81] sm:$0xff] %vm72_vm0, %v9577_v57  ;;  %v9576_v36 = vld [vmem:[#allocation3 + $0x30] sm:$0xff]  ;;  %9565 = vst.msk [vmem:[#allocation3 + $0x58] sm:$0xff] %vm72_vm0, %v9549_v8  ;;  %v9519_v1 = vmul.f32 %v14810_v4, %v18420_v25  ;;  %v9487_v16 = vpop.f32.mrb[71].mxu0  ;;  %v18699_v20 = vld [vmem:[#allocation2 + $0x40] sm:$0xff] }
 0xe96   :  { %v18604_v42 = vld [vmem:[#allocation2 + $0x31] sm:$0xff]  ;;  %9593 = vst.msk [vmem:[#allocation2 + $0x71] sm:$0xff] %vm72_vm0, %v9576_v36  ;;  %9564 = vst.msk [vmem:[#allocation3 + $0x50] sm:$0xff] %vm72_vm0, %v9548_v7  ;;  %v9518_v14 = vmul.f32 %v9487_v16, %v18422_v45  ;;  %v12465_v63 = vld [vmem:[%s19208_s9 + $0xc0] sm:$0xff] }
 0xe97   :  { %14826 = vmatmul.mubr.msk.f32.vlgmr.msra.gmra.mrb[50].mxu1 %vm72_vm0, %v18604_v42  ;;  %v9551_v25 = vadd.f32 %v9535_v9, %v9519_v1  ;;  %v18695_v10 = vld [vmem:[#allocation2 + $0x30] sm:$0xff]  ;;  %v12408_v1 = vld [vmem:[%s19208_s9 + $0x78] sm:$0xff]  ;;  %v12425_v9 = vld [vmem:[%s19208_s9 + $0x80] sm:$0xff] }
 0xe98   :  { %14828 = vmatprep.mubr.msk.f32.mxu1 %vm72_vm0, %v18614_v40  ;;  %15461 = vmatpush3.bf16.msra.mxu1 %v18553_v41  ;;  %v9579_v26 = vld [vmem:[#allocation3 + $0x48] sm:$0xff]  ;;  %v9550_v0 = vadd.f32 %v9534_v30, %v9518_v14  ;;  %v14813_v19 = vpop.f32.mrb[72].mxu0  ;;  %v9537_v41 = vld [vmem:[#allocation3 + $0x78] sm:$0xff]  ;;  %v18707_v56 = vld [vmem:[#allocation2 + $0x60] sm:$0xff] }
 0xe99   :  { %15463 = vmatprep.subr.bf16.mxu1 %v15462_v27  ;;  %9596 = vst.msk [vmem:[#allocation2 + $0xc1] sm:$0xff] %vm72_vm0, %v9579_v26  ;;  %v9578_v45 = vld [vmem:[#allocation3 + $0x40] sm:$0xff]  ;;  %9567 = vst.msk [vmem:[#allocation3 + $0x68] sm:$0xff] %vm72_vm0, %v9551_v25  ;;  %v9521_v5 = vmul.f32 %v14813_v19, %v18427_v50  ;;  %v9497_v29 = vpop.f32.mrb[73].mxu0  ;;  %v12407_v36 = vld [vmem:[%s19208_s9 + $0x70] sm:$0xff] }
 0xe9a   :  { %v18622_v55 = vld [vmem:[#allocation2 + $0x51] sm:$0xff]  ;;  %9595 = vst.msk [vmem:[#allocation2 + $0xb1] sm:$0xff] %vm72_vm0, %v9578_v45  ;;  %9566 = vst.msk [vmem:[#allocation3 + $0x60] sm:$0xff] %vm72_vm0, %v9550_v0  ;;  %v9520_v46 = vmul.f32 %v9497_v29, %v18429_v24  ;;  %v18629_v44 = vld [vmem:[#allocation2 + $0x61] sm:$0xff]  ;;  %v15478_v16 = vpack.c.bf16 %v12408_v1, %v12407_v36 }
 0xe9b   :  { %14829 = vmatmul.mubr.msk.f32.gmra.mrb[52].mxu1 %vm72_vm0, %v18622_v55  ;;  %v9553_v49 = vadd.f32 %v9537_v41, %v9521_v5  ;;  %v18703_v33 = vld [vmem:[#allocation2 + $0x50] sm:$0xff]  ;;  %v12426_v14 = vld [vmem:[%s19208_s9 + $0x88] sm:$0xff]  ;;  %v12485_v36 = vld [vmem:[%s19208_s9 + $0xe0] sm:$0xff] }
 0xe9c   :  { %14831 = vmatprep.mubr.msk.f32.mxu1 %vm72_vm0, %v18629_v44  ;;  %15465 = vmatpush3.bf16.msra.mxu1 %v15462_v27  ;;  %v9581_v50 = vld [vmem:[#allocation3 + $0x58] sm:$0xff]  ;;  %v9552_v23 = vadd.f32 %v9536_v53, %v9520_v46  ;;  %v10030_v27 = vld [vmem:[#allocation2 + $0x2] sm:$0xff]  ;;  %v15482_v30 = vpack.c.bf16 %v12426_v14, %v12425_v9  ;;  %v12487_v14 = vld [vmem:[%s19208_s9 + $0xf0] sm:$0xff] }
 0xe9d   :  { %15467 = vmatprep.subr.bf16.mxu1 %v15466_v61  ;;  %9598 = vst.msk [vmem:[#allocation2 + $0xe1] sm:$0xff] %vm72_vm0, %v9581_v50  ;;  %v9580_v37 = vld [vmem:[#allocation3 + $0x50] sm:$0xff]  ;;  %9569 = vst.msk [vmem:[#allocation3 + $0x78] sm:$0xff] %vm72_vm0, %v9553_v49  ;;  %v18761_v25 = vld [vmem:[#allocation2 + $0x22] sm:$0xff] }
 0xe9e   :  { %v18635_v24 = vld [vmem:[#allocation2 + $0x71] sm:$0xff]  ;;  %9597 = vst.msk [vmem:[#allocation2 + $0xd1] sm:$0xff] %vm72_vm0, %v9580_v37  ;;  %9568 = vst.msk [vmem:[#allocation3 + $0x70] sm:$0xff] %vm72_vm0, %v9552_v23  ;;  %v18769_v0 = vld [vmem:[#allocation2 + $0x42] sm:$0xff] }
 0xe9f   :  { %14832 = vmatmul.mubr.msk.f32.gmra.mrb[54].mxu1 %vm72_vm0, %v18635_v24  ;;  %v18711_v31 = vld [vmem:[#allocation2 + $0x70] sm:$0xff]  ;;  %v10038_v45 = vld [vmem:[#allocation2 + $0xa2] sm:$0xff]  ;;  %v12428_v37 = vld [vmem:[%s19208_s9 + $0x98] sm:$0xff] }
 0xea0   :  { %14834 = vmatprep.mubr.msk.f32.mxu1 %vm72_vm0, %v9631_v58  ;;  %v9583_v15 = vld [vmem:[#allocation3 + $0x68] sm:$0xff]  ;;  %v18720_v8 = vld [vmem:[#allocation2 + $0xc0] sm:$0xff]  ;;  %v18765_v26 = vld [vmem:[#allocation2 + $0x32] sm:$0xff] }
 0xea1   :  { %9600 = vst.msk [vmem:[#allocation2 + $0x101] sm:$0xff] %vm72_vm0, %v9583_v15  ;;  %v9582_v21 = vld [vmem:[#allocation3 + $0x60] sm:$0xff]  ;;  %v18643_v48 = vld [vmem:[#allocation2 + $0xb1] sm:$0xff]  ;;  %v12486_v1 = vld [vmem:[%s19208_s9 + $0xe8] sm:$0xff] }
 0xea2   :  { %9599 = vst.msk [vmem:[#allocation2 + $0xf1] sm:$0xff] %vm72_vm0, %v9582_v21  ;;  %v18648_v18 = vld [vmem:[#allocation2 + $0xc1] sm:$0xff]  ;;  %v18716_v17 = vld [vmem:[#allocation2 + $0xb0] sm:$0xff] }
 0xea3   :  { %14835 = vmatmul.mubr.msk.f32.gmra.mrb[56].mxu1 %vm72_vm0, %v18643_v48  ;;  %v18773_v19 = vld [vmem:[#allocation2 + $0x52] sm:$0xff]  ;;  %v18790_v41 = vld [vmem:[#allocation2 + $0xc2] sm:$0xff] }
 0xea4   :  { %14837 = vmatprep.mubr.msk.f32.mxu1 %vm72_vm0, %v18648_v18  ;;  %v9585_v43 = vld [vmem:[#allocation3 + $0x78] sm:$0xff]  ;;  %v18658_v39 = vld [vmem:[#allocation2 + $0xe1] sm:$0xff]  ;;  %v12427_v58 = vld [vmem:[%s19208_s9 + $0x90] sm:$0xff] }
 0xea5   :  { %9602 = vst.msk [vmem:[#allocation2 + $0x121] sm:$0xff] %vm72_vm0, %v9585_v43  ;;  %v9584_v35 = vld [vmem:[#allocation3 + $0x70] sm:$0xff]  ;;  %v18728_v57 = vld [vmem:[#allocation2 + $0xe0] sm:$0xff]  ;;  %v15486_v15 = vpack.c.bf16 %v12428_v37, %v12427_v58  ;;  %v12446_v43 = vld [vmem:[%s19208_s9 + $0xa8] sm:$0xff] }
 0xea6   :  { %v18653_v52 = vld [vmem:[#allocation2 + $0xd1] sm:$0xff]  ;;  %9601 = vst.msk [vmem:[#allocation2 + $0x111] sm:$0xff] %vm72_vm0, %v9584_v35  ;;  %v18798_v49 = vld [vmem:[#allocation2 + $0xe2] sm:$0xff] }
 0xea7   :  { %14838 = vmatmul.mubr.msk.f32.gmra.mrb[58].mxu1 %vm72_vm0, %v18653_v52  ;;  %v18724_v32 = vld [vmem:[#allocation2 + $0xd0] sm:$0xff]  ;;  %v12445_v21 = vld [vmem:[%s19208_s9 + $0xa0] sm:$0xff]  ;;  %v12506_v58 = vld [vmem:[%s19208_s9 + $0x108] sm:$0xff] }
 0xea8   :  { %14840 = vmatprep.mubr.msk.f32.mxu1 %vm72_vm0, %v18658_v39  ;;  %v18666_v12 = vld [vmem:[#allocation2 + $0x101] sm:$0xff]  ;;  %v18781_v5 = vld [vmem:[#allocation2 + $0x72] sm:$0xff]  ;;  %v15490_v35 = vpack.c.bf16 %v12446_v43, %v12445_v21 }
 0xea9   :  { %v18662_v34 = vld [vmem:[#allocation2 + $0xf1] sm:$0xff]  ;;  %v18736_v4 = vld [vmem:[#allocation2 + $0x100] sm:$0xff] }
 0xeaa   :  { %v18732_v7 = vld [vmem:[#allocation2 + $0xf0] sm:$0xff]  ;;  %v18806_v50 = vld [vmem:[#allocation2 + $0x102] sm:$0xff] }
 0xeab   :  { %14841 = vmatmul.mubr.msk.f32.gmra.mrb[60].mxu1 %vm72_vm0, %v18662_v34  ;;  %v18786_v29 = vld [vmem:[#allocation2 + $0xb2] sm:$0xff] }
 0xeac   :  { %14843 = vmatprep.mubr.msk.f32.mxu1 %vm72_vm0, %v18666_v12  ;;  %v18794_v46 = vld [vmem:[#allocation2 + $0xd2] sm:$0xff]  ;;  %v18858_v6 = vld [vmem:[#allocation2 + $0x120] sm:$0xff] }
 0xead   :  { %v18670_v51 = vld [vmem:[#allocation2 + $0x111] sm:$0xff]  ;;  %v18954_v9 = vld [vmem:[#allocation2 + $0x122] sm:$0xff] }
 0xeae   :  { %v18740_v54 = vld [vmem:[#allocation2 + $0x110] sm:$0xff] }
 0xeaf   :  { %14844 = vmatmul.mubr.msk.f32.gmra.mrb[62].mxu1 %vm72_vm0, %v18670_v51  ;;  %v18802_v53 = vld [vmem:[#allocation2 + $0xf2] sm:$0xff] }
 0xeb0   :  { %14854 = vmatprep.mubr.msk.f32.mxu1 %vm72_vm0, %v9603_v3  ;;  %v18810_v23 = vld [vmem:[#allocation2 + $0x112] sm:$0xff]  ;;  %v18840_v3 = vld [vmem:[#allocation2 + $0x80] sm:$0xff] }
 0xeb3   :  { %14855 = vmatmul.mubr.msk.f32.vlgmr.msra.gmra.mrb[64].mxu1 %vm72_vm0, %v18681_v38 }
 0xeb4   :  { %14857 = vmatprep.mubr.msk.f32.mxu1 %vm72_vm0, %v18691_v47  ;;  %15469 = vmatpush3.bf16.msra.mxu1 %v15466_v61  ;;  %v18777_v61 = vld [vmem:[#allocation2 + $0x62] sm:$0xff] }
 0xeb5   :  { %15471 = vmatprep.subr.bf16.mxu1 %v15470_v28 }
 0xeb7   :  { %14858 = vmatmul.mubr.msk.f32.gmra.mrb[50].mxu1 %vm72_vm0, %v18695_v10 }
 0xeb8   :  { %14860 = vmatprep.mubr.msk.f32.mxu1 %vm72_vm0, %v18699_v20  ;;  %15473 = vmatpush3.bf16.msra.mxu1 %v15470_v28  ;;  %v12448_v28 = vld [vmem:[%s19208_s9 + $0xb8] sm:$0xff] }
 0xeb9   :  { %15475 = vmatprep.subr.bf16.mxu1 %v15474_v2 }
 0xebb   :  { %14861 = vmatmul.mubr.msk.f32.gmra.mrb[52].mxu1 %vm72_vm0, %v18703_v33 }
 0xebc   :  { %14863 = vmatprep.mubr.msk.f32.mxu1 %vm72_vm0, %v18707_v56 }
 0xebf   :  { %14864 = vmatmul.mubr.msk.f32.gmra.mrb[54].mxu1 %vm72_vm0, %v18711_v31 }
 0xec0   :  { %14866 = vmatprep.mubr.msk.f32.mxu1 %vm72_vm0, %v9611_v60  ;;  %v18906_v60 = vld [vmem:[#allocation2 + $0x121] sm:$0xff] }
 0xec3   :  { %14867 = vmatmul.mubr.msk.f32.gmra.mrb[56].mxu1 %vm72_vm0, %v18716_v17 }
 0xec4   :  { %14869 = vmatprep.mubr.msk.f32.mxu1 %vm72_vm0, %v18720_v8 }
 0xec7   :  { %14870 = vmatmul.mubr.msk.f32.gmra.mrb[58].mxu1 %vm72_vm0, %v18724_v32 }
 0xec8   :  { %14872 = vmatprep.mubr.msk.f32.mxu1 %vm72_vm0, %v18728_v57 }
 0xecb   :  { %14873 = vmatmul.mubr.msk.f32.gmra.mrb[60].mxu1 %vm72_vm0, %v18732_v7 }
 0xecc   :  { %14875 = vmatprep.mubr.msk.f32.mxu1 %vm72_vm0, %v18736_v4 }
 0xecf   :  { %14876 = vmatmul.mubr.msk.f32.gmra.mrb[62].mxu1 %vm72_vm0, %v18740_v54 }
 0xed0   :  { %14886 = vmatprep.mubr.msk.f32.mxu1 %vm72_vm0, %v10030_v27 }
 0xed3   :  { %14887 = vmatmul.mubr.msk.f32.vlgmr.msra.gmra.mrb[64].mxu1 %vm72_vm0, %v18751_v11 }
 0xed4   :  { %14889 = vmatprep.mubr.msk.f32.mxu1 %vm72_vm0, %v18761_v25  ;;  %15477 = vmatpush3.bf16.msra.mxu1 %v15474_v2  ;;  %v15498_v2 = vpack.c.bf16 %v12466_v59, %v12465_v63 }
 0xed5   :  { %15479 = vmatprep.subr.bf16.mxu1 %v15478_v16 }
 0xed7   :  { %14890 = vmatmul.mubr.msk.f32.gmra.mrb[50].mxu1 %vm72_vm0, %v18765_v26 }
 0xed8   :  { %14892 = vmatprep.mubr.msk.f32.mxu1 %vm72_vm0, %v18769_v0  ;;  %15481 = vmatpush3.bf16.msra.mxu1 %v15478_v16  ;;  %v15506_v16 = vpack.c.bf16 %v12486_v1, %v12485_v36 }
 0xed9   :  { %15483 = vmatprep.subr.bf16.mxu1 %v15482_v30 }
 0xedb   :  { %14893 = vmatmul.mubr.msk.f32.gmra.mrb[52].mxu1 %vm72_vm0, %v18773_v19 }
 0xedc   :  { %14895 = vmatprep.mubr.msk.f32.mxu1 %vm72_vm0, %v18777_v61 }
 0xedf   :  { %14896 = vmatmul.mubr.msk.f32.gmra.mrb[54].mxu1 %vm72_vm0, %v18781_v5 }
 0xee0   :  { %14898 = vmatprep.mubr.msk.f32.mxu1 %vm72_vm0, %v10038_v45 }
 0xee3   :  { %14899 = vmatmul.mubr.msk.f32.gmra.mrb[56].mxu1 %vm72_vm0, %v18786_v29 }
 0xee4   :  { %14901 = vmatprep.mubr.msk.f32.mxu1 %vm72_vm0, %v18790_v41 }
 0xee7   :  { %14902 = vmatmul.mubr.msk.f32.gmra.mrb[58].mxu1 %vm72_vm0, %v18794_v46 }
 0xee8   :  { %14904 = vmatprep.mubr.msk.f32.mxu1 %vm72_vm0, %v18798_v49 }
 0xeeb   :  { %14905 = vmatmul.mubr.msk.f32.gmra.mrb[60].mxu1 %vm72_vm0, %v18802_v53 }
 0xeec   :  { %14907 = vmatprep.mubr.msk.f32.mxu1 %vm72_vm0, %v18806_v50 }
 0xeef   :  { %14908 = vmatmul.mubr.msk.f32.gmra.mrb[62].mxu1 %vm72_vm0, %v18810_v23 }
 0xef0   :  { %14918 = vmatprep.mubr.msk.f32.mxu1 %vm72_vm0, %v18681_v38  ;;  %v15494_v38 = vpack.c.bf16 %v12448_v28, %v12447_v22  ;;  %v11668_v22 = vld [vmem:[%s19199_s0 + $0x30] sm:$0xff] }
 0xef3   :  { %14919 = vmatmul.mubr.msk.f32.vlgmr.msra.gmra.mrb[64].mxu1 %vm72_vm0, %v18691_v47 }
 0xef4   :  { %14921 = vmatprep.mubr.msk.f32.mxu1 %vm72_vm0, %v18695_v10  ;;  %15485 = vmatpush3.bf16.msra.mxu1 %v15482_v30  ;;  %v12488_v30 = vld [vmem:[%s19208_s9 + $0xf8] sm:$0xff] }
 0xef5   :  { %15487 = vmatprep.subr.bf16.mxu1 %v15486_v15  ;;  %v15510_v45 = vpack.c.bf16 %v12488_v30, %v12487_v14  ;;  %v11672_v14 = vld [vmem:[%s19199_s0 + $0x50] sm:$0xff] }
 0xef7   :  { %14922 = vmatmul.mubr.msk.f32.gmra.mrb[50].mxu1 %vm72_vm0, %v18699_v20 }
 0xef8   :  { %14924 = vmatprep.mubr.msk.f32.mxu1 %vm72_vm0, %v18703_v33  ;;  %15489 = vmatpush3.bf16.msra.mxu1 %v15486_v15 }
 0xef9   :  { %15491 = vmatprep.subr.bf16.mxu1 %v15490_v35 }
 0xefb   :  { %14925 = vmatmul.mubr.msk.f32.gmra.mrb[52].mxu1 %vm72_vm0, %v18707_v56 }
 0xefc   :  { %14927 = vmatprep.mubr.msk.f32.mxu1 %vm72_vm0, %v18711_v31 }
 0xeff   :  { %14928 = vmatmul.mubr.msk.f32.gmra.mrb[54].mxu1 %vm72_vm0, %v18840_v3 }
 0xf00   :  { %14930 = vmatprep.mubr.msk.f32.mxu1 %vm72_vm0, %v18716_v17  ;;  %v12468_v17 = vld [vmem:[%s19208_s9 + $0xd8] sm:$0xff] }
 0xf03   :  { %14931 = vmatmul.mubr.msk.f32.gmra.mrb[56].mxu1 %vm72_vm0, %v18720_v8 }
 0xf04   :  { %14933 = vmatprep.mubr.msk.f32.mxu1 %vm72_vm0, %v18724_v32 }
 0xf07   :  { %14934 = vmatmul.mubr.msk.f32.gmra.mrb[58].mxu1 %vm72_vm0, %v18728_v57 }
 0xf08   :  { %14936 = vmatprep.mubr.msk.f32.mxu1 %vm72_vm0, %v18732_v7 }
 0xf0b   :  { %14937 = vmatmul.mubr.msk.f32.gmra.mrb[60].mxu1 %vm72_vm0, %v18736_v4 }
 0xf0c   :  { %14939 = vmatprep.mubr.msk.f32.mxu1 %vm72_vm0, %v18740_v54 }
 0xf0f   :  { %14940 = vmatmul.mubr.msk.f32.gmra.mrb[62].mxu1 %vm72_vm0, %v18858_v6 }
 0xf10   :  { %14950 = vmatprep.mubr.msk.f32.mxu1 %vm72_vm0, %v18588_v13  ;;  %v18888_v13 = vld [vmem:[#allocation2 + $0x81] sm:$0xff] }
 0xf13   :  { %14951 = vmatmul.mubr.msk.f32.vlgmr.msra.gmra.mrb[64].mxu1 %vm72_vm0, %v18578_v62 }
 0xf14   :  { %14953 = vmatprep.mubr.msk.f32.mxu1 %vm72_vm0, %v18604_v42  ;;  %15493 = vmatpush3.bf16.msra.mxu1 %v15490_v35  ;;  %v11669_v35 = vld [vmem:[%s19199_s0 + $0x38] sm:$0xff] }
 0xf15   :  { %15495 = vmatprep.subr.bf16.mxu1 %v15494_v38 }
 0xf17   :  { %14954 = vmatmul.mubr.msk.f32.gmra.mrb[50].mxu1 %vm72_vm0, %v18614_v40 }
 0xf18   :  { %14956 = vmatprep.mubr.msk.f32.mxu1 %vm72_vm0, %v18622_v55  ;;  %15497 = vmatpush3.bf16.msra.mxu1 %v15494_v38 }
 0xf19   :  { %15499 = vmatprep.subr.bf16.mxu1 %v15498_v2 }
 0xf1b   :  { %14957 = vmatmul.mubr.msk.f32.gmra.mrb[52].mxu1 %vm72_vm0, %v18629_v44 }
 0xf1c   :  { %14959 = vmatprep.mubr.msk.f32.mxu1 %vm72_vm0, %v18635_v24 }
 0xf1f   :  { %14960 = vmatmul.mubr.msk.f32.gmra.mrb[54].mxu1 %vm72_vm0, %v18888_v13 }
 0xf20   :  { %14962 = vmatprep.mubr.msk.f32.mxu1 %vm72_vm0, %v18643_v48  ;;  %v12467_v48 = vld [vmem:[%s19208_s9 + $0xd0] sm:$0xff] }
 0xf21   :  { %v15502_v27 = vpack.c.bf16 %v12468_v17, %v12467_v48  ;;  %v11670_v48 = vld [vmem:[%s19199_s0 + $0x40] sm:$0xff] }
 0xf23   :  { %14963 = vmatmul.mubr.msk.f32.gmra.mrb[56].mxu1 %vm72_vm0, %v18648_v18 }
 0xf24   :  { %14965 = vmatprep.mubr.msk.f32.mxu1 %vm72_vm0, %v18653_v52 }
 0xf27   :  { %14966 = vmatmul.mubr.msk.f32.gmra.mrb[58].mxu1 %vm72_vm0, %v18658_v39 }
 0xf28   :  { %14968 = vmatprep.mubr.msk.f32.mxu1 %vm72_vm0, %v18662_v34 }
 0xf2b   :  { %14969 = vmatmul.mubr.msk.f32.gmra.mrb[60].mxu1 %vm72_vm0, %v18666_v12 }
 0xf2c   :  { %14971 = vmatprep.mubr.msk.f32.mxu1 %vm72_vm0, %v18670_v51 }
 0xf2f   :  { %14972 = vmatmul.mubr.msk.f32.gmra.mrb[62].mxu1 %vm72_vm0, %v18906_v60 }
 0xf30   :  { %14982 = vmatprep.mubr.msk.f32.mxu1 %vm72_vm0, %v18751_v11  ;;  %v18936_v11 = vld [vmem:[#allocation2 + $0x82] sm:$0xff] }
 0xf33   :  { %14983 = vmatmul.mubr.msk.f32.vlgmr.msra.gmra.mrb[64].mxu1 %vm72_vm0, %v18761_v25 }
 0xf34   :  { %14985 = vmatprep.mubr.msk.f32.mxu1 %vm72_vm0, %v18765_v26  ;;  %15501 = vmatpush3.bf16.msra.mxu1 %v15498_v2  ;;  %v11671_v2 = vld [vmem:[%s19199_s0 + $0x48] sm:$0xff] }
 0xf35   :  { %15503 = vmatprep.subr.bf16.mxu1 %v15502_v27 }
 0xf37   :  { %14986 = vmatmul.mubr.msk.f32.gmra.mrb[50].mxu1 %vm72_vm0, %v18769_v0 }
 0xf38   :  { %14988 = vmatprep.mubr.msk.f32.mxu1 %vm72_vm0, %v18773_v19  ;;  %15505 = vmatpush3.bf16.msra.mxu1 %v15502_v27 }
 0xf39   :  { %15507 = vmatprep.subr.bf16.mxu1 %v15506_v16 }
 0xf3b   :  { %14989 = vmatmul.mubr.msk.f32.gmra.mrb[52].mxu1 %vm72_vm0, %v18777_v61 }
 0xf3c   :  { %14991 = vmatprep.mubr.msk.f32.mxu1 %vm72_vm0, %v18781_v5 }
 0xf3f   :  { %14992 = vmatmul.mubr.msk.f32.gmra.mrb[54].mxu1 %vm72_vm0, %v18936_v11 }
 0xf40   :  { %14994 = vmatprep.mubr.msk.f32.mxu1 %vm72_vm0, %v18786_v29  ;;  %v12505_v29 = vld [vmem:[%s19208_s9 + $0x100] sm:$0xff] }
 0xf41   :  { %v15514_v37 = vpack.c.bf16 %v12506_v58, %v12505_v29 }
 0xf43   :  { %14995 = vmatmul.mubr.msk.f32.gmra.mrb[56].mxu1 %vm72_vm0, %v18790_v41 }
 0xf44   :  { %14997 = vmatprep.mubr.msk.f32.mxu1 %vm72_vm0, %v18794_v46 }
 0xf47   :  { %14998 = vmatmul.mubr.msk.f32.gmra.mrb[58].mxu1 %vm72_vm0, %v18798_v49 }
 0xf48   :  { %15000 = vmatprep.mubr.msk.f32.mxu1 %vm72_vm0, %v18802_v53 }
 0xf4b   :  { %15001 = vmatmul.mubr.msk.f32.gmra.mrb[60].mxu1 %vm72_vm0, %v18806_v50 }
 0xf4c   :  { %15003 = vmatprep.mubr.msk.f32.mxu1 %vm72_vm0, %v18810_v23 }
 0xf4f   :  { %15004 = vmatmul.mubr.msk.f32.gmra.mrb[62].mxu1 %vm72_vm0, %v18954_v9 }
 0xf50   :  { %15014 = vmatprep.mubr.msk.f32.mxu1 %vm72_vm0, %v18691_v47  ;;  %v10957_v47 = vld [vmem:[#allocation2 + $0x90] sm:$0xff] }
 0xf53   :  { %15015 = vmatmul.mubr.msk.f32.vlgmr.msra.gmra.mrb[64].mxu1 %vm72_vm0, %v18695_v10 }
 0xf54   :  { %15017 = vmatprep.mubr.msk.f32.mxu1 %vm72_vm0, %v18699_v20  ;;  %15509 = vmatpush3.bf16.msra.mxu1 %v15506_v16  ;;  %v11673_v16 = vld [vmem:[%s19199_s0 + $0x58] sm:$0xff] }
 0xf55   :  { %15511 = vmatprep.subr.bf16.mxu1 %v15510_v45 }
 0xf57   :  { %15018 = vmatmul.mubr.msk.f32.gmra.mrb[50].mxu1 %vm72_vm0, %v18703_v33  ;;  %v10965_v33 = vld [vmem:[#allocation2 + $0x130] sm:$0xff] }
 0xf58   :  { %15020 = vmatprep.mubr.msk.f32.mxu1 %vm72_vm0, %v18707_v56  ;;  %15513 = vmatpush3.bf16.msra.mxu1 %v15510_v45  ;;  %v12507_v56 = vld [vmem:[%s19208_s9 + $0x110] sm:$0xff] }
 0xf59   :  { %15515 = vmatprep.subr.bf16.mxu1 %v15514_v37 }
 0xf5b   :  { %15021 = vmatmul.mubr.msk.f32.gmra.mrb[52].mxu1 %vm72_vm0, %v18711_v31  ;;  %v12508_v31 = vld [vmem:[%s19208_s9 + $0x118] sm:$0xff] }
 0xf5c   :  { %15023 = vmatprep.mubr.msk.f32.mxu1 %vm72_vm0, %v18840_v3 }
 0xf5f   :  { %15024 = vmatmul.mubr.msk.f32.gmra.mrb[54].mxu1 %vm72_vm0, %v10957_v47 }
 0xf60   :  { %15026 = vmatprep.mubr.msk.f32.mxu1 %vm72_vm0, %v18720_v8  ;;  %v15518_v8 = vpack.c.bf16 %v12508_v31, %v12507_v56 }
 0xf63   :  { %15027 = vmatmul.mubr.msk.f32.gmra.mrb[56].mxu1 %vm72_vm0, %v18724_v32 }
 0xf64   :  { %15029 = vmatprep.mubr.msk.f32.mxu1 %vm72_vm0, %v18728_v57 }
 0xf65   :  { %v14824_v10 = vpop.f32.mrb[74].mxu0 }
 0xf66   :  { %v9758_v20 = vpop.f32.mrb[75].mxu0 }
 0xf67   :  { %15030 = vmatmul.mubr.msk.f32.gmra.mrb[58].mxu1 %vm72_vm0, %v18732_v7  ;;  %v11665_v7 = vld [vmem:[%s19199_s0 + $0x18] sm:$0xff] }
 0xf68   :  { %15032 = vmatprep.mubr.msk.f32.mxu1 %vm72_vm0, %v18736_v4 }
 0xf6b   :  { %15033 = vmatmul.mubr.msk.f32.gmra.mrb[60].mxu1 %vm72_vm0, %v18740_v54 }
 0xf6c   :  { %15035 = vmatprep.mubr.msk.f32.mxu1 %vm72_vm0, %v18858_v6 }
 0xf6f   :  { %15036 = vmatmul.mubr.msk.f32.gmra.mrb[62].mxu1 %vm72_vm0, %v10965_v33 }
 0xf70   :  { %15046 = vmatprep.mubr.msk.f32.mxu1 %vm72_vm0, %v18578_v62  ;;  %v11187_v62 = vld [vmem:[#allocation2 + $0x91] sm:$0xff] }
 0xf73   :  { %15047 = vmatmul.mubr.msk.f32.vlgmr.msra.gmra.mrb[64].mxu1 %vm72_vm0, %v18604_v42  ;;  %v11195_v42 = vld [vmem:[#allocation2 + $0x131] sm:$0xff] }
 0xf74   :  { %15049 = vmatprep.mubr.msk.f32.mxu1 %vm72_vm0, %v18614_v40  ;;  %15517 = vmatpush3.bf16.msra.mxu1 %v15514_v37  ;;  %v11417_v40 = vld [vmem:[#allocation2 + $0x92] sm:$0xff]  ;;  %v11675_v37 = vld [vmem:[%s19199_s0 + $0x68] sm:$0xff] }
 0xf75   :  { %15519 = vmatprep.subr.bf16.mxu1 %v15518_v8 }
 0xf77   :  { %15050 = vmatmul.mubr.msk.f32.gmra.mrb[50].mxu1 %vm72_vm0, %v18622_v55  ;;  %v11425_v55 = vld [vmem:[#allocation2 + $0x132] sm:$0xff] }
 0xf78   :  { %15052 = vmatprep.mubr.msk.f32.mxu1 %vm72_vm0, %v18629_v44  ;;  %15521 = vmatpush3.bf16.msra.mxu1 %v15518_v8  ;;  %v19069_v44 = vld [vmem:[%s19209_s10] ss:$0 sm:$0xff] }
 0xf7b   :  { %15053 = vmatmul.mubr.msk.f32.gmra.mrb[52].mxu1 %vm72_vm0, %v18635_v24 }
 0xf7c   :  { %15055 = vmatprep.mubr.msk.f32.mxu1 %vm72_vm0, %v18888_v13 }
 0xf7f   :  { %15056 = vmatmul.mubr.msk.f32.gmra.mrb[54].mxu1 %vm72_vm0, %v11187_v62  ;;  %v11677_v62 = vld [vmem:[%s19199_s0 + $0x78] sm:$0xff] }
 0xf80   :  { %15058 = vmatprep.mubr.msk.f32.mxu1 %vm72_vm0, %v18648_v18 }
 0xf83   :  { %15059 = vmatmul.mubr.msk.f32.gmra.mrb[56].mxu1 %vm72_vm0, %v18653_v52 }
 0xf84   :  { %15061 = vmatprep.mubr.msk.f32.mxu1 %vm72_vm0, %v18658_v39  ;;  %v11663_v39 = vld [vmem:[%s19199_s0 + $0x8] sm:$0xff] }
 0xf87   :  { %15062 = vmatmul.mubr.msk.f32.gmra.mrb[58].mxu1 %vm72_vm0, %v18662_v34 }
 0xf88   :  { %15064 = vmatprep.mubr.msk.f32.mxu1 %vm72_vm0, %v18666_v12 }
 0xf8b   :  { %15065 = vmatmul.mubr.msk.f32.gmra.mrb[60].mxu1 %vm72_vm0, %v18670_v51  ;;  %v11662_v51 = vld [vmem:[%s19199_s0] sm:$0xff] }
 0xf8c   :  { %15067 = vmatprep.mubr.msk.f32.mxu1 %vm72_vm0, %v18906_v60 }
 0xf8f   :  { %15068 = vmatmul.mubr.msk.f32.gmra.mrb[62].mxu1 %vm72_vm0, %v11195_v42 }
 0xf90   :  { %15078 = vmatprep.mubr.msk.f32.mxu1 %vm72_vm0, %v18761_v25 }
 0xf93   :  { %15079 = vmatmul.mubr.msk.f32.vlgmr.msra.gmra.mrb[64].mxu1 %vm72_vm0, %v18765_v26  ;;  %v11664_v26 = vld [vmem:[%s19199_s0 + $0x10] sm:$0xff] }
 0xf94   :  { %15081 = vmatprep.mubr.msk.f32.mxu1 %vm72_vm0, %v18769_v0 }
 0xf97   :  { %15082 = vmatmul.mubr.msk.f32.gmra.mrb[50].mxu1 %vm72_vm0, %v18773_v19 }
 0xf98   :  { %15084 = vmatprep.mubr.msk.f32.mxu1 %vm72_vm0, %v18777_v61 }
 0xf9b   :  { %15085 = vmatmul.mubr.msk.f32.gmra.mrb[52].mxu1 %vm72_vm0, %v18781_v5 }
 0xf9c   :  { %15087 = vmatprep.mubr.msk.f32.mxu1 %vm72_vm0, %v18936_v11 }
 0xf9f   :  { %15088 = vmatmul.mubr.msk.f32.gmra.mrb[54].mxu1 %vm72_vm0, %v11417_v40 }
 0xfa0   :  { %15090 = vmatprep.mubr.msk.f32.mxu1 %vm72_vm0, %v18790_v41 }
 0xfa3   :  { %15091 = vmatmul.mubr.msk.f32.gmra.mrb[56].mxu1 %vm72_vm0, %v18794_v46  ;;  %v11667_v46 = vld [vmem:[%s19199_s0 + $0x28] sm:$0xff] }
 0xfa4   :  { %15093 = vmatprep.mubr.msk.f32.mxu1 %vm72_vm0, %v18798_v49 }
 0xfa7   :  { %15094 = vmatmul.mubr.msk.f32.gmra.mrb[58].mxu1 %vm72_vm0, %v18802_v53 }
 0xfa8   :  { %15096 = vmatprep.mubr.msk.f32.mxu1 %vm72_vm0, %v18806_v50  ;;  %v11666_v50 = vld [vmem:[%s19199_s0 + $0x20] sm:$0xff] }
 0xfab   :  { %15097 = vmatmul.mubr.msk.f32.gmra.mrb[60].mxu1 %vm72_vm0, %v18810_v23 }
 0xfac   :  { %15099 = vmatprep.mubr.msk.f32.mxu1 %vm72_vm0, %v18954_v9 }
 0xfaf   :  { %15100 = vmatmul.mubr.msk.f32.gmra.mrb[62].mxu1 %vm72_vm0, %v11425_v55  ;;  %v11676_v55 = vld [vmem:[%s19199_s0 + $0x70] sm:$0xff] }
0x1066   :  { %v15080_v24 = vpop.f32.mrb[64].mxu1 }
0x1067   :  { %v15542_v18 = vadd.f32 %v15080_v24, %v14824_v10  ;;  %v11545_v52 = vpop.f32.mrb[65].mxu1 }
0x1068   :  { %v15543_v34 = vadd.f32 %v11545_v52, %v9758_v20  ;;  %v11674_v20 = vld [vmem:[%s19199_s0 + $0x60] sm:$0xff] }
0x1069   :  { %v11647_v12 = vadd.f32 %v15542_v18, %v19069_v44 }
0x106a   :  { %v11646_v32 = vadd.f32 %v15543_v34, %v19069_v44  ;;  %v15083_v57 = vpop.f32.mrb[50].mxu1 }
0x106b   :  { %v11679_v4 = vadd.f32 %v11663_v39, %v11647_v12  ;;  %v11649_v54 = vadd.f32 %v15083_v57, %v19069_v44  ;;  %v11555_v25 = vpop.f32.mrb[51].mxu1 }
0x106c   :  { %v11678_v0 = vadd.f32 %v11662_v51, %v11646_v32  ;;  %v11648_v19 = vadd.f32 %v19069_v44, %v11555_v25 }
0x106d   :  { %11695 = vst.msk [vmem:[%s19212_s13 + $0x8] sm:$0xff] %vm72_vm0, %v11679_v4  ;;  %v11681_v61 = vadd.f32 %v11665_v7, %v11649_v54 }
0x106e   :  { %11694 = vst.msk [vmem:[%s19212_s13] sm:$0xff] %vm72_vm0, %v11678_v0  ;;  %v11680_v5 = vadd.f32 %v11664_v26, %v11648_v19  ;;  %v15086_v41 = vpop.f32.mrb[52].mxu1 }
0x106f   :  { %11697 = vst.msk [vmem:[%s19212_s13 + $0x18] sm:$0xff] %vm72_vm0, %v11681_v61  ;;  %v11651_v49 = vadd.f32 %v15086_v41, %v19069_v44  ;;  %v11565_v53 = vpop.f32.mrb[53].mxu1 }
0x1070   :  { %11696 = vst.msk [vmem:[%s19212_s13 + $0x10] sm:$0xff] %vm72_vm0, %v11680_v5  ;;  %v11650_v23 = vadd.f32 %v19069_v44, %v11565_v53 }
0x1071   :  { %v11683_v15 = vadd.f32 %v11667_v46, %v11651_v49 }
0x1072   :  { %v11682_v21 = vadd.f32 %v11666_v50, %v11650_v23  ;;  %v15089_v43 = vpop.f32.mrb[54].mxu1 }
0x1073   :  { %11699 = vst.msk [vmem:[%s19212_s13 + $0x28] sm:$0xff] %vm72_vm0, %v11683_v15  ;;  %v11653_v3 = vadd.f32 %v15089_v43, %v19069_v44  ;;  %v11575_v6 = vpop.f32.mrb[55].mxu1 }
0x1074   :  { %11698 = vst.msk [vmem:[%s19212_s13 + $0x20] sm:$0xff] %vm72_vm0, %v11682_v21  ;;  %v11652_v28 = vadd.f32 %v19069_v44, %v11575_v6 }
0x1075   :  { %v11685_v38 = vadd.f32 %v11669_v35, %v11653_v3 }
0x1076   :  { %v11684_v63 = vadd.f32 %v11668_v22, %v11652_v28  ;;  %v15092_v59 = vpop.f32.mrb[56].mxu1 }
0x1077   :  { %11701 = vst.msk [vmem:[%s19212_s13 + $0x38] sm:$0xff] %vm72_vm0, %v11685_v38  ;;  %v11655_v13 = vadd.f32 %v15092_v59, %v19069_v44  ;;  %v11585_v60 = vpop.f32.mrb[57].mxu1 }
0x1078   :  { %11700 = vst.msk [vmem:[%s19212_s13 + $0x30] sm:$0xff] %vm72_vm0, %v11684_v63  ;;  %v11654_v17 = vadd.f32 %v19069_v44, %v11585_v60 }
0x1079   :  { %v11687_v27 = vadd.f32 %v11671_v2, %v11655_v13 }
0x107a   :  { %v11686_v36 = vadd.f32 %v11670_v48, %v11654_v17  ;;  %v15095_v1 = vpop.f32.mrb[58].mxu1 }
0x107b   :  { %11703 = vst.msk [vmem:[%s19212_s13 + $0x48] sm:$0xff] %vm72_vm0, %v11687_v27  ;;  %v11657_v11 = vadd.f32 %v15095_v1, %v19069_v44  ;;  %v11595_v9 = vpop.f32.mrb[59].mxu1 }
0x107c   :  { %11702 = vst.msk [vmem:[%s19212_s13 + $0x40] sm:$0xff] %vm72_vm0, %v11686_v36  ;;  %v11656_v30 = vadd.f32 %v19069_v44, %v11595_v9 }
0x107d   :  { %v11689_v45 = vadd.f32 %v11673_v16, %v11657_v11 }
0x107e   :  { %v11688_v29 = vadd.f32 %v11672_v14, %v11656_v30  ;;  %v15098_v58 = vpop.f32.mrb[60].mxu1 }
0x107f   :  { %11705 = vst.msk [vmem:[%s19212_s13 + $0x58] sm:$0xff] %vm72_vm0, %v11689_v45  ;;  %v11659_v47 = vadd.f32 %v15098_v58, %v19069_v44  ;;  %v11605_v10 = vpop.f32.mrb[61].mxu1 }
0x1080   :  { %11704 = vst.msk [vmem:[%s19212_s13 + $0x50] sm:$0xff] %vm72_vm0, %v11688_v29  ;;  %v11658_v33 = vadd.f32 %v19069_v44, %v11605_v10 }
0x1081   :  { %v11691_v56 = vadd.f32 %v11675_v37, %v11659_v47 }
0x1082   :  { %v11690_v31 = vadd.f32 %v11674_v20, %v11658_v33  ;;  %v15101_v8 = vpop.f32.mrb[62].mxu1 }
0x1083   :  { %11707 = vst.msk [vmem:[%s19212_s13 + $0x68] sm:$0xff] %vm72_vm0, %v11691_v56  ;;  %v11661_v42 = vadd.f32 %v15101_v8, %v19069_v44  ;;  %v11615_v40 = vpop.f32.mrb[63].mxu1 }
0x1084   :  { %11706 = vst.msk [vmem:[%s19212_s13 + $0x60] sm:$0xff] %vm72_vm0, %v11690_v31  ;;  %v11660_v24 = vadd.f32 %v19069_v44, %v11615_v40 }
0x1085   :  { %v11693_v18 = vadd.f32 %v11677_v62, %v11661_v42 }
0x1086   :  { %v11692_v52 = vadd.f32 %v11676_v55, %v11660_v24 }
0x1087   :  { %11709 = vst.msk [vmem:[%s19212_s13 + $0x78] sm:$0xff] %vm72_vm0, %v11693_v18 }
0x1088   :  { %11708 = vst.msk [vmem:[%s19212_s13 + $0x70] sm:$0xff] %vm72_vm0, %v11692_v52 }
0x1089   :  { %11714 = vsyncpa [#allocation5], 1 }
0x108a   :  { %11715 = vsyncpa [#allocation7], 1 }

</bundles_post_ra>
